<compile_context>
chip_gen: v6e
topology: v6e:2x2x1
jax: 0.10.0
libtpu: 0.0.40
codegen_flags: <defaults>
</compile_context>

<pallas_src>
import functools

import jax
import jax.numpy as jnp
from jax.experimental import pallas as pl
from jax.experimental.pallas import tpu as pltpu


_LANE = 128
_LAYER_DIMS = [(2048, 4096), (4096, 2048), (2048, 1024), (1024, 512), (512, 256), (256, 6)]
_MAX_W_BLOCK_BYTES = 4 * 1024 * 1024     # per weight block; double-buffered -> 8 MB
_VMEM_LIMIT_BYTES = 32 * 1024 * 1024


# --------------------------- streamed kernel for the two big layers ---------------------------

def _linear_kernel(x_ref, w_ref, b_ref, o_ref, *, apply_relu):
    """One (M, tn) output slab: full-K bf16 matmul (f32 accumulate) + f32 bias (+ optional ReLU)."""
    x = x_ref[...].astype(jnp.bfloat16)                      # cast on VPU; MXU is bf16-native
    r = jnp.dot(x, w_ref[...], preferred_element_type=jnp.float32)
    r = r + b_ref[...]
    if apply_relu:
        r = jnp.maximum(r, 0.0)
    o_ref[...] = r.astype(o_ref.dtype)


def _pick_tn(K, N, itemsize):
    """Largest lane-aligned tn whose (K, tn) weight block fits the byte budget, preferring
    >=2 N-blocks so the 'parallel' N axis can shard across both v7x TensorCores."""
    fallback = None
    for tn in (2048, 1024, 512, 256, 128):
        if N % tn == 0 and K * tn * itemsize <= _MAX_W_BLOCK_BYTES:
            if N // tn >= 2:
                return tn
            if fallback is None:
                fallback = tn
    return fallback if fallback is not None else N


def linear_streamed(x, w, b2, *, apply_relu):
    """x: (M, K) f32, w: (K, N) bf16, b2: (1, N) f32 -> (M, N) f32; weights streamed in N blocks."""
    M, K = x.shape
    Kw, N = w.shape
    assert K == Kw and b2.shape == (1, N)
    assert M % 8 == 0, "batch must be a multiple of the f32 sublane tile (8)"
    assert K % _LANE == 0 and N % _LANE == 0

    tn = _pick_tn(K, N, w.dtype.itemsize)
    kernel = functools.partial(_linear_kernel, apply_relu=apply_relu)

    return pl.pallas_call(
        kernel,
        out_shape=jax.ShapeDtypeStruct((M, N), jnp.float32),
        grid=(N // tn,),
        in_specs=[
            pl.BlockSpec((M, K), lambda j: (0, 0)),    # activations: resident across N blocks
            pl.BlockSpec((K, tn), lambda j: (0, j)),   # bf16 weights: streamed, full K per block
            pl.BlockSpec((1, tn), lambda j: (0, j)),   # bias slab (f32, tiny)
        ],
        out_specs=pl.BlockSpec((M, tn), lambda j: (0, j)),   # lane-dense: tn % 128 == 0
        compiler_params=pltpu.CompilerParams(
            dimension_semantics=("parallel",),
            vmem_limit_bytes=_VMEM_LIMIT_BYTES,
        ),
    )(x, w, b2)


# ------------------------------ fused tail kernel (layers 3-6) ------------------------------

def _tail_kernel(x_ref, w3_ref, b3_ref, w4_ref, b4_ref, w5_ref, b5_ref, w6_ref, b6_ref, o_ref):
    """Layers 3-6 fused; all four weight matrices (~5.3 MB bf16) are resident in VMEM."""
    def lin(h, w_ref, b_ref, relu):
        r = jnp.dot(h.astype(jnp.bfloat16), w_ref[...], preferred_element_type=jnp.float32)
        r = r + b_ref[...]
        return jnp.maximum(r, 0.0) if relu else r

    h = x_ref[...]
    h = lin(h, w3_ref, b3_ref, True)
    h = lin(h, w4_ref, b4_ref, True)
    h = lin(h, w5_ref, b5_ref, True)
    o_ref[...] = lin(h, w6_ref, b6_ref, False).astype(o_ref.dtype)


def tail_fused(x, tail_params):
    """x: (M, 2048) f32; tail_params: [(w, b2)] for layers 3..6 -> (M, 128) f32 (padded)."""
    assert len(tail_params) == 4
    M, K = x.shape
    args = [x]
    in_specs = [pl.BlockSpec((M, K), lambda i: (0, 0))]
    for w, b2 in tail_params:
        args += [w, b2]
        in_specs += [pl.BlockSpec(w.shape, lambda i: (0, 0)),
                     pl.BlockSpec(b2.shape, lambda i: (0, 0))]
    n_out = tail_params[-1][0].shape[1]

    return pl.pallas_call(
        _tail_kernel,
        out_shape=jax.ShapeDtypeStruct((M, n_out), jnp.float32),
        grid=(1,),
        in_specs=in_specs,
        out_specs=pl.BlockSpec((M, n_out), lambda i: (0, 0)),
        compiler_params=pltpu.CompilerParams(
            dimension_semantics=("arbitrary",),
            vmem_limit_bytes=_VMEM_LIMIT_BYTES,
        ),
    )(*args)


# ---------------- parameter construction (deterministic, PyTorch-style init) --------------

def init_params(key):
    """PyTorch-style uniform init. Weights stored (in, out) and rounded once to bf16; biases
    kept f32 and pre-reshaped to (1, N); last layer padded N=6->128 once at init time."""
    params = []
    for fan_in, fan_out in _LAYER_DIMS:
        key, kw, kb = jax.random.split(key, 3)
        bound = 1.0 / (fan_in ** 0.5)
        w = jax.random.uniform(kw, (fan_in, fan_out), jnp.float32, -bound, bound)
        b = jax.random.uniform(kb, (fan_out,), jnp.float32, -bound, bound)
        n_pad = (-fan_out) % _LANE
        if n_pad:
            w = jnp.pad(w, ((0, 0), (0, n_pad)))
            b = jnp.pad(b, (0, n_pad))
        params.append((w.astype(jnp.bfloat16), b.reshape(1, -1).astype(jnp.float32), fan_out))
    return params


def simple_nn_forward(x, params):
    """Forward pass matching SimpleNN.forward (ReLU on all layers but the last)."""
    x = linear_streamed(x, params[0][0], params[0][1], apply_relu=True)   # fc1
    x = linear_streamed(x, params[1][0], params[1][1], apply_relu=True)   # fc2
    x = tail_fused(x, [(w, b2) for (w, b2, _) in params[2:]])             # fc3..fc6 fused
    return x[:, : params[-1][2]]   # drop the lane padding of the final layer (6 real outputs)


if __name__ == "__main__":
    key = jax.random.PRNGKey(0)
    key, kx = jax.random.split(key)

    batch = 8  # one f32 sublane tile
    x = jax.random.normal(kx, (batch, 2048), jnp.float32)
    params = init_params(key)

    out = jax.block_until_ready(simple_nn_forward(x, params))

    # Reference using the same numerics (bf16 weights/activations into the MXU, f32 accumulate,
    # f32 bias/ReLU); padded columns are exact zeros and are sliced off.
    ref = x
    for idx, (w, b2, _) in enumerate(params):
        ref = jnp.dot(ref.astype(jnp.bfloat16), w, preferred_element_type=jnp.float32) + b2
        if idx != len(params) - 1:
            ref = jnp.maximum(ref, 0.0)
    ref = ref[:, : params[-1][2]]

    assert out.shape == (batch, 6), out.shape
    assert jnp.allclose(out, ref, atol=1e-2, rtol=1e-2), "mismatch vs reference"

    print("KERNEL_OK")
</pallas_src>

<mosaic_0001>
module attributes {stable_mosaic.version = 11 : i64} {
  func.func @_linear_kernel(%arg0: i32, %arg1: memref<8x2048xf32, #tpu.memory_space<vmem>>, %arg2: memref<2048x1024xbf16, #tpu.memory_space<vmem>>, %arg3: memref<1x1024xf32, #tpu.memory_space<vmem>>, %arg4: memref<8x1024xf32, #tpu.memory_space<vmem>>) attributes {dimension_semantics = [#tpu.dimension_semantics<parallel>], iteration_bounds = array<i64: 4>, scalar_prefetch = 0 : i64, scratch_operands = 0 : i64, tpu.core_type = #tpu.core_type<tc>, window_params = [{pipeline_mode = #tpu.pipeline_mode<synchronous>, transform_indices = @transform_0, window_bounds = array<i64: 8, 2048>}, {transform_indices = @transform_1, window_bounds = array<i64: 2048, 1024>}, {transform_indices = @transform_2, window_bounds = array<i64: 1, 1024>}, {transform_indices = @transform_3, window_bounds = array<i64: 8, 1024>}]} {
    %c0 = arith.constant 0 : index
    %c0_0 = arith.constant 0 : index
    %0 = vector.load %arg1[%c0, %c0_0] : memref<8x2048xf32, #tpu.memory_space<vmem>>, vector<8x2048xf32>
    %1 = arith.truncf %0 : vector<8x2048xf32> to vector<8x2048xbf16>
    %c0_1 = arith.constant 0 : index
    %c0_2 = arith.constant 0 : index
    %2 = vector.load %arg2[%c0_1, %c0_2] : memref<2048x1024xbf16, #tpu.memory_space<vmem>>, vector<2048x1024xbf16>
    %cst = arith.constant dense<0.000000e+00> : vector<8x1024xf32>
    %3 = tpu.matmul %1, %2, %cst {dimension_numbers = #tpu.dot_dimension_numbers<[1], [0], [0], [1], [0, 0, 1, 1], [], []>} : vector<8x2048xbf16>, vector<2048x1024xbf16>, vector<8x1024xf32> -> vector<8x1024xf32>
    %c0_3 = arith.constant 0 : index
    %c0_4 = arith.constant 0 : index
    %4 = vector.load %arg3[%c0_3, %c0_4] : memref<1x1024xf32, #tpu.memory_space<vmem>>, vector<1x1024xf32>
    %5 = vector.broadcast %4 : vector<1x1024xf32> to vector<8x1024xf32>
    %6 = arith.addf %3, %5 : vector<8x1024xf32>
    %cst_5 = arith.constant 0.000000e+00 : f32
    %7 = vector.broadcast %cst_5 : f32 to vector<8x1024xf32>
    %8 = arith.maximumf %6, %7 : vector<8x1024xf32>
    %c0_6 = arith.constant 0 : index
    %c0_7 = arith.constant 0 : index
    %9 = vector.load %arg4[%c0_6, %c0_7] : memref<8x1024xf32, #tpu.memory_space<vmem>>, vector<8x1024xf32>
    tpu.vector_store %arg4[%c0_6, %c0_7], %8 {strides = array<i32>} : memref<8x1024xf32, #tpu.memory_space<vmem>>, vector<8x1024xf32>,
    return
  }
  func.func @transform_0(%arg0: i32) -> (i32, i32) {
    %c0_i32 = arith.constant 0 : i32
    %c0_i32_0 = arith.constant 0 : i32
    %c0_i32_1 = arith.constant 0 : i32
    return %c0_i32, %c0_i32_0 : i32, i32
  }
  func.func @transform_1(%arg0: i32) -> (i32, i32) {
    %c0_i32 = arith.constant 0 : i32
    %c0_i32_0 = arith.constant 0 : i32
    return %c0_i32, %arg0 : i32, i32
  }
  func.func @transform_2(%arg0: i32) -> (i32, i32) {
    %c0_i32 = arith.constant 0 : i32
    %c0_i32_0 = arith.constant 0 : i32
    return %c0_i32, %arg0 : i32, i32
  }
  func.func @transform_3(%arg0: i32) -> (i32, i32) {
    %c0_i32 = arith.constant 0 : i32
    %c0_i32_0 = arith.constant 0 : i32
    return %c0_i32, %arg0 : i32, i32
  }
}

</mosaic_0001>

<bundles_post_ra>
// kernel: tpu_custom_call.1
= control target key start
LH: loop header
LB: loop body
LE: loop exit
PB: predicated region body
PF: predicated region fallthrough
CT: control target
= control target key end

     0   :  { %8 = vsyncpa [#allocation3], 0  ;;  %s10621_s0 = inlined_call_operand.hbm [shape: f32[8,2048], index: 0, kind: input, shape index: {}]   ;;  %s10622_s1 = inlined_call_operand.hbm [shape: bf16[2048,4096], index: 1, kind: input, shape index: {}]   ;;  %s10623_s2 = inlined_call_operand.hbm [shape: f32[1,4096], index: 2, kind: input, shape index: {}]   ;;  %s10624_s3 = inlined_call_operand.hbm [shape: f32[8,4096], index: 3, kind: output, shape index: {}]  }
   0x1   :  { %9 = vsyncpa [#allocation6], 0 }
   0x2   :  { %11 = vsyncpa [#allocation6 + $0x1], 0 }
   0x3   :  { %12 = vsyncpa [#allocation4], 0 }
   0x4   :  { %14 = vsyncpa [#allocation4 + $0x1], 0  ;;  %s9197_s12 = smov 0   ;;  %s9199_s13 = smov 0  }
   0x5   :  { %s9201_s14 = smov 0   ;;  %s9203_s15 = smov 0  }
   0x6 LB: > { %s9218_s16 = sadd.s32 1, %s9168_s15   ;;  %s48_s17 = sadd.s32 1, %s9164_s14  ;;  %s9168_s15 = sphi %s9203_s15, %s10643_s15   ;;  %s9164_s14 = sphi %s9201_s14, %s10642_s14   ;;  %s9160_s13 = sphi %s9199_s13, %s10641_s13   ;;  %s9156_s12 = sphi %s9197_s12, %s10640_s12  }
   0x7   : > { %s45_s18 = ssub.s32 %s9168_s15, %s9218_s16  ;;  %p55_p0 = scmp.ne.s32.totalorder %s9164_s14, %s9160_s13 }
   0x8   : > { %p46_p1 = scmp.eq.s32.totalorder %s45_s18, 0  ;;  %p56_p2 = scmp.eq.s32.totalorder %s9168_s15, 0 }
   0x9   : > { %p8976_p3 = scmp.lt.s32.totalorder %s9168_s15, 4  ;;  %s148_s20 = sand.u32 1, %s9168_s15  }
   0xa   : > { %s9228_s19 = scalar_select %p46_p1, %s9164_s14, %s48_s17  }
   0xb   : > { %p57_p4 = por %p56_p2, %p55_p0  ;;  %s150_s21 = sand.u32 1, %s9164_s14  }
   0xc   : > { %s7907_s22 = sshll.u32 %s150_s21, 13  ;;  %s8947_s23 = sshll.u32 %s9168_s15, 9 }
   0xd   : > { %s9241_s26 = scalar_lea.hbm %s10622_s1, %s8947_s23  ;;  %s152_s27 = scalar_lea.vmem [#allocation5], %s7907_s22 }
   0xe   : > { %s159_s28 = sshll.u32 %s152_s27, 4  ;;  %p9243_p5 = pnand %p8976_p3, %p57_p4  ;;  %s9247_s28 = int_to_ptr.vmem [resolvable:$true] %s159_s28 }
   0xf   : > { %s9249_s30 = scalar_lea.sflag [#allocation6], %s148_s20  ;;  %s9018_s4 = scalar_lea.hbm %s9241_s26, 131072 }
  0x10   : > { %p9019_p6 = scmp.ne.s32.totalorder %s9241_s26, %s9018_s4  ;;  %p10625_p7 = pneg %p9243_p5 }
  0x11   : > { %s9023_s7 = scalar_lea.hbm %s10622_s1, 524288  ;;  %p9024_p10 = scmp.lt.s32.totalorder %s9241_s26, %s10622_s1 }
  0x12   : > { %p9021_p8 = pnand %p10625_p7, %p9019_p6  ;;  %p9025_p11 = scmp.lt.s32.totalorder %s9023_s7, %s9018_s4 }
  0x14   : > { %p9022_p9 = pneg %p9021_p8  ;;  %p9026_p12 = por %p9025_p11, %p9024_p10 }
  0x16   : > { %p9027_p13 = pnand %p9026_p12, %p9022_p9 }
  0x18   : > { %9030 = shalt.err (!%p9027_p13)
}
  0x19   : > { %s9031_s10 = scalar_lea.vmem %s9247_s28, 131072  ;;  %s9170_s11 = smov [#allocation5]  }
  0x1a   : > { %p9032_p1 = scmp.ne.s32.totalorder %s9247_s28, %s9031_s10  ;;  %s9036_s17 = sshll.u32 %s9170_s11, 4  ;;  %s9037_s17 = int_to_ptr.vmem [resolvable:$false] %s9036_s17 }
  0x1b   : > { %s9038_s18 = scalar_lea.vmem %s9037_s17, 262144  ;;  %p9039_p4 = scmp.lt.s32.totalorder %s9247_s28, %s9037_s17 }
  0x1c   : > { %p9034_p2 = pnand %p9032_p1, %p10625_p7  ;;  %p9040_p6 = scmp.lt.s32.totalorder %s9038_s18, %s9031_s10 }
  0x1e   : > { %p9035_p3 = pneg %p9034_p2  ;;  %p9041_p8 = por %p9040_p6, %p9039_p4 }
  0x20   : > { %p9042_p10 = pnand %p9041_p8, %p9035_p3 }
  0x22   : > { %9045 = shalt.err (!%p9042_p10)
}
  0x23   : > { %s9171_s20 = smov 2048   ;;  %s9172_s22 = smov 512  }
  0x24   : > { %s9173_s23 = smov 32   ;;  %s9277_s24 = sadd.s32 4294967295, %s9168_s15  }
  0x25   : > { %8967 = dma.hbm_to_vmem [thread:$0]  (!%p9243_p5), %s9241_s26, 131072, %s9247_s28, %s9249_s30, %s9171_s20, %s9172_s22, %s9173_s23  }
  0x26   : > { %s7903_s25 = sadd.s32 4294967294, %s9168_s15   ;;  %p61_p9 = scmp.ne.s32.totalorder %s9160_s13, %s9156_s12 }
  0x27   : > { %p10627_p11 = scmp.eq.s32.totalorder %s9277_s24, 0  ;;  %p111_p12 = scmp.eq.s32.totalorder %s9277_s24, 3 }
  0x28   : > { %p117_p13 = scmp.eq.s32.totalorder %s7903_s25, 3  ;;  %p7904_p1 = scmp.ge.s32.totalorder %s9168_s15, 1 }
  0x29   : > { %p9287_p2 = por %p10627_p11, %p61_p9  ;;  %p9294_p3 = por %p111_p12, %p55_p0 }
  0x2a   : > { %p9298_p4 = por %p117_p13, %p61_p9  ;;  %p124_p6 = scmp.lt.s32.totalorder %s9168_s15, 5 }
  0x2b   : > { %s10630_s27 = scalar_select %p9287_p2, 1, 0 }
  0x2c   : > { %s10631_s26 = scalar_select %p9294_p3, 1, 0 }
  0x2d   : > { %s10632_s28 = scalar_select %p9298_p4, 1, 0 }
  0x2e   : > { %p9303_p8 = pnand %p7904_p1, %p124_p6  ;;  %s9174_s5 = smov [#allocation2]  }
  0x2f   : > { %s137_s6 = sshll.u32 %s9174_s5, 4  ;;  %s7910_s7 = sshll.u32 %s150_s21, 3  ;;  %s138_s6 = int_to_ptr.vmem [resolvable:$true] %s137_s6 }
  0x30   : > { %p8960_p10 = pneg %p9303_p8  ;;  %s8948_s8 = sshll.u32 %s9168_s15, 7 }
  0x31   : > { %s173_s9 = scalar_lea.vmem [#allocation7], %s7910_s7  ;;  %s9317_s18 = scalar_lea.hbm %s10623_s2, %s8948_s8 }
  0x32   : > { %s181_s10 = sshll.u32 %s173_s9, 4  ;;  %p8961_p0 = pnand %p8960_p10, %p10627_p11  ;;  %s9319_s10 = int_to_ptr.vmem [resolvable:$true] %s181_s10 }
  0x33   : > { %s9057_s20 = scalar_lea.vmem %s138_s6, 2048  ;;  %p9065_p6 = scmp.lt.s32.totalorder %s138_s6, %s138_s6 }
  0x34   : > { %p9048_p9 = pneg %p8961_p0  ;;  %p9058_p12 = scmp.ne.s32.totalorder %s138_s6, %s9057_s20 }
  0x35   : > { %p9066_p7 = scmp.lt.s32.totalorder %s9057_s20, %s9057_s20 }
  0x36   : > { %p9060_p13 = pnand %p9058_p12, %p9048_p9 }
  0x37   : > { %p9067_p4 = por %p9066_p7, %p9065_p6 }
  0x38   : > { %p9061_p1 = pneg %p9060_p13 }
  0x3a   : > { %p9068_p3 = pnand %p9067_p4, %p9061_p1 }
  0x3c   : > { %9071 = shalt.err (!%p9068_p3)
}
  0x3d   : > { %8963 = dma.hbm_to_vmem [thread:$0]  (!%p8961_p0), %s10621_s0, 2048, %s138_s6, [#allocation3]  }
  0x3e   : > { %s9072_s23 = scalar_lea.hbm %s9317_s18, 128  ;;  %p10634_p11 = pneg %p9243_p5 }
  0x3f   : > { %p9073_p10 = scmp.ne.s32.totalorder %s9317_s18, %s9072_s23  ;;  %s9077_s7 = scalar_lea.hbm %s10623_s2, 512 }
  0x40   : > { %p9078_p7 = scmp.lt.s32.totalorder %s9317_s18, %s10623_s2  ;;  %p9079_p3 = scmp.lt.s32.totalorder %s9077_s7, %s9072_s23 }
  0x41   : > { %p9075_p2 = pnand %p9073_p10, %p10634_p11 }
  0x42   : > { %p9080_p4 = por %p9079_p3, %p9078_p7 }
  0x43   : > { %p9076_p9 = pneg %p9075_p2 }
  0x45   : > { %p9081_p12 = pnand %p9080_p4, %p9076_p9 }
  0x47   : > { %9084 = shalt.err (!%p9081_p12)
}
  0x48   : > { %s9085_s6 = scalar_lea.vmem %s9319_s10, 128  ;;  %s9175_s11 = smov [#allocation7]  }
  0x49   : > { %p9086_p0 = scmp.ne.s32.totalorder %s9319_s10, %s9085_s6  ;;  %s9090_s17 = sshll.u32 %s9175_s11, 4  ;;  %s9091_s17 = int_to_ptr.vmem [resolvable:$false] %s9090_s17 }
  0x4a   : > { %s9092_s20 = scalar_lea.vmem %s9091_s17, 256  ;;  %p9093_p1 = scmp.lt.s32.totalorder %s9319_s10, %s9091_s17 }
  0x4b   : > { %p9088_p2 = pnand %p9086_p0, %p10634_p11  ;;  %p9094_p6 = scmp.lt.s32.totalorder %s9092_s20, %s9085_s6 }
  0x4d   : > { %p9089_p13 = pneg %p9088_p2  ;;  %p9095_p10 = por %p9094_p6, %p9093_p1 }
  0x4f   : > { %p9096_p7 = pnand %p9095_p10, %p9089_p13 }
  0x51   : > { %9099 = shalt.err (!%p9096_p7)
}
  0x52   : > { %8970 = dma.hbm_to_vmem [thread:$0]  (!%p9243_p5), %s9317_s18, 128, %s9319_s10, %s9249_s30  }
  0x53   : > { %190 = sbr.rel (%p9303_p8) target bundleno = 1341 (0x53d), region = 32  ;;  %p10635_p9 = scmp.eq.s32.totalorder (!%p9303_p8), %s9277_s24, 0 }
  0x58   : > { %9143 = dma.done.wait (%p10635_p9), [#allocation3], 2048   ;;  %p10636_p3 = pmov %p10635_p9 }
  0x59   : > { %s196_s21 = sand.u32 1, %s9277_s24   ;;  %s9355_s22 = sand.u32 1, %s9160_s13  }
  0x5a   : > { %9145 = vsyncadd (%p10636_p3), [#allocation3], 4294965248  ;;  %s7915_s29 = sshll.u32 %s9355_s22, 13  ;;  %s197_s23 = scalar_lea.sflag [#allocation6], %s196_s21 }
  0x5b   : > { %s9358_s25 = scalar_lea.vmem [#allocation5], %s7915_s29  ;;  %p10637_p5 = scmp.ne.s32.totalorder %s10630_s27, 0 }
  0x5d   : > { %9147 = dma.done.wait (%p10637_p5), %s197_s23, 131200  }
  0x5e   : > { %9149 = vsyncadd (%p10637_p5), %s197_s23, 4294836096  ;;  %v328_v0 = vld [vmem:[%s9358_s25 + $0x1c0] sm:$0xff]  ;;  %v241_v53 = vld [vmem:[#allocation2 + $0x8] sm:$0xff]  ;;  %s7916_s30 = sshll.u32 %s9355_s22, 3  ;;  %s7917_s4 = sshll.u32 %s9355_s22, 6 }
  0x5f   : > { %v332_v1 = vld [vmem:[%s9358_s25 + $0x1e0] sm:$0xff]  ;;  %v243_v54 = vld [vmem:[#allocation2 + $0x18] sm:$0xff]  ;;  %v9394_v58 = vpack.c.bf16 %v241_v53, %v241_v53  ;;  %s9670_s27 = scalar_lea.vmem [#allocation7], %s7916_s30  ;;  %s9925_s10 = scalar_lea.vmem [#allocation8], %s7917_s4 }
  0x60   : > { %v456_v2 = vld [vmem:[%s9358_s25 + $0x5c0] sm:$0xff]  ;;  %v7975_v3 = vcombine.high %v328_v0, %v332_v1  ;;  %v7974_v5 = vcombine.low %v328_v0, %v332_v1  ;;  %v9396_v59 = vpack.c.bf16 %v243_v54, %v243_v54  ;;  %s8949_s18 = sshll.u32 %s9277_s24, 10  ;;  %s7801_s5 = sshll.u32 %s9925_s10, 4  ;;  %s7802_s5 = int_to_ptr.vmem [resolvable:$true] %s7801_s5 }
  0x61   : > { %v460_v4 = vld [vmem:[%s9358_s25 + $0x5e0] sm:$0xff]  ;;  %6490 = vmatprep.mubr.bf16.mxu0 %v9394_v58  ;;  %s7799_s9 = scalar_lea.hbm %s10624_s3, %s8949_s18  ;;  %s7787_s6 = scalar_lea.sflag [#allocation4], %s9355_s22 }
  0x62   : > { %v320_v6 = vld [vmem:[%s9358_s25 + $0x180] sm:$0xff]  ;;  %v8103_v8 = vcombine.high %v456_v2, %v460_v4  ;;  %v8102_v9 = vcombine.low %v456_v2, %v460_v4  ;;  %6458 = vmatprep.subr.bf16.mxu0 %v7975_v3  ;;  %6531 = vmatprep.mubr.bf16.mxu1 %v9396_v59  ;;  %s9100_s11 = scalar_lea.vmem %s7802_s5, 1024  ;;  %p10638_p4 = scmp.ne.s32.totalorder %s10631_s26, 0 }
  0x63   : > { %v324_v7 = vld [vmem:[%s9358_s25 + $0x1a0] sm:$0xff]  ;;  %6459 = vmatpush1.bf16.msra.mxu0 %v7974_v5  ;;  %p9101_p8 = scmp.ne.s32.totalorder %s7802_s5, %s9100_s11  ;;  %s9176_s24 = smov [#allocation8]  }
  0x64   : > { %v7967_v10 = vcombine.high %v320_v6, %v324_v7  ;;  %v448_v11 = vld [vmem:[%s9358_s25 + $0x580] sm:$0xff]  ;;  %6499 = vmatprep.subr.bf16.mxu1 %v8103_v8  ;;  %v7966_v18 = vcombine.low %v320_v6, %v324_v7  ;;  %s9104_s17 = sshll.u32 %s9176_s24, 4  ;;  %s9105_s17 = int_to_ptr.vmem [resolvable:$false] %s9104_s17 }
  0x65   : > { %v452_v12 = vld [vmem:[%s9358_s25 + $0x5a0] sm:$0xff]  ;;  %6500 = vmatpush1.bf16.msra.mxu1 %v8102_v9  ;;  %p9102_p12 = pnand %p9101_p8, %p10638_p4  ;;  %s9106_s20 = scalar_lea.vmem %s9105_s17, 2048 }
  0x66   : > { %v312_v13 = vld [vmem:[%s9358_s25 + $0x140] sm:$0xff]  ;;  %v8095_v14 = vcombine.high %v448_v11, %v452_v12  ;;  %6460 = vmatprep.subr.bf16.mxu0 %v7967_v10  ;;  %v8094_v19 = vcombine.low %v448_v11, %v452_v12  ;;  %p9107_p11 = scmp.lt.s32.totalorder %s7802_s5, %s9105_s17  ;;  %p9108_p2 = scmp.lt.s32.totalorder %s9106_s20, %s9100_s11 }
  0x67   : > { %v316_v15 = vld [vmem:[%s9358_s25 + $0x160] sm:$0xff]  ;;  %6461 = vmatpush1.bf16.msra.mxu0 %v7966_v18  ;;  %p9103_p0 = pneg %p9102_p12 }
  0x68   : > { %v440_v16 = vld [vmem:[%s9358_s25 + $0x540] sm:$0xff]  ;;  %v7959_v20 = vcombine.high %v312_v13, %v316_v15  ;;  %6501 = vmatprep.subr.bf16.mxu1 %v8095_v14  ;;  %v7958_v26 = vcombine.low %v312_v13, %v316_v15  ;;  %p9109_p13 = por %p9108_p2, %p9107_p11 }
  0x69   : > { %v444_v17 = vld [vmem:[%s9358_s25 + $0x560] sm:$0xff]  ;;  %6502 = vmatpush1.bf16.msra.mxu1 %v8094_v19 }
  0x6a   : > { %v8087_v21 = vcombine.high %v440_v16, %v444_v17  ;;  %v304_v22 = vld [vmem:[%s9358_s25 + $0x100] sm:$0xff]  ;;  %6462 = vmatprep.subr.bf16.mxu0 %v7959_v20  ;;  %v8086_v27 = vcombine.low %v440_v16, %v444_v17  ;;  %p9110_p1 = pnand %p9109_p13, %p9103_p0 }
  0x6b   : > { %v308_v23 = vld [vmem:[%s9358_s25 + $0x120] sm:$0xff]  ;;  %6463 = vmatpush1.bf16.msra.mxu0 %v7958_v26 }
  0x6c   : > { %v432_v24 = vld [vmem:[%s9358_s25 + $0x500] sm:$0xff]  ;;  %v7951_v28 = vcombine.high %v304_v22, %v308_v23  ;;  %6503 = vmatprep.subr.bf16.mxu1 %v8087_v21  ;;  %v7950_v34 = vcombine.low %v304_v22, %v308_v23 }
  0x6d   : > { %v436_v25 = vld [vmem:[%s9358_s25 + $0x520] sm:$0xff]  ;;  %6504 = vmatpush1.bf16.msra.mxu1 %v8086_v27 }
  0x6e   : > { %v8079_v29 = vcombine.high %v432_v24, %v436_v25  ;;  %v296_v30 = vld [vmem:[%s9358_s25 + $0xc0] sm:$0xff]  ;;  %6464 = vmatprep.subr.bf16.mxu0 %v7951_v28  ;;  %v8078_v35 = vcombine.low %v432_v24, %v436_v25 }
  0x6f   : > { %v300_v31 = vld [vmem:[%s9358_s25 + $0xe0] sm:$0xff]  ;;  %6465 = vmatpush1.bf16.msra.mxu0 %v7950_v34 }
  0x70   : > { %v424_v32 = vld [vmem:[%s9358_s25 + $0x4c0] sm:$0xff]  ;;  %v7943_v36 = vcombine.high %v296_v30, %v300_v31  ;;  %6505 = vmatprep.subr.bf16.mxu1 %v8079_v29  ;;  %v7942_v42 = vcombine.low %v296_v30, %v300_v31 }
  0x71   : > { %v428_v33 = vld [vmem:[%s9358_s25 + $0x4e0] sm:$0xff]  ;;  %6506 = vmatpush1.bf16.msra.mxu1 %v8078_v35 }
  0x72   : > { %v8071_v37 = vcombine.high %v424_v32, %v428_v33  ;;  %v288_v38 = vld [vmem:[%s9358_s25 + $0x80] sm:$0xff]  ;;  %6466 = vmatprep.subr.bf16.mxu0 %v7943_v36  ;;  %v8070_v43 = vcombine.low %v424_v32, %v428_v33 }
  0x73   : > { %v292_v39 = vld [vmem:[%s9358_s25 + $0xa0] sm:$0xff]  ;;  %6467 = vmatpush1.bf16.msra.mxu0 %v7942_v42 }
  0x74   : > { %v416_v40 = vld [vmem:[%s9358_s25 + $0x480] sm:$0xff]  ;;  %v7935_v44 = vcombine.high %v288_v38, %v292_v39  ;;  %6507 = vmatprep.subr.bf16.mxu1 %v8071_v37  ;;  %v7934_v50 = vcombine.low %v288_v38, %v292_v39 }
  0x75   : > { %v420_v41 = vld [vmem:[%s9358_s25 + $0x4a0] sm:$0xff]  ;;  %6508 = vmatpush1.bf16.msra.mxu1 %v8070_v43 }
  0x76   : > { %v8063_v45 = vcombine.high %v416_v40, %v420_v41  ;;  %v280_v46 = vld [vmem:[%s9358_s25 + $0x40] sm:$0xff]  ;;  %6468 = vmatprep.subr.bf16.mxu0 %v7935_v44  ;;  %v8062_v51 = vcombine.low %v416_v40, %v420_v41 }
  0x77   : > { %v284_v47 = vld [vmem:[%s9358_s25 + $0x60] sm:$0xff]  ;;  %6469 = vmatpush1.bf16.msra.mxu0 %v7934_v50 }
  0x78   : > { %v408_v48 = vld [vmem:[%s9358_s25 + $0x440] sm:$0xff]  ;;  %v7927_v52 = vcombine.high %v280_v46, %v284_v47  ;;  %6509 = vmatprep.subr.bf16.mxu1 %v8063_v45  ;;  %v7926_v62 = vcombine.low %v280_v46, %v284_v47 }
  0x79   : > { %v412_v49 = vld [vmem:[%s9358_s25 + $0x460] sm:$0xff]  ;;  %6510 = vmatpush1.bf16.msra.mxu1 %v8062_v51 }
  0x7a   : > { %v8055_v55 = vcombine.high %v408_v48, %v412_v49  ;;  %v272_v56 = vld [vmem:[%s9358_s25] sm:$0xff]  ;;  %6470 = vmatprep.subr.bf16.mxu0 %v7927_v52  ;;  %v8054_v63 = vcombine.low %v408_v48, %v412_v49 }
  0x7b   : > { %v276_v57 = vld [vmem:[%s9358_s25 + $0x20] sm:$0xff]  ;;  %6471 = vmatpush1.bf16.msra.mxu0 %v7926_v62 }
  0x7c   : > { %v400_v60 = vld [vmem:[%s9358_s25 + $0x400] sm:$0xff]  ;;  %v7919_v0 = vcombine.high %v272_v56, %v276_v57  ;;  %6511 = vmatprep.subr.bf16.mxu1 %v8055_v55  ;;  %v7918_v6 = vcombine.low %v272_v56, %v276_v57 }
  0x7d   : > { %v404_v61 = vld [vmem:[%s9358_s25 + $0x420] sm:$0xff]  ;;  %6512 = vmatpush1.bf16.msra.mxu1 %v8054_v63 }
  0x7e   : > { %v8047_v1 = vcombine.high %v400_v60, %v404_v61  ;;  %v392_v2 = vld [vmem:[%s9358_s25 + $0x3c0] sm:$0xff]  ;;  %6472 = vmatprep.subr.bf16.mxu0 %v7919_v0  ;;  %v8046_v7 = vcombine.low %v400_v60, %v404_v61 }
  0x7f   : > { %v396_v3 = vld [vmem:[%s9358_s25 + $0x3e0] sm:$0xff]  ;;  %6473 = vmatpush1.bf16.msra.mxu0 %v7918_v6 }
  0x80   : > { %v520_v4 = vld [vmem:[%s9358_s25 + $0x7c0] sm:$0xff]  ;;  %v8039_v8 = vcombine.high %v392_v2, %v396_v3  ;;  %6513 = vmatprep.subr.bf16.mxu1 %v8047_v1  ;;  %v8038_v14 = vcombine.low %v392_v2, %v396_v3 }
  0x81   : > { %v524_v5 = vld [vmem:[%s9358_s25 + $0x7e0] sm:$0xff]  ;;  %6514 = vmatpush1.bf16.msra.mxu1 %v8046_v7 }
  0x82   : > { %v8167_v9 = vcombine.high %v520_v4, %v524_v5  ;;  %v384_v10 = vld [vmem:[%s9358_s25 + $0x380] sm:$0xff]  ;;  %6474 = vmatprep.subr.bf16.mxu0 %v8039_v8  ;;  %v8166_v15 = vcombine.low %v520_v4, %v524_v5 }
  0x83   : > { %v388_v11 = vld [vmem:[%s9358_s25 + $0x3a0] sm:$0xff]  ;;  %6475 = vmatpush2.bf16.msra.mxu0 %v8038_v14 }
  0x84   : > { %v512_v12 = vld [vmem:[%s9358_s25 + $0x780] sm:$0xff]  ;;  %v8031_v16 = vcombine.high %v384_v10, %v388_v11  ;;  %6515 = vmatprep.subr.bf16.mxu1 %v8167_v9  ;;  %v8030_v22 = vcombine.low %v384_v10, %v388_v11  ;;  %v242_v11 = vld [vmem:[#allocation2 + $0x10] sm:$0xff] }
  0x85   : > { %v516_v13 = vld [vmem:[%s9358_s25 + $0x7a0] sm:$0xff]  ;;  %6516 = vmatpush2.bf16.msra.mxu1 %v8166_v15 }
  0x86   : > { %v8159_v17 = vcombine.high %v512_v12, %v516_v13  ;;  %v376_v18 = vld [vmem:[%s9358_s25 + $0x340] sm:$0xff]  ;;  %6476 = vmatprep.subr.bf16.mxu0 %v8031_v16  ;;  %v8158_v23 = vcombine.low %v512_v12, %v516_v13 }
  0x87   : > { %v380_v19 = vld [vmem:[%s9358_s25 + $0x360] sm:$0xff]  ;;  %6477 = vmatpush2.bf16.msra.mxu0 %v8030_v22  ;;  %v247_v22 = vld [vmem:[#allocation2 + $0x38] sm:$0xff] }
  0x88   : > { %v504_v20 = vld [vmem:[%s9358_s25 + $0x740] sm:$0xff]  ;;  %v8023_v24 = vcombine.high %v376_v18, %v380_v19  ;;  %6517 = vmatprep.subr.bf16.mxu1 %v8159_v17  ;;  %v8022_v30 = vcombine.low %v376_v18, %v380_v19  ;;  %v245_v19 = vld [vmem:[#allocation2 + $0x28] sm:$0xff] }
  0x89   : > { %v508_v21 = vld [vmem:[%s9358_s25 + $0x760] sm:$0xff]  ;;  %6518 = vmatpush2.bf16.msra.mxu1 %v8158_v23 }
  0x8a   : > { %v8151_v25 = vcombine.high %v504_v20, %v508_v21  ;;  %v368_v26 = vld [vmem:[%s9358_s25 + $0x300] sm:$0xff]  ;;  %6478 = vmatprep.subr.bf16.mxu0 %v8023_v24  ;;  %v8150_v31 = vcombine.low %v504_v20, %v508_v21  ;;  %v9444_v20 = vpack.c.bf16 %v242_v11, %v242_v11 }
  0x8b   : > { %v372_v27 = vld [vmem:[%s9358_s25 + $0x320] sm:$0xff]  ;;  %6479 = vmatpush2.bf16.msra.mxu0 %v8022_v30 }
  0x8c   : > { %v496_v28 = vld [vmem:[%s9358_s25 + $0x700] sm:$0xff]  ;;  %v8015_v32 = vcombine.high %v368_v26, %v372_v27  ;;  %6519 = vmatprep.subr.bf16.mxu1 %v8151_v25  ;;  %v8014_v38 = vcombine.low %v368_v26, %v372_v27 }
  0x8d   : > { %v500_v29 = vld [vmem:[%s9358_s25 + $0x720] sm:$0xff]  ;;  %6520 = vmatpush2.bf16.msra.mxu1 %v8150_v31  ;;  %v9453_v31 = vpack.c.bf16 %v247_v22, %v247_v22 }
  0x8e   : > { %v8143_v33 = vcombine.high %v496_v28, %v500_v29  ;;  %v360_v34 = vld [vmem:[%s9358_s25 + $0x2c0] sm:$0xff]  ;;  %6480 = vmatprep.subr.bf16.mxu0 %v8015_v32  ;;  %v8142_v39 = vcombine.low %v496_v28, %v500_v29  ;;  %v9448_v28 = vpack.c.bf16 %v245_v19, %v245_v19 }
  0x8f   : > { %v364_v35 = vld [vmem:[%s9358_s25 + $0x2e0] sm:$0xff]  ;;  %6481 = vmatpush2.bf16.msra.mxu0 %v8014_v38 }
  0x90   : > { %v488_v36 = vld [vmem:[%s9358_s25 + $0x6c0] sm:$0xff]  ;;  %v8007_v40 = vcombine.high %v360_v34, %v364_v35  ;;  %6521 = vmatprep.subr.bf16.mxu1 %v8143_v33  ;;  %v8006_v46 = vcombine.low %v360_v34, %v364_v35 }
  0x91   : > { %v492_v37 = vld [vmem:[%s9358_s25 + $0x6e0] sm:$0xff]  ;;  %6522 = vmatpush2.bf16.msra.mxu1 %v8142_v39 }
  0x92   : > { %v8135_v41 = vcombine.high %v488_v36, %v492_v37  ;;  %v352_v42 = vld [vmem:[%s9358_s25 + $0x280] sm:$0xff]  ;;  %6482 = vmatprep.subr.bf16.mxu0 %v8007_v40  ;;  %v8134_v47 = vcombine.low %v488_v36, %v492_v37 }
  0x93   : > { %v356_v43 = vld [vmem:[%s9358_s25 + $0x2a0] sm:$0xff]  ;;  %6483 = vmatpush2.bf16.msra.mxu0 %v8006_v46 }
  0x94   : > { %v480_v44 = vld [vmem:[%s9358_s25 + $0x680] sm:$0xff]  ;;  %v7999_v48 = vcombine.high %v352_v42, %v356_v43  ;;  %6523 = vmatprep.subr.bf16.mxu1 %v8135_v41  ;;  %v7998_v54 = vcombine.low %v352_v42, %v356_v43 }
  0x95   : > { %v484_v45 = vld [vmem:[%s9358_s25 + $0x6a0] sm:$0xff]  ;;  %6524 = vmatpush2.bf16.msra.mxu1 %v8134_v47 }
  0x96   : > { %v8127_v49 = vcombine.high %v480_v44, %v484_v45  ;;  %v344_v50 = vld [vmem:[%s9358_s25 + $0x240] sm:$0xff]  ;;  %6484 = vmatprep.subr.bf16.mxu0 %v7999_v48  ;;  %v8126_v55 = vcombine.low %v480_v44, %v484_v45 }
  0x97   : > { %v348_v51 = vld [vmem:[%s9358_s25 + $0x260] sm:$0xff]  ;;  %6485 = vmatpush2.bf16.msra.mxu0 %v7998_v54 }
  0x98   : > { %v472_v52 = vld [vmem:[%s9358_s25 + $0x640] sm:$0xff]  ;;  %v7991_v56 = vcombine.high %v344_v50, %v348_v51  ;;  %6525 = vmatprep.subr.bf16.mxu1 %v8127_v49  ;;  %v7990_v0 = vcombine.low %v344_v50, %v348_v51 }
  0x99   : > { %v476_v53 = vld [vmem:[%s9358_s25 + $0x660] sm:$0xff]  ;;  %6526 = vmatpush2.bf16.msra.mxu1 %v8126_v55 }
  0x9a   : > { %v8119_v57 = vcombine.high %v472_v52, %v476_v53  ;;  %v336_v60 = vld [vmem:[%s9358_s25 + $0x200] sm:$0xff]  ;;  %6486 = vmatprep.subr.bf16.mxu0 %v7991_v56  ;;  %v8118_v1 = vcombine.low %v472_v52, %v476_v53 }
  0x9b   : > { %v340_v61 = vld [vmem:[%s9358_s25 + $0x220] sm:$0xff]  ;;  %6487 = vmatpush2.bf16.msra.mxu0 %v7990_v0 }
  0x9c   : > { %v464_v62 = vld [vmem:[%s9358_s25 + $0x600] sm:$0xff]  ;;  %v7983_v2 = vcombine.high %v336_v60, %v340_v61  ;;  %6527 = vmatprep.subr.bf16.mxu1 %v8119_v57  ;;  %v7982_v8 = vcombine.low %v336_v60, %v340_v61 }
  0x9d   : > { %v468_v63 = vld [vmem:[%s9358_s25 + $0x620] sm:$0xff]  ;;  %6528 = vmatpush2.bf16.msra.mxu1 %v8118_v1 }
  0x9e   : > { %v8111_v3 = vcombine.high %v464_v62, %v468_v63  ;;  %v584_v4 = vld [vmem:[%s9358_s25 + $0x9c0] sm:$0xff]  ;;  %6488 = vmatprep.subr.bf16.mxu0 %v7983_v2  ;;  %v8110_v10 = vcombine.low %v464_v62, %v468_v63 }
  0x9f   : > { %v588_v5 = vld [vmem:[%s9358_s25 + $0x9e0] sm:$0xff]  ;;  %6489 = vmatpush2.bf16.msra.mxu0 %v7982_v8 }
  0xa0   : > { %v712_v6 = vld [vmem:[%s9358_s25 + $0xdc0] sm:$0xff]  ;;  %v8231_v12 = vcombine.high %v584_v4, %v588_v5  ;;  %6529 = vmatprep.subr.bf16.mxu1 %v8111_v3  ;;  %v8230_v21 = vcombine.low %v584_v4, %v588_v5 }
  0xa1   : > { %v716_v7 = vld [vmem:[%s9358_s25 + $0xde0] sm:$0xff]  ;;  %6530 = vmatpush2.bf16.msra.mxu1 %v8110_v10 }
  0xa2   : > { %v240_v9 = vld [vmem:[#allocation2] sm:$0xff]  ;;  %v8359_v13 = vcombine.high %v712_v6, %v716_v7  ;;  %6540 = vmatprep.subr.bf16.mxu0 %v8231_v12  ;;  %v8358_v23 = vcombine.low %v712_v6, %v716_v7 }
  0xa3   : > { %v576_v14 = vld [vmem:[%s9358_s25 + $0x980] sm:$0xff]  ;;  %v9440_v16 = vpack.c.bf16 %v240_v9, %v240_v9 }
  0xa4   : > { %v580_v15 = vld [vmem:[%s9358_s25 + $0x9a0] sm:$0xff]  ;;  %6581 = vmatprep.subr.bf16.mxu1 %v8359_v13  ;;  %6532 = vmatmul.mubr.bf16.vlgmr.msra.gmra.mxu1 %v9444_v20 }
  0xa5   : > { %v704_v17 = vld [vmem:[%s9358_s25 + $0xd80] sm:$0xff]  ;;  %v8223_v24 = vcombine.high %v576_v14, %v580_v15  ;;  %6491 = vmatmul.mubr.bf16.vlgmr.msra.gmra.mxu0 %v9440_v16  ;;  %v8222_v32 = vcombine.low %v576_v14, %v580_v15  ;;  %6582 = vmatpush1.bf16.msra.mxu1 %v8358_v23 }
  0xa6   : > { %v708_v18 = vld [vmem:[%s9358_s25 + $0xda0] sm:$0xff]  ;;  %6541 = vmatpush1.bf16.msra.mxu0 %v8230_v21  ;;  %6572 = vmatprep.mubr.bf16.mxu0 %v9448_v28 }
  0xa7   : > { %v8351_v25 = vcombine.high %v704_v17, %v708_v18  ;;  %v568_v26 = vld [vmem:[%s9358_s25 + $0x940] sm:$0xff]  ;;  %6542 = vmatprep.subr.bf16.mxu0 %v8223_v24  ;;  %v8350_v33 = vcombine.low %v704_v17, %v708_v18  ;;  %6613 = vmatprep.mubr.bf16.mxu1 %v9453_v31 }
  0xa8   : > { %v572_v27 = vld [vmem:[%s9358_s25 + $0x960] sm:$0xff] }
  0xa9   : > { %v696_v29 = vld [vmem:[%s9358_s25 + $0xd40] sm:$0xff]  ;;  %v8215_v34 = vcombine.high %v568_v26, %v572_v27  ;;  %6583 = vmatprep.subr.bf16.mxu1 %v8351_v25  ;;  %v8214_v40 = vcombine.low %v568_v26, %v572_v27 }
  0xaa   : > { %v700_v30 = vld [vmem:[%s9358_s25 + $0xd60] sm:$0xff]  ;;  %6543 = vmatpush1.bf16.msra.mxu0 %v8222_v32  ;;  %6584 = vmatpush1.bf16.msra.mxu1 %v8350_v33 }
  0xab   : > { %v8343_v35 = vcombine.high %v696_v29, %v700_v30  ;;  %v560_v36 = vld [vmem:[%s9358_s25 + $0x900] sm:$0xff]  ;;  %6544 = vmatprep.subr.bf16.mxu0 %v8215_v34  ;;  %v8342_v41 = vcombine.low %v696_v29, %v700_v30 }
  0xac   : > { %v564_v37 = vld [vmem:[%s9358_s25 + $0x920] sm:$0xff] }
  0xad   : > { %v688_v38 = vld [vmem:[%s9358_s25 + $0xd00] sm:$0xff]  ;;  %v8207_v42 = vcombine.high %v560_v36, %v564_v37  ;;  %6585 = vmatprep.subr.bf16.mxu1 %v8343_v35  ;;  %v8206_v48 = vcombine.low %v560_v36, %v564_v37 }
  0xae   : > { %v692_v39 = vld [vmem:[%s9358_s25 + $0xd20] sm:$0xff]  ;;  %6545 = vmatpush1.bf16.msra.mxu0 %v8214_v40  ;;  %6586 = vmatpush1.bf16.msra.mxu1 %v8342_v41 }
  0xaf   : > { %v8335_v43 = vcombine.high %v688_v38, %v692_v39  ;;  %v552_v44 = vld [vmem:[%s9358_s25 + $0x8c0] sm:$0xff]  ;;  %6546 = vmatprep.subr.bf16.mxu0 %v8207_v42  ;;  %v8334_v49 = vcombine.low %v688_v38, %v692_v39 }
  0xb0   : > { %v556_v45 = vld [vmem:[%s9358_s25 + $0x8e0] sm:$0xff] }
  0xb1   : > { %v680_v46 = vld [vmem:[%s9358_s25 + $0xcc0] sm:$0xff]  ;;  %v8199_v50 = vcombine.high %v552_v44, %v556_v45  ;;  %6587 = vmatprep.subr.bf16.mxu1 %v8335_v43  ;;  %v8198_v56 = vcombine.low %v552_v44, %v556_v45 }
  0xb2   : > { %v684_v47 = vld [vmem:[%s9358_s25 + $0xce0] sm:$0xff]  ;;  %6547 = vmatpush1.bf16.msra.mxu0 %v8206_v48  ;;  %6588 = vmatpush1.bf16.msra.mxu1 %v8334_v49 }
  0xb3   : > { %v8327_v51 = vcombine.high %v680_v46, %v684_v47  ;;  %v544_v52 = vld [vmem:[%s9358_s25 + $0x880] sm:$0xff]  ;;  %6548 = vmatprep.subr.bf16.mxu0 %v8199_v50  ;;  %v8326_v57 = vcombine.low %v680_v46, %v684_v47 }
  0xb4   : > { %v548_v53 = vld [vmem:[%s9358_s25 + $0x8a0] sm:$0xff] }
  0xb5   : > { %v672_v54 = vld [vmem:[%s9358_s25 + $0xc80] sm:$0xff]  ;;  %v8191_v60 = vcombine.high %v544_v52, %v548_v53  ;;  %6589 = vmatprep.subr.bf16.mxu1 %v8327_v51  ;;  %v8190_v2 = vcombine.low %v544_v52, %v548_v53 }
  0xb6   : > { %v676_v55 = vld [vmem:[%s9358_s25 + $0xca0] sm:$0xff]  ;;  %6549 = vmatpush1.bf16.msra.mxu0 %v8198_v56  ;;  %6590 = vmatpush1.bf16.msra.mxu1 %v8326_v57 }
  0xb7   : > { %v8319_v61 = vcombine.high %v672_v54, %v676_v55  ;;  %v536_v62 = vld [vmem:[%s9358_s25 + $0x840] sm:$0xff]  ;;  %6550 = vmatprep.subr.bf16.mxu0 %v8191_v60  ;;  %v8318_v3 = vcombine.low %v672_v54, %v676_v55 }
  0xb8   : > { %v540_v63 = vld [vmem:[%s9358_s25 + $0x860] sm:$0xff] }
  0xb9   : > { %v664_v0 = vld [vmem:[%s9358_s25 + $0xc40] sm:$0xff]  ;;  %v8183_v4 = vcombine.high %v536_v62, %v540_v63  ;;  %6591 = vmatprep.subr.bf16.mxu1 %v8319_v61  ;;  %v8182_v10 = vcombine.low %v536_v62, %v540_v63 }
  0xba   : > { %v668_v1 = vld [vmem:[%s9358_s25 + $0xc60] sm:$0xff]  ;;  %6551 = vmatpush1.bf16.msra.mxu0 %v8190_v2  ;;  %6592 = vmatpush1.bf16.msra.mxu1 %v8318_v3 }
  0xbb   : > { %v8311_v5 = vcombine.high %v664_v0, %v668_v1  ;;  %v528_v6 = vld [vmem:[%s9358_s25 + $0x800] sm:$0xff]  ;;  %6552 = vmatprep.subr.bf16.mxu0 %v8183_v4  ;;  %v8310_v11 = vcombine.low %v664_v0, %v668_v1 }
  0xbc   : > { %v532_v7 = vld [vmem:[%s9358_s25 + $0x820] sm:$0xff] }
  0xbd   : > { %v656_v8 = vld [vmem:[%s9358_s25 + $0xc00] sm:$0xff]  ;;  %v8175_v12 = vcombine.high %v528_v6, %v532_v7  ;;  %6593 = vmatprep.subr.bf16.mxu1 %v8311_v5  ;;  %v8174_v19 = vcombine.low %v528_v6, %v532_v7 }
  0xbe   : > { %v660_v9 = vld [vmem:[%s9358_s25 + $0xc20] sm:$0xff]  ;;  %6553 = vmatpush1.bf16.msra.mxu0 %v8182_v10  ;;  %6594 = vmatpush1.bf16.msra.mxu1 %v8310_v11 }
  0xbf   : > { %v8303_v13 = vcombine.high %v656_v8, %v660_v9  ;;  %v648_v14 = vld [vmem:[%s9358_s25 + $0xbc0] sm:$0xff]  ;;  %6554 = vmatprep.subr.bf16.mxu0 %v8175_v12  ;;  %v8302_v21 = vcombine.low %v656_v8, %v660_v9 }
  0xc0   : > { %v652_v15 = vld [vmem:[%s9358_s25 + $0xbe0] sm:$0xff] }
  0xc1   : > { %v776_v17 = vld [vmem:[%s9358_s25 + $0xfc0] sm:$0xff]  ;;  %v8295_v22 = vcombine.high %v648_v14, %v652_v15  ;;  %6595 = vmatprep.subr.bf16.mxu1 %v8303_v13  ;;  %v8294_v29 = vcombine.low %v648_v14, %v652_v15 }
  0xc2   : > { %v780_v18 = vld [vmem:[%s9358_s25 + $0xfe0] sm:$0xff]  ;;  %6555 = vmatpush1.bf16.msra.mxu0 %v8174_v19  ;;  %6596 = vmatpush1.bf16.msra.mxu1 %v8302_v21 }
  0xc3   : > { %v8423_v23 = vcombine.high %v776_v17, %v780_v18  ;;  %v640_v24 = vld [vmem:[%s9358_s25 + $0xb80] sm:$0xff]  ;;  %6556 = vmatprep.subr.bf16.mxu0 %v8295_v22  ;;  %v8422_v30 = vcombine.low %v776_v17, %v780_v18 }
  0xc4   : > { %v644_v25 = vld [vmem:[%s9358_s25 + $0xba0] sm:$0xff] }
  0xc5   : > { %v768_v26 = vld [vmem:[%s9358_s25 + $0xf80] sm:$0xff]  ;;  %v8287_v32 = vcombine.high %v640_v24, %v644_v25  ;;  %6597 = vmatprep.subr.bf16.mxu1 %v8423_v23  ;;  %v8286_v38 = vcombine.low %v640_v24, %v644_v25 }
  0xc6   : > { %v772_v27 = vld [vmem:[%s9358_s25 + $0xfa0] sm:$0xff]  ;;  %6557 = vmatpush2.bf16.msra.mxu0 %v8294_v29  ;;  %6598 = vmatpush2.bf16.msra.mxu1 %v8422_v30  ;;  %v246_v30 = vld [vmem:[#allocation2 + $0x30] sm:$0xff] }
  0xc7   : > { %v8415_v33 = vcombine.high %v768_v26, %v772_v27  ;;  %v632_v34 = vld [vmem:[%s9358_s25 + $0xb40] sm:$0xff]  ;;  %6558 = vmatprep.subr.bf16.mxu0 %v8287_v32  ;;  %v8414_v39 = vcombine.low %v768_v26, %v772_v27 }
  0xc8   : > { %v636_v35 = vld [vmem:[%s9358_s25 + $0xb60] sm:$0xff] }
  0xc9   : > { %v760_v36 = vld [vmem:[%s9358_s25 + $0xf40] sm:$0xff]  ;;  %v8279_v40 = vcombine.high %v632_v34, %v636_v35  ;;  %6599 = vmatprep.subr.bf16.mxu1 %v8415_v33  ;;  %v8278_v46 = vcombine.low %v632_v34, %v636_v35 }
  0xca   : > { %v764_v37 = vld [vmem:[%s9358_s25 + $0xf60] sm:$0xff]  ;;  %6559 = vmatpush2.bf16.msra.mxu0 %v8286_v38  ;;  %6600 = vmatpush2.bf16.msra.mxu1 %v8414_v39  ;;  %v249_v39 = vld [vmem:[#allocation2 + $0x48] sm:$0xff] }
  0xcb   : > { %v8407_v41 = vcombine.high %v760_v36, %v764_v37  ;;  %v624_v42 = vld [vmem:[%s9358_s25 + $0xb00] sm:$0xff]  ;;  %6560 = vmatprep.subr.bf16.mxu0 %v8279_v40  ;;  %v8406_v47 = vcombine.low %v760_v36, %v764_v37  ;;  %v9520_v40 = vpack.c.bf16 %v246_v30, %v246_v30 }
  0xcc   : > { %v628_v43 = vld [vmem:[%s9358_s25 + $0xb20] sm:$0xff] }
  0xcd   : > { %v752_v44 = vld [vmem:[%s9358_s25 + $0xf00] sm:$0xff]  ;;  %v8271_v48 = vcombine.high %v624_v42, %v628_v43  ;;  %6601 = vmatprep.subr.bf16.mxu1 %v8407_v41  ;;  %v8270_v54 = vcombine.low %v624_v42, %v628_v43  ;;  %v251_v42 = vld [vmem:[#allocation2 + $0x58] sm:$0xff] }
  0xce   : > { %v756_v45 = vld [vmem:[%s9358_s25 + $0xf20] sm:$0xff]  ;;  %6561 = vmatpush2.bf16.msra.mxu0 %v8278_v46  ;;  %6602 = vmatpush2.bf16.msra.mxu1 %v8406_v47 }
  0xcf   : > { %v8399_v49 = vcombine.high %v752_v44, %v756_v45  ;;  %v616_v50 = vld [vmem:[%s9358_s25 + $0xac0] sm:$0xff]  ;;  %6562 = vmatprep.subr.bf16.mxu0 %v8271_v48  ;;  %v8398_v55 = vcombine.low %v752_v44, %v756_v45  ;;  %v9524_v48 = vpack.c.bf16 %v249_v39, %v249_v39 }
  0xd0   : > { %v620_v51 = vld [vmem:[%s9358_s25 + $0xae0] sm:$0xff] }
  0xd1   : > { %v744_v52 = vld [vmem:[%s9358_s25 + $0xec0] sm:$0xff]  ;;  %v8263_v56 = vcombine.high %v616_v50, %v620_v51  ;;  %6603 = vmatprep.subr.bf16.mxu1 %v8399_v49  ;;  %v8262_v0 = vcombine.low %v616_v50, %v620_v51  ;;  %v9529_v51 = vpack.c.bf16 %v251_v42, %v251_v42 }
  0xd2   : > { %v748_v53 = vld [vmem:[%s9358_s25 + $0xee0] sm:$0xff]  ;;  %6563 = vmatpush2.bf16.msra.mxu0 %v8270_v54  ;;  %6604 = vmatpush2.bf16.msra.mxu1 %v8398_v55 }
  0xd3   : > { %v8391_v57 = vcombine.high %v744_v52, %v748_v53  ;;  %v608_v60 = vld [vmem:[%s9358_s25 + $0xa80] sm:$0xff]  ;;  %6564 = vmatprep.subr.bf16.mxu0 %v8263_v56  ;;  %v8390_v1 = vcombine.low %v744_v52, %v748_v53 }
  0xd4   : > { %v612_v61 = vld [vmem:[%s9358_s25 + $0xaa0] sm:$0xff] }
  0xd5   : > { %v736_v62 = vld [vmem:[%s9358_s25 + $0xe80] sm:$0xff]  ;;  %v8255_v2 = vcombine.high %v608_v60, %v612_v61  ;;  %6605 = vmatprep.subr.bf16.mxu1 %v8391_v57  ;;  %v8254_v8 = vcombine.low %v608_v60, %v612_v61 }
  0xd6   : > { %v740_v63 = vld [vmem:[%s9358_s25 + $0xea0] sm:$0xff]  ;;  %6565 = vmatpush2.bf16.msra.mxu0 %v8262_v0  ;;  %6606 = vmatpush2.bf16.msra.mxu1 %v8390_v1 }
  0xd7   : > { %v8383_v3 = vcombine.high %v736_v62, %v740_v63  ;;  %v600_v4 = vld [vmem:[%s9358_s25 + $0xa40] sm:$0xff]  ;;  %6566 = vmatprep.subr.bf16.mxu0 %v8255_v2  ;;  %v8382_v9 = vcombine.low %v736_v62, %v740_v63 }
  0xd8   : > { %v604_v5 = vld [vmem:[%s9358_s25 + $0xa60] sm:$0xff] }
  0xd9   : > { %v728_v6 = vld [vmem:[%s9358_s25 + $0xe40] sm:$0xff]  ;;  %v8247_v10 = vcombine.high %v600_v4, %v604_v5  ;;  %6607 = vmatprep.subr.bf16.mxu1 %v8383_v3  ;;  %v8246_v17 = vcombine.low %v600_v4, %v604_v5 }
  0xda   : > { %v732_v7 = vld [vmem:[%s9358_s25 + $0xe60] sm:$0xff]  ;;  %6567 = vmatpush2.bf16.msra.mxu0 %v8254_v8  ;;  %6608 = vmatpush2.bf16.msra.mxu1 %v8382_v9 }
  0xdb   : > { %v8375_v11 = vcombine.high %v728_v6, %v732_v7  ;;  %v592_v12 = vld [vmem:[%s9358_s25 + $0xa00] sm:$0xff]  ;;  %6568 = vmatprep.subr.bf16.mxu0 %v8247_v10  ;;  %v8374_v18 = vcombine.low %v728_v6, %v732_v7 }
  0xdc   : > { %v596_v13 = vld [vmem:[%s9358_s25 + $0xa20] sm:$0xff] }
  0xdd   : > { %v720_v14 = vld [vmem:[%s9358_s25 + $0xe00] sm:$0xff]  ;;  %v8239_v19 = vcombine.high %v592_v12, %v596_v13  ;;  %6609 = vmatprep.subr.bf16.mxu1 %v8375_v11  ;;  %v8238_v26 = vcombine.low %v592_v12, %v596_v13 }
  0xde   : > { %v724_v15 = vld [vmem:[%s9358_s25 + $0xe20] sm:$0xff]  ;;  %6569 = vmatpush2.bf16.msra.mxu0 %v8246_v17  ;;  %6610 = vmatpush2.bf16.msra.mxu1 %v8374_v18 }
  0xdf   : > { %v8367_v21 = vcombine.high %v720_v14, %v724_v15  ;;  %v840_v22 = vld [vmem:[%s9358_s25 + $0x11c0] sm:$0xff]  ;;  %6570 = vmatprep.subr.bf16.mxu0 %v8239_v19  ;;  %v8366_v29 = vcombine.low %v720_v14, %v724_v15 }
  0xe0   : > { %v844_v23 = vld [vmem:[%s9358_s25 + $0x11e0] sm:$0xff] }
  0xe1   : > { %v968_v24 = vld [vmem:[%s9358_s25 + $0x15c0] sm:$0xff]  ;;  %v8487_v32 = vcombine.high %v840_v22, %v844_v23  ;;  %6611 = vmatprep.subr.bf16.mxu1 %v8367_v21  ;;  %v8486_v41 = vcombine.low %v840_v22, %v844_v23 }
  0xe2   : > { %v972_v25 = vld [vmem:[%s9358_s25 + $0x15e0] sm:$0xff]  ;;  %6571 = vmatpush2.bf16.msra.mxu0 %v8238_v26  ;;  %6612 = vmatpush2.bf16.msra.mxu1 %v8366_v29 }
  0xe3   : > { %v244_v27 = vld [vmem:[#allocation2 + $0x20] sm:$0xff]  ;;  %v8615_v33 = vcombine.high %v968_v24, %v972_v25  ;;  %6622 = vmatprep.subr.bf16.mxu0 %v8487_v32  ;;  %v8614_v43 = vcombine.low %v968_v24, %v972_v25 }
  0xe4   : > { %v832_v34 = vld [vmem:[%s9358_s25 + $0x1180] sm:$0xff]  ;;  %v9516_v36 = vpack.c.bf16 %v244_v27, %v244_v27 }
  0xe5   : > { %v836_v35 = vld [vmem:[%s9358_s25 + $0x11a0] sm:$0xff]  ;;  %6663 = vmatprep.subr.bf16.mxu1 %v8615_v33  ;;  %6614 = vmatmul.mubr.bf16.vlgmr.msra.gmra.mxu1 %v9520_v40 }
  0xe6   : > { %v960_v37 = vld [vmem:[%s9358_s25 + $0x1580] sm:$0xff]  ;;  %v8479_v44 = vcombine.high %v832_v34, %v836_v35  ;;  %6573 = vmatmul.mubr.bf16.vlgmr.msra.gmra.mxu0 %v9516_v36  ;;  %v8478_v52 = vcombine.low %v832_v34, %v836_v35  ;;  %6664 = vmatpush1.bf16.msra.mxu1 %v8614_v43 }
  0xe7   : > { %v964_v38 = vld [vmem:[%s9358_s25 + $0x15a0] sm:$0xff]  ;;  %6623 = vmatpush1.bf16.msra.mxu0 %v8486_v41  ;;  %6654 = vmatprep.mubr.bf16.mxu0 %v9524_v48 }
  0xe8   : > { %v8607_v45 = vcombine.high %v960_v37, %v964_v38  ;;  %v824_v46 = vld [vmem:[%s9358_s25 + $0x1140] sm:$0xff]  ;;  %6624 = vmatprep.subr.bf16.mxu0 %v8479_v44  ;;  %v8606_v53 = vcombine.low %v960_v37, %v964_v38  ;;  %6695 = vmatprep.mubr.bf16.mxu1 %v9529_v51 }
  0xe9   : > { %v828_v47 = vld [vmem:[%s9358_s25 + $0x1160] sm:$0xff] }
  0xea   : > { %v952_v49 = vld [vmem:[%s9358_s25 + $0x1540] sm:$0xff]  ;;  %v8471_v54 = vcombine.high %v824_v46, %v828_v47  ;;  %6665 = vmatprep.subr.bf16.mxu1 %v8607_v45  ;;  %v8470_v62 = vcombine.low %v824_v46, %v828_v47 }
  0xeb   : > { %v956_v50 = vld [vmem:[%s9358_s25 + $0x1560] sm:$0xff]  ;;  %6625 = vmatpush1.bf16.msra.mxu0 %v8478_v52  ;;  %6666 = vmatpush1.bf16.msra.mxu1 %v8606_v53 }
  0xec   : > { %v8599_v55 = vcombine.high %v952_v49, %v956_v50  ;;  %v816_v56 = vld [vmem:[%s9358_s25 + $0x1100] sm:$0xff]  ;;  %6626 = vmatprep.subr.bf16.mxu0 %v8471_v54  ;;  %v8598_v63 = vcombine.low %v952_v49, %v956_v50 }
  0xed   : > { %v820_v57 = vld [vmem:[%s9358_s25 + $0x1120] sm:$0xff] }
  0xee   : > { %v944_v60 = vld [vmem:[%s9358_s25 + $0x1500] sm:$0xff]  ;;  %v8463_v0 = vcombine.high %v816_v56, %v820_v57  ;;  %6667 = vmatprep.subr.bf16.mxu1 %v8599_v55  ;;  %v8462_v6 = vcombine.low %v816_v56, %v820_v57 }
  0xef   : > { %v948_v61 = vld [vmem:[%s9358_s25 + $0x1520] sm:$0xff]  ;;  %6627 = vmatpush1.bf16.msra.mxu0 %v8470_v62  ;;  %6668 = vmatpush1.bf16.msra.mxu1 %v8598_v63 }
  0xf0   : > { %v8591_v1 = vcombine.high %v944_v60, %v948_v61  ;;  %v808_v2 = vld [vmem:[%s9358_s25 + $0x10c0] sm:$0xff]  ;;  %6628 = vmatprep.subr.bf16.mxu0 %v8463_v0  ;;  %v8590_v7 = vcombine.low %v944_v60, %v948_v61 }
  0xf1   : > { %v812_v3 = vld [vmem:[%s9358_s25 + $0x10e0] sm:$0xff] }
  0xf2   : > { %v936_v4 = vld [vmem:[%s9358_s25 + $0x14c0] sm:$0xff]  ;;  %v8455_v8 = vcombine.high %v808_v2, %v812_v3  ;;  %6669 = vmatprep.subr.bf16.mxu1 %v8591_v1  ;;  %v8454_v14 = vcombine.low %v808_v2, %v812_v3 }
  0xf3   : > { %v940_v5 = vld [vmem:[%s9358_s25 + $0x14e0] sm:$0xff]  ;;  %6629 = vmatpush1.bf16.msra.mxu0 %v8462_v6  ;;  %6670 = vmatpush1.bf16.msra.mxu1 %v8590_v7 }
  0xf4   : > { %v8583_v9 = vcombine.high %v936_v4, %v940_v5  ;;  %v800_v10 = vld [vmem:[%s9358_s25 + $0x1080] sm:$0xff]  ;;  %6630 = vmatprep.subr.bf16.mxu0 %v8455_v8  ;;  %v8582_v15 = vcombine.low %v936_v4, %v940_v5 }
  0xf5   : > { %v804_v11 = vld [vmem:[%s9358_s25 + $0x10a0] sm:$0xff] }
  0xf6   : > { %v928_v12 = vld [vmem:[%s9358_s25 + $0x1480] sm:$0xff]  ;;  %v8447_v17 = vcombine.high %v800_v10, %v804_v11  ;;  %6671 = vmatprep.subr.bf16.mxu1 %v8583_v9  ;;  %v8446_v24 = vcombine.low %v800_v10, %v804_v11 }
  0xf7   : > { %v932_v13 = vld [vmem:[%s9358_s25 + $0x14a0] sm:$0xff]  ;;  %6631 = vmatpush1.bf16.msra.mxu0 %v8454_v14  ;;  %6672 = vmatpush1.bf16.msra.mxu1 %v8582_v15 }
  0xf8   : > { %v8575_v18 = vcombine.high %v928_v12, %v932_v13  ;;  %v792_v19 = vld [vmem:[%s9358_s25 + $0x1040] sm:$0xff]  ;;  %6632 = vmatprep.subr.bf16.mxu0 %v8447_v17  ;;  %v8574_v25 = vcombine.low %v928_v12, %v932_v13 }
  0xf9   : > { %v796_v21 = vld [vmem:[%s9358_s25 + $0x1060] sm:$0xff] }
  0xfa   : > { %v920_v22 = vld [vmem:[%s9358_s25 + $0x1440] sm:$0xff]  ;;  %v8439_v26 = vcombine.high %v792_v19, %v796_v21  ;;  %6673 = vmatprep.subr.bf16.mxu1 %v8575_v18  ;;  %v8438_v34 = vcombine.low %v792_v19, %v796_v21 }
  0xfb   : > { %v924_v23 = vld [vmem:[%s9358_s25 + $0x1460] sm:$0xff]  ;;  %6633 = vmatpush1.bf16.msra.mxu0 %v8446_v24  ;;  %6674 = vmatpush1.bf16.msra.mxu1 %v8574_v25 }
  0xfc   : > { %v8567_v27 = vcombine.high %v920_v22, %v924_v23  ;;  %v784_v29 = vld [vmem:[%s9358_s25 + $0x1000] sm:$0xff]  ;;  %6634 = vmatprep.subr.bf16.mxu0 %v8439_v26  ;;  %v8566_v35 = vcombine.low %v920_v22, %v924_v23 }
  0xfd   : > { %v788_v30 = vld [vmem:[%s9358_s25 + $0x1020] sm:$0xff] }
  0xfe   : > { %v912_v32 = vld [vmem:[%s9358_s25 + $0x1400] sm:$0xff]  ;;  %v8431_v37 = vcombine.high %v784_v29, %v788_v30  ;;  %6675 = vmatprep.subr.bf16.mxu1 %v8567_v27  ;;  %v8430_v44 = vcombine.low %v784_v29, %v788_v30 }
  0xff   : > { %v916_v33 = vld [vmem:[%s9358_s25 + $0x1420] sm:$0xff]  ;;  %6635 = vmatpush1.bf16.msra.mxu0 %v8438_v34  ;;  %6676 = vmatpush1.bf16.msra.mxu1 %v8566_v35 }
 0x100   : > { %v8559_v38 = vcombine.high %v912_v32, %v916_v33  ;;  %v904_v39 = vld [vmem:[%s9358_s25 + $0x13c0] sm:$0xff]  ;;  %6636 = vmatprep.subr.bf16.mxu0 %v8431_v37  ;;  %v8558_v45 = vcombine.low %v912_v32, %v916_v33 }
 0x101   : > { %v908_v41 = vld [vmem:[%s9358_s25 + $0x13e0] sm:$0xff] }
 0x102   : > { %v1032_v42 = vld [vmem:[%s9358_s25 + $0x17c0] sm:$0xff]  ;;  %v8551_v46 = vcombine.high %v904_v39, %v908_v41  ;;  %6677 = vmatprep.subr.bf16.mxu1 %v8559_v38  ;;  %v8550_v54 = vcombine.low %v904_v39, %v908_v41 }
 0x103   : > { %v1036_v43 = vld [vmem:[%s9358_s25 + $0x17e0] sm:$0xff]  ;;  %6637 = vmatpush1.bf16.msra.mxu0 %v8430_v44  ;;  %6678 = vmatpush1.bf16.msra.mxu1 %v8558_v45 }
 0x104   : > { %v8679_v47 = vcombine.high %v1032_v42, %v1036_v43  ;;  %v896_v49 = vld [vmem:[%s9358_s25 + $0x1380] sm:$0xff]  ;;  %6638 = vmatprep.subr.bf16.mxu0 %v8551_v46  ;;  %v8678_v55 = vcombine.low %v1032_v42, %v1036_v43 }
 0x105   : > { %v900_v50 = vld [vmem:[%s9358_s25 + $0x13a0] sm:$0xff] }
 0x106   : > { %v1024_v52 = vld [vmem:[%s9358_s25 + $0x1780] sm:$0xff]  ;;  %v8543_v56 = vcombine.high %v896_v49, %v900_v50  ;;  %6679 = vmatprep.subr.bf16.mxu1 %v8679_v47  ;;  %v8542_v0 = vcombine.low %v896_v49, %v900_v50 }
 0x107   : > { %v1028_v53 = vld [vmem:[%s9358_s25 + $0x17a0] sm:$0xff]  ;;  %6639 = vmatpush2.bf16.msra.mxu0 %v8550_v54  ;;  %6680 = vmatpush2.bf16.msra.mxu1 %v8678_v55 }
 0x108   : > { %v8671_v57 = vcombine.high %v1024_v52, %v1028_v53  ;;  %v888_v60 = vld [vmem:[%s9358_s25 + $0x1340] sm:$0xff]  ;;  %6640 = vmatprep.subr.bf16.mxu0 %v8543_v56  ;;  %v8670_v1 = vcombine.low %v1024_v52, %v1028_v53 }
 0x109   : > { %v892_v61 = vld [vmem:[%s9358_s25 + $0x1360] sm:$0xff] }
 0x10a   : > { %v1016_v62 = vld [vmem:[%s9358_s25 + $0x1740] sm:$0xff]  ;;  %v8535_v2 = vcombine.high %v888_v60, %v892_v61  ;;  %6681 = vmatprep.subr.bf16.mxu1 %v8671_v57  ;;  %v8534_v8 = vcombine.low %v888_v60, %v892_v61  ;;  %v250_v61 = vld [vmem:[#allocation2 + $0x50] sm:$0xff] }
 0x10b   : > { %v1020_v63 = vld [vmem:[%s9358_s25 + $0x1760] sm:$0xff]  ;;  %6641 = vmatpush2.bf16.msra.mxu0 %v8542_v0  ;;  %6682 = vmatpush2.bf16.msra.mxu1 %v8670_v1 }
 0x10c   : > { %v8663_v3 = vcombine.high %v1016_v62, %v1020_v63  ;;  %v880_v4 = vld [vmem:[%s9358_s25 + $0x1300] sm:$0xff]  ;;  %6642 = vmatprep.subr.bf16.mxu0 %v8535_v2  ;;  %v8662_v9 = vcombine.low %v1016_v62, %v1020_v63 }
 0x10d   : > { %v884_v5 = vld [vmem:[%s9358_s25 + $0x1320] sm:$0xff] }
 0x10e   : > { %v1008_v6 = vld [vmem:[%s9358_s25 + $0x1700] sm:$0xff]  ;;  %v8527_v10 = vcombine.high %v880_v4, %v884_v5  ;;  %6683 = vmatprep.subr.bf16.mxu1 %v8663_v3  ;;  %v8526_v17 = vcombine.low %v880_v4, %v884_v5  ;;  %v253_v5 = vld [vmem:[#allocation2 + $0x68] sm:$0xff] }
 0x10f   : > { %v1012_v7 = vld [vmem:[%s9358_s25 + $0x1720] sm:$0xff]  ;;  %6643 = vmatpush2.bf16.msra.mxu0 %v8534_v8  ;;  %6684 = vmatpush2.bf16.msra.mxu1 %v8662_v9  ;;  %v255_v8 = vld [vmem:[#allocation2 + $0x78] sm:$0xff] }
 0x110   : > { %v8655_v11 = vcombine.high %v1008_v6, %v1012_v7  ;;  %v872_v12 = vld [vmem:[%s9358_s25 + $0x12c0] sm:$0xff]  ;;  %6644 = vmatprep.subr.bf16.mxu0 %v8527_v10  ;;  %v8654_v18 = vcombine.low %v1008_v6, %v1012_v7  ;;  %v9596_v6 = vpack.c.bf16 %v250_v61, %v250_v61 }
 0x111   : > { %v876_v13 = vld [vmem:[%s9358_s25 + $0x12e0] sm:$0xff] }
 0x112   : > { %v1000_v14 = vld [vmem:[%s9358_s25 + $0x16c0] sm:$0xff]  ;;  %v8519_v19 = vcombine.high %v872_v12, %v876_v13  ;;  %6685 = vmatprep.subr.bf16.mxu1 %v8655_v11  ;;  %v8518_v26 = vcombine.low %v872_v12, %v876_v13 }
 0x113   : > { %v1004_v15 = vld [vmem:[%s9358_s25 + $0x16e0] sm:$0xff]  ;;  %6645 = vmatpush2.bf16.msra.mxu0 %v8526_v17  ;;  %6686 = vmatpush2.bf16.msra.mxu1 %v8654_v18  ;;  %v9605_v18 = vpack.c.bf16 %v255_v8, %v255_v8 }
 0x114   : > { %v8647_v21 = vcombine.high %v1000_v14, %v1004_v15  ;;  %v864_v22 = vld [vmem:[%s9358_s25 + $0x1280] sm:$0xff]  ;;  %6646 = vmatprep.subr.bf16.mxu0 %v8519_v19  ;;  %v8646_v27 = vcombine.low %v1000_v14, %v1004_v15  ;;  %v9600_v14 = vpack.c.bf16 %v253_v5, %v253_v5 }
 0x115   : > { %v868_v23 = vld [vmem:[%s9358_s25 + $0x12a0] sm:$0xff] }
 0x116   : > { %v992_v24 = vld [vmem:[%s9358_s25 + $0x1680] sm:$0xff]  ;;  %v8511_v29 = vcombine.high %v864_v22, %v868_v23  ;;  %6687 = vmatprep.subr.bf16.mxu1 %v8647_v21  ;;  %v8510_v37 = vcombine.low %v864_v22, %v868_v23 }
 0x117   : > { %v996_v25 = vld [vmem:[%s9358_s25 + $0x16a0] sm:$0xff]  ;;  %6647 = vmatpush2.bf16.msra.mxu0 %v8518_v26  ;;  %6688 = vmatpush2.bf16.msra.mxu1 %v8646_v27 }
 0x118   : > { %v8639_v30 = vcombine.high %v992_v24, %v996_v25  ;;  %v856_v32 = vld [vmem:[%s9358_s25 + $0x1240] sm:$0xff]  ;;  %6648 = vmatprep.subr.bf16.mxu0 %v8511_v29  ;;  %v8638_v38 = vcombine.low %v992_v24, %v996_v25 }
 0x119   : > { %v860_v33 = vld [vmem:[%s9358_s25 + $0x1260] sm:$0xff] }
 0x11a   : > { %v984_v34 = vld [vmem:[%s9358_s25 + $0x1640] sm:$0xff]  ;;  %v8503_v39 = vcombine.high %v856_v32, %v860_v33  ;;  %6689 = vmatprep.subr.bf16.mxu1 %v8639_v30  ;;  %v8502_v46 = vcombine.low %v856_v32, %v860_v33 }
 0x11b   : > { %v988_v35 = vld [vmem:[%s9358_s25 + $0x1660] sm:$0xff]  ;;  %6649 = vmatpush2.bf16.msra.mxu0 %v8510_v37  ;;  %6690 = vmatpush2.bf16.msra.mxu1 %v8638_v38 }
 0x11c   : > { %v8631_v41 = vcombine.high %v984_v34, %v988_v35  ;;  %v848_v42 = vld [vmem:[%s9358_s25 + $0x1200] sm:$0xff]  ;;  %6650 = vmatprep.subr.bf16.mxu0 %v8503_v39  ;;  %v8630_v47 = vcombine.low %v984_v34, %v988_v35 }
 0x11d   : > { %v852_v43 = vld [vmem:[%s9358_s25 + $0x1220] sm:$0xff] }
 0x11e   : > { %v976_v44 = vld [vmem:[%s9358_s25 + $0x1600] sm:$0xff]  ;;  %v8495_v49 = vcombine.high %v848_v42, %v852_v43  ;;  %6691 = vmatprep.subr.bf16.mxu1 %v8631_v41  ;;  %v8494_v56 = vcombine.low %v848_v42, %v852_v43 }
 0x11f   : > { %v980_v45 = vld [vmem:[%s9358_s25 + $0x1620] sm:$0xff]  ;;  %6651 = vmatpush2.bf16.msra.mxu0 %v8502_v46  ;;  %6692 = vmatpush2.bf16.msra.mxu1 %v8630_v47 }
 0x120   : > { %v8623_v50 = vcombine.high %v976_v44, %v980_v45  ;;  %v1096_v52 = vld [vmem:[%s9358_s25 + $0x19c0] sm:$0xff]  ;;  %6652 = vmatprep.subr.bf16.mxu0 %v8495_v49  ;;  %v8622_v60 = vcombine.low %v976_v44, %v980_v45 }
 0x121   : > { %v1100_v53 = vld [vmem:[%s9358_s25 + $0x19e0] sm:$0xff] }
 0x122   : > { %v1224_v54 = vld [vmem:[%s9358_s25 + $0x1dc0] sm:$0xff]  ;;  %v8743_v62 = vcombine.high %v1096_v52, %v1100_v53  ;;  %6693 = vmatprep.subr.bf16.mxu1 %v8623_v50  ;;  %v8742_v7 = vcombine.low %v1096_v52, %v1100_v53 }
 0x123   : > { %v1228_v55 = vld [vmem:[%s9358_s25 + $0x1de0] sm:$0xff]  ;;  %6653 = vmatpush2.bf16.msra.mxu0 %v8494_v56  ;;  %6694 = vmatpush2.bf16.msra.mxu1 %v8622_v60 }
 0x124   : > { %v248_v57 = vld [vmem:[#allocation2 + $0x40] sm:$0xff]  ;;  %v8871_v63 = vcombine.high %v1224_v54, %v1228_v55  ;;  %6704 = vmatprep.subr.bf16.mxu0 %v8743_v62  ;;  %v8870_v9 = vcombine.low %v1224_v54, %v1228_v55 }
 0x125   : > { %v1088_v0 = vld [vmem:[%s9358_s25 + $0x1980] sm:$0xff]  ;;  %v9592_v2 = vpack.c.bf16 %v248_v57, %v248_v57 }
 0x126   : > { %v1092_v1 = vld [vmem:[%s9358_s25 + $0x19a0] sm:$0xff]  ;;  %6745 = vmatprep.subr.bf16.mxu1 %v8871_v63  ;;  %6696 = vmatmul.mubr.bf16.vlgmr.msra.gmra.mxu1 %v9596_v6 }
 0x127   : > { %v1216_v3 = vld [vmem:[%s9358_s25 + $0x1d80] sm:$0xff]  ;;  %v8735_v10 = vcombine.high %v1088_v0, %v1092_v1  ;;  %6655 = vmatmul.mubr.bf16.vlgmr.msra.gmra.mxu0 %v9592_v2  ;;  %v8734_v19 = vcombine.low %v1088_v0, %v1092_v1  ;;  %6746 = vmatpush1.bf16.msra.mxu1 %v8870_v9 }
 0x128   : > { %v1220_v4 = vld [vmem:[%s9358_s25 + $0x1da0] sm:$0xff]  ;;  %6705 = vmatpush1.bf16.msra.mxu0 %v8742_v7  ;;  %6736 = vmatprep.mubr.bf16.mxu0 %v9600_v14 }
 0x129   : > { %v8863_v11 = vcombine.high %v1216_v3, %v1220_v4  ;;  %v1080_v12 = vld [vmem:[%s9358_s25 + $0x1940] sm:$0xff]  ;;  %6706 = vmatprep.subr.bf16.mxu0 %v8735_v10  ;;  %v8862_v21 = vcombine.low %v1216_v3, %v1220_v4  ;;  %6777 = vmatprep.mubr.bf16.mxu1 %v9605_v18 }
 0x12a   : > { %v1084_v13 = vld [vmem:[%s9358_s25 + $0x1960] sm:$0xff] }
 0x12b   : > { %v1208_v15 = vld [vmem:[%s9358_s25 + $0x1d40] sm:$0xff]  ;;  %v8727_v22 = vcombine.high %v1080_v12, %v1084_v13  ;;  %6747 = vmatprep.subr.bf16.mxu1 %v8863_v11  ;;  %v8726_v29 = vcombine.low %v1080_v12, %v1084_v13 }
 0x12c   : > { %v1212_v17 = vld [vmem:[%s9358_s25 + $0x1d60] sm:$0xff]  ;;  %6707 = vmatpush1.bf16.msra.mxu0 %v8734_v19  ;;  %6748 = vmatpush1.bf16.msra.mxu1 %v8862_v21 }
 0x12d   : > { %v8855_v23 = vcombine.high %v1208_v15, %v1212_v17  ;;  %v1072_v24 = vld [vmem:[%s9358_s25 + $0x1900] sm:$0xff]  ;;  %6708 = vmatprep.subr.bf16.mxu0 %v8727_v22  ;;  %v8854_v30 = vcombine.low %v1208_v15, %v1212_v17 }
 0x12e   : > { %v1076_v25 = vld [vmem:[%s9358_s25 + $0x1920] sm:$0xff] }
 0x12f   : > { %v1200_v26 = vld [vmem:[%s9358_s25 + $0x1d00] sm:$0xff]  ;;  %v8719_v32 = vcombine.high %v1072_v24, %v1076_v25  ;;  %6749 = vmatprep.subr.bf16.mxu1 %v8855_v23  ;;  %v8718_v39 = vcombine.low %v1072_v24, %v1076_v25 }
 0x130   : > { %v1204_v27 = vld [vmem:[%s9358_s25 + $0x1d20] sm:$0xff]  ;;  %6709 = vmatpush1.bf16.msra.mxu0 %v8726_v29  ;;  %6750 = vmatpush1.bf16.msra.mxu1 %v8854_v30 }
 0x131   : > { %v8847_v33 = vcombine.high %v1200_v26, %v1204_v27  ;;  %v1064_v34 = vld [vmem:[%s9358_s25 + $0x18c0] sm:$0xff]  ;;  %6710 = vmatprep.subr.bf16.mxu0 %v8719_v32  ;;  %v8846_v41 = vcombine.low %v1200_v26, %v1204_v27 }
 0x132   : > { %v1068_v35 = vld [vmem:[%s9358_s25 + $0x18e0] sm:$0xff] }
 0x133   : > { %v1192_v37 = vld [vmem:[%s9358_s25 + $0x1cc0] sm:$0xff]  ;;  %v8711_v42 = vcombine.high %v1064_v34, %v1068_v35  ;;  %6751 = vmatprep.subr.bf16.mxu1 %v8847_v33  ;;  %v8710_v49 = vcombine.low %v1064_v34, %v1068_v35 }
 0x134   : > { %v1196_v38 = vld [vmem:[%s9358_s25 + $0x1ce0] sm:$0xff]  ;;  %6711 = vmatpush1.bf16.msra.mxu0 %v8718_v39  ;;  %6752 = vmatpush1.bf16.msra.mxu1 %v8846_v41 }
 0x135   : > { %v8839_v43 = vcombine.high %v1192_v37, %v1196_v38  ;;  %v1056_v44 = vld [vmem:[%s9358_s25 + $0x1880] sm:$0xff]  ;;  %6712 = vmatprep.subr.bf16.mxu0 %v8711_v42  ;;  %v8838_v50 = vcombine.low %v1192_v37, %v1196_v38 }
 0x136   : > { %v1060_v45 = vld [vmem:[%s9358_s25 + $0x18a0] sm:$0xff] }
 0x137   : > { %v1184_v46 = vld [vmem:[%s9358_s25 + $0x1c80] sm:$0xff]  ;;  %v8703_v52 = vcombine.high %v1056_v44, %v1060_v45  ;;  %6753 = vmatprep.subr.bf16.mxu1 %v8839_v43  ;;  %v8702_v60 = vcombine.low %v1056_v44, %v1060_v45 }
 0x138   : > { %v1188_v47 = vld [vmem:[%s9358_s25 + $0x1ca0] sm:$0xff]  ;;  %6713 = vmatpush1.bf16.msra.mxu0 %v8710_v49  ;;  %6754 = vmatpush1.bf16.msra.mxu1 %v8838_v50 }
 0x139   : > { %v8831_v53 = vcombine.high %v1184_v46, %v1188_v47  ;;  %v1048_v54 = vld [vmem:[%s9358_s25 + $0x1840] sm:$0xff]  ;;  %6714 = vmatprep.subr.bf16.mxu0 %v8703_v52  ;;  %v8830_v61 = vcombine.low %v1184_v46, %v1188_v47 }
 0x13a   : > { %v1052_v55 = vld [vmem:[%s9358_s25 + $0x1860] sm:$0xff] }
 0x13b   : > { %v1176_v56 = vld [vmem:[%s9358_s25 + $0x1c40] sm:$0xff]  ;;  %v8695_v62 = vcombine.high %v1048_v54, %v1052_v55  ;;  %6755 = vmatprep.subr.bf16.mxu1 %v8831_v53  ;;  %v8694_v5 = vcombine.low %v1048_v54, %v1052_v55 }
 0x13c   : > { %v1180_v57 = vld [vmem:[%s9358_s25 + $0x1c60] sm:$0xff]  ;;  %6715 = vmatpush1.bf16.msra.mxu0 %v8702_v60  ;;  %6756 = vmatpush1.bf16.msra.mxu1 %v8830_v61 }
 0x13d   : > { %v8823_v63 = vcombine.high %v1176_v56, %v1180_v57  ;;  %v1040_v0 = vld [vmem:[%s9358_s25 + $0x1800] sm:$0xff]  ;;  %6716 = vmatprep.subr.bf16.mxu0 %v8695_v62  ;;  %v8822_v7 = vcombine.low %v1176_v56, %v1180_v57 }
 0x13e   : > { %v1044_v1 = vld [vmem:[%s9358_s25 + $0x1820] sm:$0xff] }
 0x13f   : > { %v1168_v3 = vld [vmem:[%s9358_s25 + $0x1c00] sm:$0xff]  ;;  %v8687_v8 = vcombine.high %v1040_v0, %v1044_v1  ;;  %6757 = vmatprep.subr.bf16.mxu1 %v8823_v63  ;;  %v8686_v15 = vcombine.low %v1040_v0, %v1044_v1 }
 0x140   : > { %v1172_v4 = vld [vmem:[%s9358_s25 + $0x1c20] sm:$0xff]  ;;  %6717 = vmatpush1.bf16.msra.mxu0 %v8694_v5  ;;  %6758 = vmatpush1.bf16.msra.mxu1 %v8822_v7 }
 0x141   : > { %v8815_v9 = vcombine.high %v1168_v3, %v1172_v4  ;;  %v1160_v10 = vld [vmem:[%s9358_s25 + $0x1bc0] sm:$0xff]  ;;  %6718 = vmatprep.subr.bf16.mxu0 %v8687_v8  ;;  %v8814_v17 = vcombine.low %v1168_v3, %v1172_v4 }
 0x142   : > { %v1164_v11 = vld [vmem:[%s9358_s25 + $0x1be0] sm:$0xff] }
 0x143   : > { %v1288_v12 = vld [vmem:[%s9358_s25 + $0x1fc0] sm:$0xff]  ;;  %v8807_v19 = vcombine.high %v1160_v10, %v1164_v11  ;;  %6759 = vmatprep.subr.bf16.mxu1 %v8815_v9  ;;  %v8806_v26 = vcombine.low %v1160_v10, %v1164_v11 }
 0x144   : > { %v1292_v13 = vld [vmem:[%s9358_s25 + $0x1fe0] sm:$0xff]  ;;  %6719 = vmatpush1.bf16.msra.mxu0 %v8686_v15  ;;  %6760 = vmatpush1.bf16.msra.mxu1 %v8814_v17 }
 0x145   : > { %v8935_v21 = vcombine.high %v1288_v12, %v1292_v13  ;;  %v1152_v22 = vld [vmem:[%s9358_s25 + $0x1b80] sm:$0xff]  ;;  %6720 = vmatprep.subr.bf16.mxu0 %v8807_v19  ;;  %v8934_v27 = vcombine.low %v1288_v12, %v1292_v13  ;;  %v1298_v13 = vlaneseq }
 0x146   : > { %v1156_v23 = vld [vmem:[%s9358_s25 + $0x1ba0] sm:$0xff] }
 0x147   : > { %v1280_v24 = vld [vmem:[%s9358_s25 + $0x1f80] sm:$0xff]  ;;  %v8799_v29 = vcombine.high %v1152_v22, %v1156_v23  ;;  %6761 = vmatprep.subr.bf16.mxu1 %v8935_v21  ;;  %v8798_v37 = vcombine.low %v1152_v22, %v1156_v23 }
 0x148   : > { %v1284_v25 = vld [vmem:[%s9358_s25 + $0x1fa0] sm:$0xff]  ;;  %6721 = vmatpush2.bf16.msra.mxu0 %v8806_v26  ;;  %6762 = vmatpush2.bf16.msra.mxu1 %v8934_v27  ;;  %v9663_v26 = vshrl.u32 %v1298_v13, 7 }
 0x149   : > { %v8927_v30 = vcombine.high %v1280_v24, %v1284_v25  ;;  %v1144_v32 = vld [vmem:[%s9358_s25 + $0x1b40] sm:$0xff]  ;;  %6722 = vmatprep.subr.bf16.mxu0 %v8799_v29  ;;  %v8926_v38 = vcombine.low %v1280_v24, %v1284_v25 }
 0x14a   : > { %v1148_v33 = vld [vmem:[%s9358_s25 + $0x1b60] sm:$0xff] }
 0x14b   : > { %v1272_v34 = vld [vmem:[%s9358_s25 + $0x1f40] sm:$0xff]  ;;  %v8791_v39 = vcombine.high %v1144_v32, %v1148_v33  ;;  %6763 = vmatprep.subr.bf16.mxu1 %v8927_v30  ;;  %v8790_v46 = vcombine.low %v1144_v32, %v1148_v33  ;;  %v329_v32 = vld [vmem:[%s9358_s25 + $0x1c8] sm:$0xff] }
 0x14c   : > { %v1276_v35 = vld [vmem:[%s9358_s25 + $0x1f60] sm:$0xff]  ;;  %6723 = vmatpush2.bf16.msra.mxu0 %v8798_v37  ;;  %6764 = vmatpush2.bf16.msra.mxu1 %v8926_v38  ;;  %v333_v33 = vld [vmem:[%s9358_s25 + $0x1e8] sm:$0xff]  ;;  %v1300_v38 = vsub.s32 0, %v9663_v26 }
 0x14d   : > { %v8919_v41 = vcombine.high %v1272_v34, %v1276_v35  ;;  %v1136_v42 = vld [vmem:[%s9358_s25 + $0x1b00] sm:$0xff]  ;;  %6724 = vmatprep.subr.bf16.mxu0 %v8791_v39  ;;  %v8918_v47 = vcombine.low %v1272_v34, %v1276_v35  ;;  %v457_v34 = vld [vmem:[%s9358_s25 + $0x5c8] sm:$0xff] }
 0x14e   : > { %v1140_v43 = vld [vmem:[%s9358_s25 + $0x1b20] sm:$0xff]  ;;  %v461_v35 = vld [vmem:[%s9358_s25 + $0x5e8] sm:$0xff] }
 0x14f   : > { %v1264_v44 = vld [vmem:[%s9358_s25 + $0x1f00] sm:$0xff]  ;;  %v8783_v49 = vcombine.high %v1136_v42, %v1140_v43  ;;  %6765 = vmatprep.subr.bf16.mxu1 %v8919_v41  ;;  %v8782_v56 = vcombine.low %v1136_v42, %v1140_v43  ;;  %v254_v43 = vld [vmem:[#allocation2 + $0x70] sm:$0xff] }
 0x150   : > { %v1268_v45 = vld [vmem:[%s9358_s25 + $0x1f20] sm:$0xff]  ;;  %6725 = vmatpush2.bf16.msra.mxu0 %v8790_v46  ;;  %6766 = vmatpush2.bf16.msra.mxu1 %v8918_v47  ;;  %v1304_v46 = vsub.s32 1, %v9663_v26  ;;  %v321_v47 = vld [vmem:[%s9358_s25 + $0x188] sm:$0xff] }
 0x151   : > { %v8911_v50 = vcombine.high %v1264_v44, %v1268_v45  ;;  %v1128_v52 = vld [vmem:[%s9358_s25 + $0x1ac0] sm:$0xff]  ;;  %6726 = vmatprep.subr.bf16.mxu0 %v8783_v49  ;;  %v8910_v57 = vcombine.low %v1264_v44, %v1268_v45  ;;  %v7977_v44 = vcombine.high %v329_v32, %v333_v33  ;;  %v8105_v45 = vcombine.high %v457_v34, %v461_v35  ;;  %v325_v49 = vld [vmem:[%s9358_s25 + $0x1a8] sm:$0xff] }
 0x152   : > { %v1132_v53 = vld [vmem:[%s9358_s25 + $0x1ae0] sm:$0xff] }
 0x153   : > { %v1256_v54 = vld [vmem:[%s9358_s25 + $0x1ec0] sm:$0xff]  ;;  %v8775_v60 = vcombine.high %v1128_v52, %v1132_v53  ;;  %6767 = vmatprep.subr.bf16.mxu1 %v8911_v50  ;;  %v8774_v3 = vcombine.low %v1128_v52, %v1132_v53  ;;  %v449_v52 = vld [vmem:[%s9358_s25 + $0x588] sm:$0xff] }
 0x154   : > { %v1260_v55 = vld [vmem:[%s9358_s25 + $0x1ee0] sm:$0xff]  ;;  %6727 = vmatpush2.bf16.msra.mxu0 %v8782_v56  ;;  %6768 = vmatpush2.bf16.msra.mxu1 %v8910_v57  ;;  %v453_v53 = vld [vmem:[%s9358_s25 + $0x5a8] sm:$0xff]  ;;  %v7976_v56 = vcombine.low %v329_v32, %v333_v33  ;;  %v8104_v57 = vcombine.low %v457_v34, %v461_v35 }
 0x155   : > { %v8903_v61 = vcombine.high %v1256_v54, %v1260_v55  ;;  %v1120_v62 = vld [vmem:[%s9358_s25 + $0x1a80] sm:$0xff]  ;;  %6728 = vmatprep.subr.bf16.mxu0 %v8775_v60  ;;  %v8902_v4 = vcombine.low %v1256_v54, %v1260_v55  ;;  %v9680_v55 = vpack.c.bf16 %v254_v43, %v254_v43  ;;  %v7969_v60 = vcombine.high %v321_v47, %v325_v49 }
 0x156   : > { %v1124_v63 = vld [vmem:[%s9358_s25 + $0x1aa0] sm:$0xff] }
 0x157   : > { %v1248_v0 = vld [vmem:[%s9358_s25 + $0x1e80] sm:$0xff]  ;;  %v8767_v5 = vcombine.high %v1120_v62, %v1124_v63  ;;  %6769 = vmatprep.subr.bf16.mxu1 %v8903_v61  ;;  %v8766_v12 = vcombine.low %v1120_v62, %v1124_v63  ;;  %v8097_v62 = vcombine.high %v449_v52, %v453_v53  ;;  %v313_v63 = vld [vmem:[%s9358_s25 + $0x148] sm:$0xff] }
 0x158   : > { %v1252_v1 = vld [vmem:[%s9358_s25 + $0x1ea0] sm:$0xff]  ;;  %6729 = vmatpush2.bf16.msra.mxu0 %v8774_v3  ;;  %6770 = vmatpush2.bf16.msra.mxu1 %v8902_v4  ;;  %v441_v3 = vld [vmem:[%s9358_s25 + $0x548] sm:$0xff] }
 0x159   : > { %v8895_v7 = vcombine.high %v1248_v0, %v1252_v1  ;;  %v1112_v8 = vld [vmem:[%s9358_s25 + $0x1a40] sm:$0xff]  ;;  %6730 = vmatprep.subr.bf16.mxu0 %v8767_v5  ;;  %v8894_v15 = vcombine.low %v1248_v0, %v1252_v1  ;;  %v317_v0 = vld [vmem:[%s9358_s25 + $0x168] sm:$0xff] }
 0x15a   : > { %v1116_v9 = vld [vmem:[%s9358_s25 + $0x1a60] sm:$0xff]  ;;  %v445_v4 = vld [vmem:[%s9358_s25 + $0x568] sm:$0xff] }
 0x15b   : > { %v1240_v10 = vld [vmem:[%s9358_s25 + $0x1e40] sm:$0xff]  ;;  %v8759_v17 = vcombine.high %v1112_v8, %v1116_v9  ;;  %6771 = vmatprep.subr.bf16.mxu1 %v8895_v7  ;;  %v8758_v25 = vcombine.low %v1112_v8, %v1116_v9  ;;  %v7968_v8 = vcombine.low %v321_v47, %v325_v49  ;;  %v8088_v32 = vcombine.low %v441_v3, %v445_v4  ;;  %v293_v47 = vld [vmem:[%s9358_s25 + $0xa8] sm:$0xff] }
 0x15c   : > { %v1244_v11 = vld [vmem:[%s9358_s25 + $0x1e60] sm:$0xff]  ;;  %6731 = vmatpush2.bf16.msra.mxu0 %v8766_v12  ;;  %6772 = vmatpush2.bf16.msra.mxu1 %v8894_v15  ;;  %v417_v49 = vld [vmem:[%s9358_s25 + $0x488] sm:$0xff] }
 0x15d   : > { %v8887_v19 = vcombine.high %v1240_v10, %v1244_v11  ;;  %v1104_v21 = vld [vmem:[%s9358_s25 + $0x1a00] sm:$0xff]  ;;  %6732 = vmatprep.subr.bf16.mxu0 %v8759_v17  ;;  %v8886_v27 = vcombine.low %v1240_v10, %v1244_v11  ;;  %v8096_v10 = vcombine.low %v449_v52, %v453_v53  ;;  %v7961_v11 = vcombine.high %v313_v63, %v317_v0  ;;  %v421_v52 = vld [vmem:[%s9358_s25 + $0x4a8] sm:$0xff] }
 0x15e   : > { %v1108_v22 = vld [vmem:[%s9358_s25 + $0x1a20] sm:$0xff]  ;;  %v8089_v17 = vcombine.high %v441_v3, %v445_v4 }
 0x15f   : > { %v1232_v23 = vld [vmem:[%s9358_s25 + $0x1e00] sm:$0xff]  ;;  %v8751_v29 = vcombine.high %v1104_v21, %v1108_v22  ;;  %6773 = vmatprep.subr.bf16.mxu1 %v8887_v19  ;;  %v8750_v37 = vcombine.low %v1104_v21, %v1108_v22  ;;  %v305_v19 = vld [vmem:[%s9358_s25 + $0x108] sm:$0xff] }
 0x160   : > { %v1236_v24 = vld [vmem:[%s9358_s25 + $0x1e20] sm:$0xff]  ;;  %6733 = vmatpush2.bf16.msra.mxu0 %v8758_v25  ;;  %6774 = vmatpush2.bf16.msra.mxu1 %v8886_v27  ;;  %v309_v21 = vld [vmem:[%s9358_s25 + $0x128] sm:$0xff] }
 0x161   : > { %v8879_v30 = vcombine.high %v1232_v23, %v1236_v24  ;;  %v252_v39 = vld [vmem:[#allocation2 + $0x60] sm:$0xff]  ;;  %6734 = vmatprep.subr.bf16.mxu0 %v8751_v29  ;;  %v8878_v41 = vcombine.low %v1232_v23, %v1236_v24  ;;  %v433_v23 = vld [vmem:[%s9358_s25 + $0x508] sm:$0xff]  ;;  %v7960_v29 = vcombine.low %v313_v63, %v317_v0  ;;  %v7953_v33 = vcombine.high %v305_v19, %v309_v21 }
 0x162   : > { %v1296_v42 = vld [vmem:[%s9670_s27] sm:$0xff]  ;;  %v9676_v50 = vpack.c.bf16 %v252_v39, %v252_v39 }
 0x163   : > { %6775 = vmatprep.subr.bf16.mxu1 %v8879_v30  ;;  %v1301_v54 = vrot.slane %v1296_v42, %v1300_v38  ;;  %v1305_v61 = vrot.slane %v1296_v42, %v1304_v46  ;;  %v437_v24 = vld [vmem:[%s9358_s25 + $0x528] sm:$0xff]  ;;  %v7952_v42 = vcombine.low %v305_v19, %v309_v21 }
 0x164   : > { %6735 = vmatpush2.bf16.msra.mxu0 %v8750_v37  ;;  %6776 = vmatpush2.bf16.msra.mxu1 %v8878_v41  ;;  %v6533_v7 = vpop.f32.mrf.mxu1  ;;  %v8081_v35 = vcombine.high %v433_v23, %v437_v24  ;;  %v297_v37 = vld [vmem:[%s9358_s25 + $0xc8] sm:$0xff]  ;;  %v8080_v43 = vcombine.low %v433_v23, %v437_v24 }
 0x165   : > { %6786 = vmatprep.subr.bf16.mxu0 %v7977_v44  ;;  %6827 = vmatprep.subr.bf16.mxu1 %v8105_v45  ;;  %v6492_v1 = vpop.f32.mrf.mxu0  ;;  %v301_v38 = vld [vmem:[%s9358_s25 + $0xe8] sm:$0xff] }
 0x166   : > { %v6493_v5 = vadd.f32 %v6492_v1, %v1301_v54  ;;  %v6535_v15 = vpop.f32.mrf.mxu1  ;;  %v425_v39 = vld [vmem:[%s9358_s25 + $0x4c8] sm:$0xff]  ;;  %v7945_v44 = vcombine.high %v297_v37, %v301_v38  ;;  %v7944_v53 = vcombine.low %v297_v37, %v301_v38  ;;  %v8064_v1 = vcombine.low %v417_v49, %v421_v52 }
 0x167   : > { %6737 = vmatmul.mubr.bf16.vlgmr.msra.gmra.mxu0 %v9676_v50  ;;  %6778 = vmatmul.mubr.bf16.vlgmr.msra.gmra.mxu1 %v9680_v55  ;;  %v6494_v9 = vpop.f32.mrf.mxu0  ;;  %v429_v41 = vld [vmem:[%s9358_s25 + $0x4e8] sm:$0xff] }
 0x168   : > { %6787 = vmatpush1.bf16.msra.mxu0 %v7976_v56  ;;  %6828 = vmatpush1.bf16.msra.mxu1 %v8104_v57  ;;  %v9688_v12 = vadd.f32 %v6533_v7, %v6493_v5  ;;  %v6495_v13 = vadd.f32 %v6494_v9, %v1305_v61  ;;  %v6537_v27 = vpop.f32.mrf.mxu1  ;;  %v8073_v45 = vcombine.high %v425_v39, %v429_v41  ;;  %v289_v46 = vld [vmem:[%s9358_s25 + $0x88] sm:$0xff] }
 0x169   : > { %6788 = vmatprep.subr.bf16.mxu0 %v7969_v60  ;;  %6829 = vmatprep.subr.bf16.mxu1 %v8097_v62  ;;  %v6496_v22 = vpop.f32.mrf.mxu0  ;;  %v8072_v54 = vcombine.low %v425_v39, %v429_v41  ;;  %v7937_v56 = vcombine.high %v289_v46, %v293_v47  ;;  %v8065_v57 = vcombine.high %v417_v49, %v421_v52  ;;  %v281_v60 = vld [vmem:[%s9358_s25 + $0x48] sm:$0xff] }
 0x16a   : > { %6818 = vmatprep.mubr.bf16.mxu0 %v9394_v58  ;;  %6859 = vmatprep.mubr.bf16.mxu1 %v9396_v59  ;;  %v9696_v25 = vadd.f32 %v6535_v15, %v6495_v13  ;;  %v6538_v34 = vpop.f32.mrf.mxu1  ;;  %v285_v61 = vld [vmem:[%s9358_s25 + $0x68] sm:$0xff]  ;;  %v7936_v0 = vcombine.low %v289_v46, %v293_v47 }
 0x16b   : > { %v6497_v30 = vpop.f32.mrf.mxu0  ;;  %v409_v62 = vld [vmem:[%s9358_s25 + $0x448] sm:$0xff]  ;;  %v7929_v3 = vcombine.high %v281_v60, %v285_v61 }
 0x16c   : > { %6789 = vmatpush1.bf16.msra.mxu0 %v7968_v8  ;;  %6830 = vmatpush1.bf16.msra.mxu1 %v8096_v10  ;;  %v413_v63 = vld [vmem:[%s9358_s25 + $0x468] sm:$0xff]  ;;  %v7928_v10 = vcombine.low %v281_v60, %v285_v61 }
 0x16d   : > { %6790 = vmatprep.subr.bf16.mxu0 %v7961_v11  ;;  %6831 = vmatprep.subr.bf16.mxu1 %v8089_v17  ;;  %v8057_v4 = vcombine.high %v409_v62, %v413_v63  ;;  %v273_v5 = vld [vmem:[%s9358_s25 + $0x8] sm:$0xff]  ;;  %v8056_v11 = vcombine.low %v409_v62, %v413_v63 }
 0x16e   : > { %v277_v7 = vld [vmem:[%s9358_s25 + $0x28] sm:$0xff] }
 0x16f   : > { %v401_v8 = vld [vmem:[%s9358_s25 + $0x408] sm:$0xff]  ;;  %v7921_v13 = vcombine.high %v273_v5, %v277_v7  ;;  %v7920_v23 = vcombine.low %v273_v5, %v277_v7 }
 0x170   : > { %6791 = vmatpush1.bf16.msra.mxu0 %v7960_v29  ;;  %6832 = vmatpush1.bf16.msra.mxu1 %v8088_v32  ;;  %v405_v9 = vld [vmem:[%s9358_s25 + $0x428] sm:$0xff] }
 0x171   : > { %6792 = vmatprep.subr.bf16.mxu0 %v7953_v33  ;;  %6833 = vmatprep.subr.bf16.mxu1 %v8081_v35  ;;  %v8049_v15 = vcombine.high %v401_v8, %v405_v9  ;;  %v393_v17 = vld [vmem:[%s9358_s25 + $0x3c8] sm:$0xff]  ;;  %v8048_v24 = vcombine.low %v401_v8, %v405_v9 }
 0x172   : > { %v397_v19 = vld [vmem:[%s9358_s25 + $0x3e8] sm:$0xff] }
 0x173   : > { %v521_v21 = vld [vmem:[%s9358_s25 + $0x7c8] sm:$0xff]  ;;  %v8041_v27 = vcombine.high %v393_v17, %v397_v19  ;;  %v8040_v35 = vcombine.low %v393_v17, %v397_v19 }
 0x174   : > { %6793 = vmatpush1.bf16.msra.mxu0 %v7952_v42  ;;  %6834 = vmatpush1.bf16.msra.mxu1 %v8080_v43  ;;  %v525_v22 = vld [vmem:[%s9358_s25 + $0x7e8] sm:$0xff] }
 0x175   : > { %6794 = vmatprep.subr.bf16.mxu0 %v7945_v44  ;;  %6835 = vmatprep.subr.bf16.mxu1 %v8073_v45  ;;  %v8169_v29 = vcombine.high %v521_v21, %v525_v22  ;;  %v385_v30 = vld [vmem:[%s9358_s25 + $0x388] sm:$0xff]  ;;  %v8168_v37 = vcombine.low %v521_v21, %v525_v22 }
 0x176   : > { %v389_v32 = vld [vmem:[%s9358_s25 + $0x3a8] sm:$0xff] }
 0x177   : > { %v513_v33 = vld [vmem:[%s9358_s25 + $0x788] sm:$0xff]  ;;  %v8033_v38 = vcombine.high %v385_v30, %v389_v32  ;;  %v8032_v45 = vcombine.low %v385_v30, %v389_v32 }
 0x178   : > { %6795 = vmatpush1.bf16.msra.mxu0 %v7944_v53  ;;  %6836 = vmatpush1.bf16.msra.mxu1 %v8072_v54  ;;  %v517_v34 = vld [vmem:[%s9358_s25 + $0x7a8] sm:$0xff] }
 0x179   : > { %6796 = vmatprep.subr.bf16.mxu0 %v7937_v56  ;;  %6837 = vmatprep.subr.bf16.mxu1 %v8065_v57  ;;  %v8161_v39 = vcombine.high %v513_v33, %v517_v34  ;;  %v377_v41 = vld [vmem:[%s9358_s25 + $0x348] sm:$0xff]  ;;  %v8160_v46 = vcombine.low %v513_v33, %v517_v34 }
 0x17a   : > { %v381_v42 = vld [vmem:[%s9358_s25 + $0x368] sm:$0xff] }
 0x17b   : > { %v505_v43 = vld [vmem:[%s9358_s25 + $0x748] sm:$0xff]  ;;  %v8025_v47 = vcombine.high %v377_v41, %v381_v42  ;;  %v8024_v57 = vcombine.low %v377_v41, %v381_v42 }
 0x17c   : > { %6797 = vmatpush1.bf16.msra.mxu0 %v7936_v0  ;;  %6838 = vmatpush1.bf16.msra.mxu1 %v8064_v1  ;;  %v509_v44 = vld [vmem:[%s9358_s25 + $0x768] sm:$0xff] }
 0x17d   : > { %6798 = vmatprep.subr.bf16.mxu0 %v7929_v3  ;;  %6839 = vmatprep.subr.bf16.mxu1 %v8057_v4  ;;  %v8153_v49 = vcombine.high %v505_v43, %v509_v44  ;;  %v369_v52 = vld [vmem:[%s9358_s25 + $0x308] sm:$0xff]  ;;  %v8152_v60 = vcombine.low %v505_v43, %v509_v44 }
 0x17e   : > { %v373_v53 = vld [vmem:[%s9358_s25 + $0x328] sm:$0xff] }
 0x17f   : > { %v497_v54 = vld [vmem:[%s9358_s25 + $0x708] sm:$0xff]  ;;  %v8017_v61 = vcombine.high %v369_v52, %v373_v53  ;;  %v8016_v4 = vcombine.low %v369_v52, %v373_v53 }
 0x180   : > { %6799 = vmatpush1.bf16.msra.mxu0 %v7928_v10  ;;  %6840 = vmatpush1.bf16.msra.mxu1 %v8056_v11  ;;  %v501_v56 = vld [vmem:[%s9358_s25 + $0x728] sm:$0xff] }
 0x181   : > { %6800 = vmatprep.subr.bf16.mxu0 %v7921_v13  ;;  %6841 = vmatprep.subr.bf16.mxu1 %v8049_v15  ;;  %v8145_v62 = vcombine.high %v497_v54, %v501_v56  ;;  %v361_v63 = vld [vmem:[%s9358_s25 + $0x2c8] sm:$0xff]  ;;  %v8144_v5 = vcombine.low %v497_v54, %v501_v56 }
 0x182   : > { %v365_v0 = vld [vmem:[%s9358_s25 + $0x2e8] sm:$0xff] }
 0x183   : > { %v489_v1 = vld [vmem:[%s9358_s25 + $0x6c8] sm:$0xff]  ;;  %v8009_v7 = vcombine.high %v361_v63, %v365_v0  ;;  %v8008_v15 = vcombine.low %v361_v63, %v365_v0 }
 0x184   : > { %6801 = vmatpush1.bf16.msra.mxu0 %v7920_v23  ;;  %6842 = vmatpush1.bf16.msra.mxu1 %v8048_v24  ;;  %v493_v3 = vld [vmem:[%s9358_s25 + $0x6e8] sm:$0xff] }
 0x185   : > { %6802 = vmatprep.subr.bf16.mxu0 %v8041_v27  ;;  %6843 = vmatprep.subr.bf16.mxu1 %v8169_v29  ;;  %v8137_v8 = vcombine.high %v489_v1, %v493_v3  ;;  %v353_v9 = vld [vmem:[%s9358_s25 + $0x288] sm:$0xff]  ;;  %v8136_v17 = vcombine.low %v489_v1, %v493_v3 }
 0x186   : > { %v357_v10 = vld [vmem:[%s9358_s25 + $0x2a8] sm:$0xff] }
 0x187   : > { %v481_v11 = vld [vmem:[%s9358_s25 + $0x688] sm:$0xff]  ;;  %v8001_v19 = vcombine.high %v353_v9, %v357_v10  ;;  %v8000_v29 = vcombine.low %v353_v9, %v357_v10 }
 0x188   : > { %6803 = vmatpush2.bf16.msra.mxu0 %v8040_v35  ;;  %6844 = vmatpush2.bf16.msra.mxu1 %v8168_v37  ;;  %v485_v13 = vld [vmem:[%s9358_s25 + $0x6a8] sm:$0xff] }
 0x189   : > { %6804 = vmatprep.subr.bf16.mxu0 %v8033_v38  ;;  %6845 = vmatprep.subr.bf16.mxu1 %v8161_v39  ;;  %v8129_v21 = vcombine.high %v481_v11, %v485_v13  ;;  %v345_v22 = vld [vmem:[%s9358_s25 + $0x248] sm:$0xff]  ;;  %v8128_v30 = vcombine.low %v481_v11, %v485_v13 }
 0x18a   : > { %v349_v23 = vld [vmem:[%s9358_s25 + $0x268] sm:$0xff] }
 0x18b   : > { %v473_v24 = vld [vmem:[%s9358_s25 + $0x648] sm:$0xff]  ;;  %v7993_v32 = vcombine.high %v345_v22, %v349_v23  ;;  %v7992_v39 = vcombine.low %v345_v22, %v349_v23 }
 0x18c   : > { %6805 = vmatpush2.bf16.msra.mxu0 %v8032_v45  ;;  %6846 = vmatpush2.bf16.msra.mxu1 %v8160_v46  ;;  %v477_v27 = vld [vmem:[%s9358_s25 + $0x668] sm:$0xff] }
 0x18d   : > { %6806 = vmatprep.subr.bf16.mxu0 %v8025_v47  ;;  %6847 = vmatprep.subr.bf16.mxu1 %v8153_v49  ;;  %v8121_v33 = vcombine.high %v473_v24, %v477_v27  ;;  %v337_v34 = vld [vmem:[%s9358_s25 + $0x208] sm:$0xff]  ;;  %v8120_v41 = vcombine.low %v473_v24, %v477_v27 }
 0x18e   : > { %v341_v35 = vld [vmem:[%s9358_s25 + $0x228] sm:$0xff] }
 0x18f   : > { %v465_v37 = vld [vmem:[%s9358_s25 + $0x608] sm:$0xff]  ;;  %v7985_v42 = vcombine.high %v337_v34, %v341_v35  ;;  %v7984_v49 = vcombine.low %v337_v34, %v341_v35 }
 0x190   : > { %6807 = vmatpush2.bf16.msra.mxu0 %v8024_v57  ;;  %6848 = vmatpush2.bf16.msra.mxu1 %v8152_v60  ;;  %v469_v38 = vld [vmem:[%s9358_s25 + $0x628] sm:$0xff] }
 0x191   : > { %6808 = vmatprep.subr.bf16.mxu0 %v8017_v61  ;;  %6849 = vmatprep.subr.bf16.mxu1 %v8145_v62  ;;  %v8113_v43 = vcombine.high %v465_v37, %v469_v38  ;;  %v585_v44 = vld [vmem:[%s9358_s25 + $0x9c8] sm:$0xff]  ;;  %v8112_v52 = vcombine.low %v465_v37, %v469_v38 }
 0x192   : > { %v589_v45 = vld [vmem:[%s9358_s25 + $0x9e8] sm:$0xff] }
 0x193   : > { %v713_v46 = vld [vmem:[%s9358_s25 + $0xdc8] sm:$0xff]  ;;  %v8233_v53 = vcombine.high %v585_v44, %v589_v45  ;;  %v8232_v62 = vcombine.low %v585_v44, %v589_v45 }
 0x194   : > { %6809 = vmatpush2.bf16.msra.mxu0 %v8016_v4  ;;  %6850 = vmatpush2.bf16.msra.mxu1 %v8144_v5  ;;  %v717_v47 = vld [vmem:[%s9358_s25 + $0xde8] sm:$0xff] }
 0x195   : > { %6810 = vmatprep.subr.bf16.mxu0 %v8009_v7  ;;  %6851 = vmatprep.subr.bf16.mxu1 %v8137_v8  ;;  %v8361_v54 = vcombine.high %v713_v46, %v717_v47  ;;  %v577_v56 = vld [vmem:[%s9358_s25 + $0x988] sm:$0xff]  ;;  %v8360_v63 = vcombine.low %v713_v46, %v717_v47 }
 0x196   : > { %v581_v57 = vld [vmem:[%s9358_s25 + $0x9a8] sm:$0xff] }
 0x197   : > { %v705_v60 = vld [vmem:[%s9358_s25 + $0xd88] sm:$0xff]  ;;  %v8225_v0 = vcombine.high %v577_v56, %v581_v57  ;;  %v8224_v11 = vcombine.low %v577_v56, %v581_v57 }
 0x198   : > { %6811 = vmatpush2.bf16.msra.mxu0 %v8008_v15  ;;  %6852 = vmatpush2.bf16.msra.mxu1 %v8136_v17  ;;  %v709_v61 = vld [vmem:[%s9358_s25 + $0xda8] sm:$0xff] }
 0x199   : > { %6812 = vmatprep.subr.bf16.mxu0 %v8001_v19  ;;  %6853 = vmatprep.subr.bf16.mxu1 %v8129_v21  ;;  %v8353_v1 = vcombine.high %v705_v60, %v709_v61  ;;  %v569_v3 = vld [vmem:[%s9358_s25 + $0x948] sm:$0xff]  ;;  %v8352_v15 = vcombine.low %v705_v60, %v709_v61 }
 0x19a   : > { %v573_v4 = vld [vmem:[%s9358_s25 + $0x968] sm:$0xff] }
 0x19b   : > { %v697_v7 = vld [vmem:[%s9358_s25 + $0xd48] sm:$0xff]  ;;  %v8217_v17 = vcombine.high %v569_v3, %v573_v4 }
 0x19c   : > { %6813 = vmatpush2.bf16.msra.mxu0 %v8000_v29  ;;  %6854 = vmatpush2.bf16.msra.mxu1 %v8128_v30  ;;  %v701_v8 = vld [vmem:[%s9358_s25 + $0xd68] sm:$0xff] }
 0x19d   : > { %6814 = vmatprep.subr.bf16.mxu0 %v7993_v32  ;;  %6855 = vmatprep.subr.bf16.mxu1 %v8121_v33  ;;  %v561_v23 = vld [vmem:[%s9358_s25 + $0x908] sm:$0xff]  ;;  %v8344_v35 = vcombine.low %v697_v7, %v701_v8 }
 0x19e   : > { %v565_v24 = vld [vmem:[%s9358_s25 + $0x928] sm:$0xff] }
 0x19f   : > { %v689_v29 = vld [vmem:[%s9358_s25 + $0xd08] sm:$0xff]  ;;  %v8209_v37 = vcombine.high %v561_v23, %v565_v24  ;;  %v8208_v45 = vcombine.low %v561_v23, %v565_v24 }
 0x1a0   : > { %6815 = vmatpush2.bf16.msra.mxu0 %v7992_v39  ;;  %6856 = vmatpush2.bf16.msra.mxu1 %v8120_v41  ;;  %v693_v30 = vld [vmem:[%s9358_s25 + $0xd28] sm:$0xff] }
 0x1a1   : > { %6816 = vmatprep.subr.bf16.mxu0 %v7985_v42  ;;  %6857 = vmatprep.subr.bf16.mxu1 %v8113_v43  ;;  %v8337_v39 = vcombine.high %v689_v29, %v693_v30  ;;  %v553_v41 = vld [vmem:[%s9358_s25 + $0x8c8] sm:$0xff]  ;;  %v8336_v46 = vcombine.low %v689_v29, %v693_v30 }
 0x1a2   : > { %v557_v42 = vld [vmem:[%s9358_s25 + $0x8e8] sm:$0xff] }
 0x1a3   : > { %v681_v43 = vld [vmem:[%s9358_s25 + $0xcc8] sm:$0xff]  ;;  %v8201_v47 = vcombine.high %v553_v41, %v557_v42  ;;  %v8200_v57 = vcombine.low %v553_v41, %v557_v42 }
 0x1a4   : > { %6817 = vmatpush2.bf16.msra.mxu0 %v7984_v49  ;;  %6858 = vmatpush2.bf16.msra.mxu1 %v8112_v52  ;;  %v685_v44 = vld [vmem:[%s9358_s25 + $0xce8] sm:$0xff] }
 0x1a5   : > { %6868 = vmatprep.subr.bf16.mxu0 %v8233_v53  ;;  %6909 = vmatprep.subr.bf16.mxu1 %v8361_v54  ;;  %v6615_v10 = vpop.f32.mrf.mxu1  ;;  %v8329_v49 = vcombine.high %v681_v43, %v685_v44  ;;  %v545_v52 = vld [vmem:[%s9358_s25 + $0x888] sm:$0xff]  ;;  %v8328_v60 = vcombine.low %v681_v43, %v685_v44 }
 0x1a6   : > { %v6574_v5 = vpop.f32.mrf.mxu0  ;;  %v549_v53 = vld [vmem:[%s9358_s25 + $0x8a8] sm:$0xff] }
 0x1a7   : > { %6819 = vmatmul.mubr.bf16.vlgmr.msra.gmra.mxu0 %v9440_v16  ;;  %v6575_v9 = vadd.f32 %v6574_v5, %v9688_v12  ;;  %6860 = vmatmul.mubr.bf16.vlgmr.msra.gmra.mxu1 %v9444_v20  ;;  %v6617_v22 = vpop.f32.mrf.mxu1  ;;  %v8345_v12 = vcombine.high %v697_v7, %v701_v8  ;;  %v673_v54 = vld [vmem:[%s9358_s25 + $0xc88] sm:$0xff]  ;;  %v8193_v61 = vcombine.high %v545_v52, %v549_v53 }
 0x1a8   : > { %6869 = vmatpush1.bf16.msra.mxu0 %v8232_v62  ;;  %6910 = vmatpush1.bf16.msra.mxu1 %v8360_v63  ;;  %v6576_v13 = vpop.f32.mrf.mxu0  ;;  %v677_v56 = vld [vmem:[%s9358_s25 + $0xca8] sm:$0xff] }
 0x1a9   : > { %6870 = vmatprep.subr.bf16.mxu0 %v8225_v0  ;;  %v9761_v19 = vadd.f32 %v6615_v10, %v6575_v9  ;;  %v6577_v21 = vadd.f32 %v6576_v13, %v9696_v25  ;;  %6911 = vmatprep.subr.bf16.mxu1 %v8353_v1  ;;  %v6619_v33 = vpop.f32.mrf.mxu1  ;;  %v8216_v25 = vcombine.low %v569_v3, %v573_v4  ;;  %v537_v63 = vld [vmem:[%s9358_s25 + $0x848] sm:$0xff] }
 0x1aa   : > { %6900 = vmatprep.mubr.bf16.mxu0 %v9448_v28  ;;  %v6578_v27 = vpop.f32.mrf.mxu0  ;;  %6941 = vmatprep.mubr.bf16.mxu1 %v9453_v31  ;;  %v8321_v62 = vcombine.high %v673_v54, %v677_v56  ;;  %v541_v0 = vld [vmem:[%s9358_s25 + $0x868] sm:$0xff]  ;;  %v8192_v4 = vcombine.low %v545_v52, %v549_v53  ;;  %v8320_v5 = vcombine.low %v673_v54, %v677_v56 }
 0x1ab   : > { %v9770_v32 = vadd.f32 %v6617_v22, %v6577_v21  ;;  %v6620_v38 = vpop.f32.mrf.mxu1  ;;  %v665_v1 = vld [vmem:[%s9358_s25 + $0xc48] sm:$0xff]  ;;  %v8185_v7 = vcombine.high %v537_v63, %v541_v0 }
 0x1ac   : > { %6871 = vmatpush1.bf16.msra.mxu0 %v8224_v11  ;;  %6912 = vmatpush1.bf16.msra.mxu1 %v8352_v15  ;;  %v6579_v34 = vpop.f32.mrf.mxu0  ;;  %v669_v3 = vld [vmem:[%s9358_s25 + $0xc68] sm:$0xff]  ;;  %v8184_v15 = vcombine.low %v537_v63, %v541_v0 }
 0x1ad   : > { %6872 = vmatprep.subr.bf16.mxu0 %v8217_v17  ;;  %6913 = vmatprep.subr.bf16.mxu1 %v8345_v12  ;;  %v8313_v8 = vcombine.high %v665_v1, %v669_v3  ;;  %v529_v9 = vld [vmem:[%s9358_s25 + $0x808] sm:$0xff]  ;;  %v8312_v17 = vcombine.low %v665_v1, %v669_v3 }
 0x1ae   : > { %v533_v10 = vld [vmem:[%s9358_s25 + $0x828] sm:$0xff] }
 0x1af   : > { %v657_v11 = vld [vmem:[%s9358_s25 + $0xc08] sm:$0xff]  ;;  %v8177_v21 = vcombine.high %v529_v9, %v533_v10  ;;  %v8176_v29 = vcombine.low %v529_v9, %v533_v10 }
 0x1b0   : > { %6873 = vmatpush1.bf16.msra.mxu0 %v8216_v25  ;;  %6914 = vmatpush1.bf16.msra.mxu1 %v8344_v35  ;;  %v661_v13 = vld [vmem:[%s9358_s25 + $0xc28] sm:$0xff] }
 0x1b1   : > { %6874 = vmatprep.subr.bf16.mxu0 %v8209_v37  ;;  %6915 = vmatprep.subr.bf16.mxu1 %v8337_v39  ;;  %v8305_v22 = vcombine.high %v657_v11, %v661_v13  ;;  %v649_v12 = vld [vmem:[%s9358_s25 + $0xbc8] sm:$0xff]  ;;  %v8304_v30 = vcombine.low %v657_v11, %v661_v13 }
 0x1b2   : > { %v653_v23 = vld [vmem:[%s9358_s25 + $0xbe8] sm:$0xff] }
 0x1b3   : > { %v777_v24 = vld [vmem:[%s9358_s25 + $0xfc8] sm:$0xff]  ;;  %v8297_v33 = vcombine.high %v649_v12, %v653_v23  ;;  %v8296_v39 = vcombine.low %v649_v12, %v653_v23 }
 0x1b4   : > { %6875 = vmatpush1.bf16.msra.mxu0 %v8208_v45  ;;  %6916 = vmatpush1.bf16.msra.mxu1 %v8336_v46  ;;  %v781_v27 = vld [vmem:[%s9358_s25 + $0xfe8] sm:$0xff] }
 0x1b5   : > { %6876 = vmatprep.subr.bf16.mxu0 %v8201_v47  ;;  %6917 = vmatprep.subr.bf16.mxu1 %v8329_v49  ;;  %v8425_v25 = vcombine.high %v777_v24, %v781_v27  ;;  %v641_v34 = vld [vmem:[%s9358_s25 + $0xb88] sm:$0xff]  ;;  %v8424_v41 = vcombine.low %v777_v24, %v781_v27 }
 0x1b6   : > { %v645_v35 = vld [vmem:[%s9358_s25 + $0xba8] sm:$0xff] }
 0x1b7   : > { %v769_v37 = vld [vmem:[%s9358_s25 + $0xf88] sm:$0xff]  ;;  %v8289_v42 = vcombine.high %v641_v34, %v645_v35  ;;  %v8288_v49 = vcombine.low %v641_v34, %v645_v35 }
 0x1b8   : > { %6877 = vmatpush1.bf16.msra.mxu0 %v8200_v57  ;;  %6918 = vmatpush1.bf16.msra.mxu1 %v8328_v60  ;;  %v773_v38 = vld [vmem:[%s9358_s25 + $0xfa8] sm:$0xff] }
 0x1b9   : > { %6878 = vmatprep.subr.bf16.mxu0 %v8193_v61  ;;  %6919 = vmatprep.subr.bf16.mxu1 %v8321_v62  ;;  %v8417_v43 = vcombine.high %v769_v37, %v773_v38  ;;  %v633_v44 = vld [vmem:[%s9358_s25 + $0xb48] sm:$0xff]  ;;  %v8416_v52 = vcombine.low %v769_v37, %v773_v38 }
 0x1ba   : > { %v637_v45 = vld [vmem:[%s9358_s25 + $0xb68] sm:$0xff] }
 0x1bb   : > { %v761_v46 = vld [vmem:[%s9358_s25 + $0xf48] sm:$0xff]  ;;  %v8281_v53 = vcombine.high %v633_v44, %v637_v45  ;;  %v8280_v62 = vcombine.low %v633_v44, %v637_v45 }
 0x1bc   : > { %6879 = vmatpush1.bf16.msra.mxu0 %v8192_v4  ;;  %6920 = vmatpush1.bf16.msra.mxu1 %v8320_v5  ;;  %v765_v47 = vld [vmem:[%s9358_s25 + $0xf68] sm:$0xff] }
 0x1bd   : > { %6880 = vmatprep.subr.bf16.mxu0 %v8185_v7  ;;  %6921 = vmatprep.subr.bf16.mxu1 %v8313_v8  ;;  %v8409_v54 = vcombine.high %v761_v46, %v765_v47  ;;  %v625_v56 = vld [vmem:[%s9358_s25 + $0xb08] sm:$0xff]  ;;  %v8408_v63 = vcombine.low %v761_v46, %v765_v47 }
 0x1be   : > { %v629_v57 = vld [vmem:[%s9358_s25 + $0xb28] sm:$0xff] }
 0x1bf   : > { %v753_v60 = vld [vmem:[%s9358_s25 + $0xf08] sm:$0xff]  ;;  %v8273_v0 = vcombine.high %v625_v56, %v629_v57  ;;  %v8272_v8 = vcombine.low %v625_v56, %v629_v57 }
 0x1c0   : > { %6881 = vmatpush1.bf16.msra.mxu0 %v8184_v15  ;;  %6922 = vmatpush1.bf16.msra.mxu1 %v8312_v17  ;;  %v757_v61 = vld [vmem:[%s9358_s25 + $0xf28] sm:$0xff] }
 0x1c1   : > { %6882 = vmatprep.subr.bf16.mxu0 %v8177_v21  ;;  %6923 = vmatprep.subr.bf16.mxu1 %v8305_v22  ;;  %v8401_v1 = vcombine.high %v753_v60, %v757_v61  ;;  %v617_v3 = vld [vmem:[%s9358_s25 + $0xac8] sm:$0xff]  ;;  %v8400_v9 = vcombine.low %v753_v60, %v757_v61 }
 0x1c2   : > { %v621_v4 = vld [vmem:[%s9358_s25 + $0xae8] sm:$0xff] }
 0x1c3   : > { %v745_v5 = vld [vmem:[%s9358_s25 + $0xec8] sm:$0xff]  ;;  %v8265_v10 = vcombine.high %v617_v3, %v621_v4  ;;  %v8264_v22 = vcombine.low %v617_v3, %v621_v4 }
 0x1c4   : > { %6883 = vmatpush1.bf16.msra.mxu0 %v8176_v29  ;;  %6924 = vmatpush1.bf16.msra.mxu1 %v8304_v30  ;;  %v749_v7 = vld [vmem:[%s9358_s25 + $0xee8] sm:$0xff] }
 0x1c5   : > { %6884 = vmatprep.subr.bf16.mxu0 %v8297_v33  ;;  %6925 = vmatprep.subr.bf16.mxu1 %v8425_v25  ;;  %v8393_v11 = vcombine.high %v745_v5, %v749_v7  ;;  %v609_v13 = vld [vmem:[%s9358_s25 + $0xa88] sm:$0xff]  ;;  %v8392_v12 = vcombine.low %v745_v5, %v749_v7 }
 0x1c6   : > { %v613_v15 = vld [vmem:[%s9358_s25 + $0xaa8] sm:$0xff] }
 0x1c7   : > { %v737_v17 = vld [vmem:[%s9358_s25 + $0xe88] sm:$0xff]  ;;  %v8257_v23 = vcombine.high %v609_v13, %v613_v15  ;;  %v8256_v25 = vcombine.low %v609_v13, %v613_v15 }
 0x1c8   : > { %6885 = vmatpush2.bf16.msra.mxu0 %v8296_v39  ;;  %6926 = vmatpush2.bf16.msra.mxu1 %v8424_v41  ;;  %v741_v21 = vld [vmem:[%s9358_s25 + $0xea8] sm:$0xff] }
 0x1c9   : > { %6886 = vmatprep.subr.bf16.mxu0 %v8289_v42  ;;  %6927 = vmatprep.subr.bf16.mxu1 %v8417_v43  ;;  %v8385_v24 = vcombine.high %v737_v17, %v741_v21  ;;  %v601_v27 = vld [vmem:[%s9358_s25 + $0xa48] sm:$0xff]  ;;  %v8384_v34 = vcombine.low %v737_v17, %v741_v21 }
 0x1ca   : > { %v605_v29 = vld [vmem:[%s9358_s25 + $0xa68] sm:$0xff] }
 0x1cb   : > { %v729_v30 = vld [vmem:[%s9358_s25 + $0xe48] sm:$0xff]  ;;  %v8249_v35 = vcombine.high %v601_v27, %v605_v29  ;;  %v8248_v43 = vcombine.low %v601_v27, %v605_v29 }
 0x1cc   : > { %6887 = vmatpush2.bf16.msra.mxu0 %v8288_v49  ;;  %6928 = vmatpush2.bf16.msra.mxu1 %v8416_v52  ;;  %v733_v33 = vld [vmem:[%s9358_s25 + $0xe68] sm:$0xff] }
 0x1cd   : > { %6888 = vmatprep.subr.bf16.mxu0 %v8281_v53  ;;  %6929 = vmatprep.subr.bf16.mxu1 %v8409_v54  ;;  %v8377_v37 = vcombine.high %v729_v30, %v733_v33  ;;  %v593_v38 = vld [vmem:[%s9358_s25 + $0xa08] sm:$0xff]  ;;  %v8376_v44 = vcombine.low %v729_v30, %v733_v33 }
 0x1ce   : > { %v597_v39 = vld [vmem:[%s9358_s25 + $0xa28] sm:$0xff] }
 0x1cf   : > { %v721_v41 = vld [vmem:[%s9358_s25 + $0xe08] sm:$0xff]  ;;  %v8241_v45 = vcombine.high %v593_v38, %v597_v39  ;;  %v8240_v54 = vcombine.low %v593_v38, %v597_v39 }
 0x1d0   : > { %6889 = vmatpush2.bf16.msra.mxu0 %v8280_v62  ;;  %6930 = vmatpush2.bf16.msra.mxu1 %v8408_v63  ;;  %v725_v42 = vld [vmem:[%s9358_s25 + $0xe28] sm:$0xff] }
 0x1d1   : > { %6890 = vmatprep.subr.bf16.mxu0 %v8273_v0  ;;  %6931 = vmatprep.subr.bf16.mxu1 %v8401_v1  ;;  %v8369_v46 = vcombine.high %v721_v41, %v725_v42  ;;  %v841_v47 = vld [vmem:[%s9358_s25 + $0x11c8] sm:$0xff]  ;;  %v8368_v56 = vcombine.low %v721_v41, %v725_v42 }
 0x1d2   : > { %v845_v49 = vld [vmem:[%s9358_s25 + $0x11e8] sm:$0xff] }
 0x1d3   : > { %v969_v52 = vld [vmem:[%s9358_s25 + $0x15c8] sm:$0xff]  ;;  %v8489_v57 = vcombine.high %v841_v47, %v845_v49  ;;  %v8488_v1 = vcombine.low %v841_v47, %v845_v49 }
 0x1d4   : > { %6891 = vmatpush2.bf16.msra.mxu0 %v8272_v8  ;;  %6932 = vmatpush2.bf16.msra.mxu1 %v8400_v9  ;;  %v973_v53 = vld [vmem:[%s9358_s25 + $0x15e8] sm:$0xff] }
 0x1d5   : > { %6892 = vmatprep.subr.bf16.mxu0 %v8265_v10  ;;  %6933 = vmatprep.subr.bf16.mxu1 %v8393_v11  ;;  %v8617_v60 = vcombine.high %v969_v52, %v973_v53  ;;  %v833_v61 = vld [vmem:[%s9358_s25 + $0x1188] sm:$0xff]  ;;  %v8616_v3 = vcombine.low %v969_v52, %v973_v53 }
 0x1d6   : > { %v837_v62 = vld [vmem:[%s9358_s25 + $0x11a8] sm:$0xff] }
 0x1d7   : > { %v961_v63 = vld [vmem:[%s9358_s25 + $0x1588] sm:$0xff]  ;;  %v8481_v4 = vcombine.high %v833_v61, %v837_v62  ;;  %v8480_v15 = vcombine.low %v833_v61, %v837_v62 }
 0x1d8   : > { %6893 = vmatpush2.bf16.msra.mxu0 %v8264_v22  ;;  %6934 = vmatpush2.bf16.msra.mxu1 %v8392_v12  ;;  %v965_v0 = vld [vmem:[%s9358_s25 + $0x15a8] sm:$0xff] }
 0x1d9   : > { %6894 = vmatprep.subr.bf16.mxu0 %v8257_v23  ;;  %6935 = vmatprep.subr.bf16.mxu1 %v8385_v24  ;;  %v8609_v5 = vcombine.high %v961_v63, %v965_v0  ;;  %v825_v7 = vld [vmem:[%s9358_s25 + $0x1148] sm:$0xff]  ;;  %v8608_v21 = vcombine.low %v961_v63, %v965_v0 }
 0x1da   : > { %v829_v8 = vld [vmem:[%s9358_s25 + $0x1168] sm:$0xff] }
 0x1db   : > { %v953_v10 = vld [vmem:[%s9358_s25 + $0x1548] sm:$0xff]  ;;  %v8473_v22 = vcombine.high %v825_v7, %v829_v8 }
 0x1dc   : > { %6895 = vmatpush2.bf16.msra.mxu0 %v8256_v25  ;;  %6936 = vmatpush2.bf16.msra.mxu1 %v8384_v34  ;;  %v957_v11 = vld [vmem:[%s9358_s25 + $0x1568] sm:$0xff]  ;;  %v8472_v34 = vcombine.low %v825_v7, %v829_v8 }
 0x1dd   : > { %6896 = vmatprep.subr.bf16.mxu0 %v8249_v35  ;;  %6937 = vmatprep.subr.bf16.mxu1 %v8377_v37  ;;  %v8601_v23 = vcombine.high %v953_v10, %v957_v11  ;;  %v817_v24 = vld [vmem:[%s9358_s25 + $0x1108] sm:$0xff]  ;;  %v8600_v37 = vcombine.low %v953_v10, %v957_v11 }
 0x1de   : > { %v821_v27 = vld [vmem:[%s9358_s25 + $0x1128] sm:$0xff] }
 0x1df   : > { %v945_v30 = vld [vmem:[%s9358_s25 + $0x1508] sm:$0xff]  ;;  %v8465_v38 = vcombine.high %v817_v24, %v821_v27 }
 0x1e0   : > { %6897 = vmatpush2.bf16.msra.mxu0 %v8248_v43  ;;  %6938 = vmatpush2.bf16.msra.mxu1 %v8376_v44  ;;  %v949_v33 = vld [vmem:[%s9358_s25 + $0x1528] sm:$0xff] }
 0x1e1   : > { %6898 = vmatprep.subr.bf16.mxu0 %v8241_v45  ;;  %6939 = vmatprep.subr.bf16.mxu1 %v8369_v46  ;;  %v8593_v41 = vcombine.high %v945_v30, %v949_v33  ;;  %v809_v42 = vld [vmem:[%s9358_s25 + $0x10c8] sm:$0xff]  ;;  %v8464_v46 = vcombine.low %v817_v24, %v821_v27  ;;  %v8592_v47 = vcombine.low %v945_v30, %v949_v33 }
 0x1e2   : > { %v813_v43 = vld [vmem:[%s9358_s25 + $0x10e8] sm:$0xff] }
 0x1e3   : > { %v937_v44 = vld [vmem:[%s9358_s25 + $0x14c8] sm:$0xff]  ;;  %v8457_v49 = vcombine.high %v809_v42, %v813_v43 }
 0x1e4   : > { %6899 = vmatpush2.bf16.msra.mxu0 %v8240_v54  ;;  %6940 = vmatpush2.bf16.msra.mxu1 %v8368_v56  ;;  %v941_v45 = vld [vmem:[%s9358_s25 + $0x14e8] sm:$0xff] }
 0x1e5   : > { %6950 = vmatprep.subr.bf16.mxu0 %v8489_v57  ;;  %6991 = vmatprep.subr.bf16.mxu1 %v8617_v60  ;;  %v8585_v52 = vcombine.high %v937_v44, %v941_v45  ;;  %v801_v53 = vld [vmem:[%s9358_s25 + $0x1088] sm:$0xff]  ;;  %v8456_v60 = vcombine.low %v809_v42, %v813_v43  ;;  %v8584_v61 = vcombine.low %v937_v44, %v941_v45 }
 0x1e6   : > { %v9835_v13 = vpop.f32.mrf.mxu1  ;;  %v805_v54 = vld [vmem:[%s9358_s25 + $0x10a8] sm:$0xff] }
 0x1e7   : > { %v9830_v9 = vpop.f32.mrf.mxu0  ;;  %6901 = vmatmul.mubr.bf16.vlgmr.msra.gmra.mxu0 %v9516_v36  ;;  %6942 = vmatmul.mubr.bf16.vlgmr.msra.gmra.mxu1 %v9520_v40  ;;  %v929_v56 = vld [vmem:[%s9358_s25 + $0x1488] sm:$0xff]  ;;  %v8449_v62 = vcombine.high %v801_v53, %v805_v54 }
 0x1e8   : > { %6951 = vmatpush1.bf16.msra.mxu0 %v8488_v1  ;;  %6992 = vmatpush1.bf16.msra.mxu1 %v8616_v3  ;;  %v9840_v12 = vpop.f32.mrf.mxu1  ;;  %v933_v57 = vld [vmem:[%s9358_s25 + $0x14a8] sm:$0xff] }
 0x1e9   : > { %v9838_v17 = vpop.f32.mrf.mxu0  ;;  %6952 = vmatprep.subr.bf16.mxu0 %v8481_v4  ;;  %6993 = vmatprep.subr.bf16.mxu1 %v8609_v5  ;;  %v8577_v63 = vcombine.high %v929_v56, %v933_v57  ;;  %v793_v0 = vld [vmem:[%s9358_s25 + $0x1048] sm:$0xff]  ;;  %v8448_v5 = vcombine.low %v801_v53, %v805_v54  ;;  %v8576_v7 = vcombine.low %v929_v56, %v933_v57 }
 0x1ea   : > { %6982 = vmatprep.mubr.bf16.mxu0 %v9524_v48  ;;  %7023 = vmatprep.mubr.bf16.mxu1 %v9529_v51  ;;  %v6701_v25 = vpop.f32.mrf.mxu1  ;;  %v797_v1 = vld [vmem:[%s9358_s25 + $0x1068] sm:$0xff] }
 0x1eb   : > { %v6660_v29 = vpop.f32.mrf.mxu0  ;;  %v921_v3 = vld [vmem:[%s9358_s25 + $0x1448] sm:$0xff]  ;;  %v8441_v8 = vcombine.high %v793_v0, %v797_v1 }
 0x1ec   : > { %6953 = vmatpush1.bf16.msra.mxu0 %v8480_v15  ;;  %6994 = vmatpush1.bf16.msra.mxu1 %v8608_v21  ;;  %v6702_v39 = vpop.f32.mrf.mxu1  ;;  %v925_v4 = vld [vmem:[%s9358_s25 + $0x1468] sm:$0xff] }
 0x1ed   : > { %v6661_v35 = vpop.f32.mrf.mxu0  ;;  %6954 = vmatprep.subr.bf16.mxu0 %v8473_v22  ;;  %6995 = vmatprep.subr.bf16.mxu1 %v8601_v23  ;;  %v8569_v10 = vcombine.high %v921_v3, %v925_v4  ;;  %v785_v11 = vld [vmem:[%s9358_s25 + $0x1008] sm:$0xff]  ;;  %v8440_v23 = vcombine.low %v793_v0, %v797_v1  ;;  %v8568_v24 = vcombine.low %v921_v3, %v925_v4 }
 0x1ee   : > { %v789_v15 = vld [vmem:[%s9358_s25 + $0x1028] sm:$0xff] }
 0x1ef   : > { %v913_v21 = vld [vmem:[%s9358_s25 + $0x1408] sm:$0xff]  ;;  %v8433_v27 = vcombine.high %v785_v11, %v789_v15  ;;  %v8432_v35 = vcombine.low %v785_v11, %v789_v15 }
 0x1f0   : > { %6955 = vmatpush1.bf16.msra.mxu0 %v8472_v34  ;;  %6996 = vmatpush1.bf16.msra.mxu1 %v8600_v37  ;;  %v917_v22 = vld [vmem:[%s9358_s25 + $0x1428] sm:$0xff] }
 0x1f1   : > { %6956 = vmatprep.subr.bf16.mxu0 %v8465_v38  ;;  %6997 = vmatprep.subr.bf16.mxu1 %v8593_v41  ;;  %v8561_v29 = vcombine.high %v913_v21, %v917_v22  ;;  %v905_v30 = vld [vmem:[%s9358_s25 + $0x13c8] sm:$0xff]  ;;  %v8560_v37 = vcombine.low %v913_v21, %v917_v22 }
 0x1f2   : > { %v909_v33 = vld [vmem:[%s9358_s25 + $0x13e8] sm:$0xff] }
 0x1f3   : > { %v1033_v25 = vld [vmem:[%s9358_s25 + $0x17c8] sm:$0xff]  ;;  %v8553_v38 = vcombine.high %v905_v30, %v909_v33  ;;  %v8552_v45 = vcombine.low %v905_v30, %v909_v33 }
 0x1f4   : > { %6957 = vmatpush1.bf16.msra.mxu0 %v8464_v46  ;;  %6998 = vmatpush1.bf16.msra.mxu1 %v8592_v47  ;;  %v1037_v34 = vld [vmem:[%s9358_s25 + $0x17e8] sm:$0xff] }
 0x1f5   : > { %6958 = vmatprep.subr.bf16.mxu0 %v8457_v49  ;;  %6999 = vmatprep.subr.bf16.mxu1 %v8585_v52  ;;  %v8681_v39 = vcombine.high %v1033_v25, %v1037_v34  ;;  %v897_v41 = vld [vmem:[%s9358_s25 + $0x1388] sm:$0xff]  ;;  %v8680_v46 = vcombine.low %v1033_v25, %v1037_v34 }
 0x1f6   : > { %v901_v42 = vld [vmem:[%s9358_s25 + $0x13a8] sm:$0xff] }
 0x1f7   : > { %v1025_v43 = vld [vmem:[%s9358_s25 + $0x1788] sm:$0xff]  ;;  %v8545_v47 = vcombine.high %v897_v41, %v901_v42  ;;  %v8544_v57 = vcombine.low %v897_v41, %v901_v42 }
 0x1f8   : > { %6959 = vmatpush1.bf16.msra.mxu0 %v8456_v60  ;;  %7000 = vmatpush1.bf16.msra.mxu1 %v8584_v61  ;;  %v1029_v44 = vld [vmem:[%s9358_s25 + $0x17a8] sm:$0xff] }
 0x1f9   : > { %6960 = vmatprep.subr.bf16.mxu0 %v8449_v62  ;;  %7001 = vmatprep.subr.bf16.mxu1 %v8577_v63  ;;  %v8673_v49 = vcombine.high %v1025_v43, %v1029_v44  ;;  %v889_v52 = vld [vmem:[%s9358_s25 + $0x1348] sm:$0xff]  ;;  %v8672_v60 = vcombine.low %v1025_v43, %v1029_v44 }
 0x1fa   : > { %v893_v53 = vld [vmem:[%s9358_s25 + $0x1368] sm:$0xff] }
 0x1fb   : > { %v1017_v54 = vld [vmem:[%s9358_s25 + $0x1748] sm:$0xff]  ;;  %v8537_v61 = vcombine.high %v889_v52, %v893_v53  ;;  %v8536_v4 = vcombine.low %v889_v52, %v893_v53 }
 0x1fc   : > { %6961 = vmatpush1.bf16.msra.mxu0 %v8448_v5  ;;  %7002 = vmatpush1.bf16.msra.mxu1 %v8576_v7  ;;  %v1021_v56 = vld [vmem:[%s9358_s25 + $0x1768] sm:$0xff] }
 0x1fd   : > { %6962 = vmatprep.subr.bf16.mxu0 %v8441_v8  ;;  %7003 = vmatprep.subr.bf16.mxu1 %v8569_v10  ;;  %v8665_v62 = vcombine.high %v1017_v54, %v1021_v56  ;;  %v881_v63 = vld [vmem:[%s9358_s25 + $0x1308] sm:$0xff]  ;;  %v8664_v5 = vcombine.low %v1017_v54, %v1021_v56 }
 0x1fe   : > { %v885_v0 = vld [vmem:[%s9358_s25 + $0x1328] sm:$0xff] }
 0x1ff   : > { %v1009_v1 = vld [vmem:[%s9358_s25 + $0x1708] sm:$0xff]  ;;  %v8529_v7 = vcombine.high %v881_v63, %v885_v0  ;;  %v8528_v22 = vcombine.low %v881_v63, %v885_v0 }
 0x200   : > { %6963 = vmatpush1.bf16.msra.mxu0 %v8440_v23  ;;  %7004 = vmatpush1.bf16.msra.mxu1 %v8568_v24  ;;  %v1013_v3 = vld [vmem:[%s9358_s25 + $0x1728] sm:$0xff] }
 0x201   : > { %6964 = vmatprep.subr.bf16.mxu0 %v8433_v27  ;;  %7005 = vmatprep.subr.bf16.mxu1 %v8561_v29  ;;  %v8657_v8 = vcombine.high %v1009_v1, %v1013_v3  ;;  %v873_v10 = vld [vmem:[%s9358_s25 + $0x12c8] sm:$0xff]  ;;  %v8656_v23 = vcombine.low %v1009_v1, %v1013_v3 }
 0x202   : > { %v877_v11 = vld [vmem:[%s9358_s25 + $0x12e8] sm:$0xff] }
 0x203   : > { %v1001_v15 = vld [vmem:[%s9358_s25 + $0x16c8] sm:$0xff]  ;;  %v8521_v24 = vcombine.high %v873_v10, %v877_v11  ;;  %v8520_v34 = vcombine.low %v873_v10, %v877_v11 }
 0x204   : > { %6965 = vmatpush1.bf16.msra.mxu0 %v8432_v35  ;;  %7006 = vmatpush1.bf16.msra.mxu1 %v8560_v37  ;;  %v1005_v21 = vld [vmem:[%s9358_s25 + $0x16e8] sm:$0xff] }
 0x205   : > { %6966 = vmatprep.subr.bf16.mxu0 %v8553_v38  ;;  %7007 = vmatprep.subr.bf16.mxu1 %v8681_v39  ;;  %v8649_v27 = vcombine.high %v1001_v15, %v1005_v21  ;;  %v865_v29 = vld [vmem:[%s9358_s25 + $0x1288] sm:$0xff]  ;;  %v8648_v35 = vcombine.low %v1001_v15, %v1005_v21 }
 0x206   : > { %v869_v30 = vld [vmem:[%s9358_s25 + $0x12a8] sm:$0xff] }
 0x207   : > { %v993_v33 = vld [vmem:[%s9358_s25 + $0x1688] sm:$0xff]  ;;  %v8513_v37 = vcombine.high %v865_v29, %v869_v30  ;;  %v8512_v44 = vcombine.low %v865_v29, %v869_v30 }
 0x208   : > { %6967 = vmatpush2.bf16.msra.mxu0 %v8552_v45  ;;  %7008 = vmatpush2.bf16.msra.mxu1 %v8680_v46  ;;  %v997_v25 = vld [vmem:[%s9358_s25 + $0x16a8] sm:$0xff] }
 0x209   : > { %6968 = vmatprep.subr.bf16.mxu0 %v8545_v47  ;;  %7009 = vmatprep.subr.bf16.mxu1 %v8673_v49  ;;  %v8641_v38 = vcombine.high %v993_v33, %v997_v25  ;;  %v857_v39 = vld [vmem:[%s9358_s25 + $0x1248] sm:$0xff]  ;;  %v8640_v45 = vcombine.low %v993_v33, %v997_v25 }
 0x20a   : > { %v861_v41 = vld [vmem:[%s9358_s25 + $0x1268] sm:$0xff] }
 0x20b   : > { %v985_v42 = vld [vmem:[%s9358_s25 + $0x1648] sm:$0xff]  ;;  %v8505_v46 = vcombine.high %v857_v39, %v861_v41  ;;  %v8504_v56 = vcombine.low %v857_v39, %v861_v41 }
 0x20c   : > { %6969 = vmatpush2.bf16.msra.mxu0 %v8544_v57  ;;  %7010 = vmatpush2.bf16.msra.mxu1 %v8672_v60  ;;  %v989_v43 = vld [vmem:[%s9358_s25 + $0x1668] sm:$0xff] }
 0x20d   : > { %6970 = vmatprep.subr.bf16.mxu0 %v8537_v61  ;;  %7011 = vmatprep.subr.bf16.mxu1 %v8665_v62  ;;  %v8633_v47 = vcombine.high %v985_v42, %v989_v43  ;;  %v849_v49 = vld [vmem:[%s9358_s25 + $0x1208] sm:$0xff]  ;;  %v8632_v57 = vcombine.low %v985_v42, %v989_v43 }
 0x20e   : > { %v853_v52 = vld [vmem:[%s9358_s25 + $0x1228] sm:$0xff] }
 0x20f   : > { %v977_v53 = vld [vmem:[%s9358_s25 + $0x1608] sm:$0xff]  ;;  %v8497_v60 = vcombine.high %v849_v49, %v853_v52  ;;  %v8496_v3 = vcombine.low %v849_v49, %v853_v52 }
 0x210   : > { %6971 = vmatpush2.bf16.msra.mxu0 %v8536_v4  ;;  %7012 = vmatpush2.bf16.msra.mxu1 %v8664_v5  ;;  %v981_v54 = vld [vmem:[%s9358_s25 + $0x1628] sm:$0xff] }
 0x211   : > { %6972 = vmatprep.subr.bf16.mxu0 %v8529_v7  ;;  %7013 = vmatprep.subr.bf16.mxu1 %v8657_v8  ;;  %v8625_v61 = vcombine.high %v977_v53, %v981_v54  ;;  %v1097_v62 = vld [vmem:[%s9358_s25 + $0x19c8] sm:$0xff]  ;;  %v8624_v4 = vcombine.low %v977_v53, %v981_v54  ;;  %v6657_v7 = vadd.f32 %v9830_v9, %v9761_v19 }
 0x212   : > { %v1101_v63 = vld [vmem:[%s9358_s25 + $0x19e8] sm:$0xff] }
 0x213   : > { %v1225_v0 = vld [vmem:[%s9358_s25 + $0x1dc8] sm:$0xff]  ;;  %v8745_v5 = vcombine.high %v1097_v62, %v1101_v63  ;;  %v6698_v9 = vadd.f32 %v9835_v13, %v6657_v7 }
 0x214   : > { %6973 = vmatpush2.bf16.msra.mxu0 %v8528_v22  ;;  %7014 = vmatpush2.bf16.msra.mxu1 %v8656_v23  ;;  %v1229_v1 = vld [vmem:[%s9358_s25 + $0x1de8] sm:$0xff]  ;;  %v6659_v22 = vadd.f32 %v9838_v17, %v9770_v32  ;;  %v8744_v23 = vcombine.low %v1097_v62, %v1101_v63 }
 0x215   : > { %6974 = vmatprep.subr.bf16.mxu0 %v8521_v24  ;;  %7015 = vmatprep.subr.bf16.mxu1 %v8649_v27  ;;  %v8873_v8 = vcombine.high %v1225_v0, %v1229_v1  ;;  %v1089_v10 = vld [vmem:[%s9358_s25 + $0x1988] sm:$0xff]  ;;  %v8872_v24 = vcombine.low %v1225_v0, %v1229_v1 }
 0x216   : > { %v1093_v11 = vld [vmem:[%s9358_s25 + $0x19a8] sm:$0xff]  ;;  %v6700_v32 = vadd.f32 %v9840_v12, %v6659_v22 }
 0x217   : > { %v1217_v15 = vld [vmem:[%s9358_s25 + $0x1d88] sm:$0xff]  ;;  %v8737_v19 = vcombine.high %v1089_v10, %v1093_v11  ;;  %v8736_v13 = vcombine.low %v1089_v10, %v1093_v11 }
 0x218   : > { %6975 = vmatpush2.bf16.msra.mxu0 %v8520_v34  ;;  %7016 = vmatpush2.bf16.msra.mxu1 %v8648_v35  ;;  %v1221_v21 = vld [vmem:[%s9358_s25 + $0x1da8] sm:$0xff] }
 0x219   : > { %6976 = vmatprep.subr.bf16.mxu0 %v8513_v37  ;;  %7017 = vmatprep.subr.bf16.mxu1 %v8641_v38  ;;  %v8865_v27 = vcombine.high %v1217_v15, %v1221_v21  ;;  %v1081_v29 = vld [vmem:[%s9358_s25 + $0x1948] sm:$0xff]  ;;  %v8864_v38 = vcombine.low %v1217_v15, %v1221_v21 }
 0x21a   : > { %v1085_v30 = vld [vmem:[%s9358_s25 + $0x1968] sm:$0xff] }
 0x21b   : > { %v1209_v25 = vld [vmem:[%s9358_s25 + $0x1d48] sm:$0xff]  ;;  %v8729_v39 = vcombine.high %v1081_v29, %v1085_v30 }
 0x21c   : > { %6977 = vmatpush2.bf16.msra.mxu0 %v8512_v44  ;;  %7018 = vmatpush2.bf16.msra.mxu1 %v8640_v45  ;;  %v1213_v34 = vld [vmem:[%s9358_s25 + $0x1d68] sm:$0xff] }
 0x21d   : > { %6978 = vmatprep.subr.bf16.mxu0 %v8505_v46  ;;  %7019 = vmatprep.subr.bf16.mxu1 %v8633_v47  ;;  %v8857_v12 = vcombine.high %v1209_v25, %v1213_v34  ;;  %v1073_v44 = vld [vmem:[%s9358_s25 + $0x1908] sm:$0xff] }
 0x21e   : > { %v1077_v45 = vld [vmem:[%s9358_s25 + $0x1928] sm:$0xff] }
 0x21f   : > { %v1201_v47 = vld [vmem:[%s9358_s25 + $0x1d08] sm:$0xff]  ;;  %v8720_v7 = vcombine.low %v1073_v44, %v1077_v45 }
 0x220   : > { %6979 = vmatpush2.bf16.msra.mxu0 %v8504_v56  ;;  %7020 = vmatpush2.bf16.msra.mxu1 %v8632_v57  ;;  %v1205_v49 = vld [vmem:[%s9358_s25 + $0x1d28] sm:$0xff]  ;;  %v8728_v56 = vcombine.low %v1081_v29, %v1085_v30 }
 0x221   : > { %6980 = vmatprep.subr.bf16.mxu0 %v8497_v60  ;;  %7021 = vmatprep.subr.bf16.mxu1 %v8625_v61  ;;  %v8856_v60 = vcombine.low %v1209_v25, %v1213_v34  ;;  %v8721_v61 = vcombine.high %v1073_v44, %v1077_v45  ;;  %v8849_v0 = vcombine.high %v1201_v47, %v1205_v49  ;;  %v1065_v1 = vld [vmem:[%s9358_s25 + $0x18c8] sm:$0xff] }
 0x222   : > { %v1057_v15 = vld [vmem:[%s9358_s25 + $0x1888] sm:$0xff] }
 0x223   : > { %v1061_v21 = vld [vmem:[%s9358_s25 + $0x18a8] sm:$0xff] }
 0x224   : > { %6981 = vmatpush2.bf16.msra.mxu0 %v8496_v3  ;;  %7022 = vmatpush2.bf16.msra.mxu1 %v8624_v4  ;;  %v1069_v3 = vld [vmem:[%s9358_s25 + $0x18e8] sm:$0xff]  ;;  %v8704_v34 = vcombine.low %v1057_v15, %v1061_v21 }
 0x225   : > { %7032 = vmatprep.subr.bf16.mxu0 %v8745_v5  ;;  %7073 = vmatprep.subr.bf16.mxu1 %v8873_v8  ;;  %v1193_v4 = vld [vmem:[%s9358_s25 + $0x1cc8] sm:$0xff]  ;;  %v8848_v8 = vcombine.low %v1201_v47, %v1205_v49  ;;  %v8713_v10 = vcombine.high %v1065_v1, %v1069_v3 }
 0x226   : > { %v1197_v5 = vld [vmem:[%s9358_s25 + $0x1ce8] sm:$0xff] }
 0x227   : > { %v6738_v33 = vpop.f32.mrf.mxu0  ;;  %6983 = vmatmul.mubr.bf16.vlgmr.msra.gmra.mxu0 %v9592_v2  ;;  %v6779_v35 = vpop.f32.mrf.mxu1  ;;  %7024 = vmatmul.mubr.bf16.vlgmr.msra.gmra.mxu1 %v9596_v6  ;;  %v8841_v11 = vcombine.high %v1193_v4, %v1197_v5  ;;  %v1185_v22 = vld [vmem:[%s9358_s25 + $0x1c88] sm:$0xff] }
 0x228   : > { %v6739_v17 = vadd.f32 %v6738_v33, %v6698_v9  ;;  %7033 = vmatpush1.bf16.msra.mxu0 %v8744_v23  ;;  %7074 = vmatpush1.bf16.msra.mxu1 %v8872_v24  ;;  %v1189_v23 = vld [vmem:[%s9358_s25 + $0x1ca8] sm:$0xff]  ;;  %v8712_v24 = vcombine.low %v1065_v1, %v1069_v3  ;;  %v8705_v9 = vcombine.high %v1057_v15, %v1061_v21 }
 0x229   : > { %v6740_v37 = vpop.f32.mrf.mxu0  ;;  %7034 = vmatprep.subr.bf16.mxu0 %v8737_v19  ;;  %v6781_v43 = vpop.f32.mrf.mxu1  ;;  %7075 = vmatprep.subr.bf16.mxu1 %v8865_v27  ;;  %v8840_v19 = vcombine.low %v1193_v4, %v1197_v5  ;;  %v8833_v27 = vcombine.high %v1185_v22, %v1189_v23  ;;  %v1049_v29 = vld [vmem:[%s9358_s25 + $0x1848] sm:$0xff] }
 0x22a   : > { %v6780_v41 = vadd.f32 %v6779_v35, %v6739_v17  ;;  %v6741_v42 = vadd.f32 %v6740_v37, %v6700_v32  ;;  %7064 = vmatprep.mubr.bf16.mxu0 %v9600_v14  ;;  %7105 = vmatprep.mubr.bf16.mxu1 %v9605_v18  ;;  %v1053_v30 = vld [vmem:[%s9358_s25 + $0x1868] sm:$0xff]  ;;  %v8832_v32 = vcombine.low %v1185_v22, %v1189_v23 }
 0x22b   : > { %v6742_v46 = vpop.f32.mrf.mxu0  ;;  %v6783_v54 = vpop.f32.mrf.mxu1  ;;  %v1177_v33 = vld [vmem:[%s9358_s25 + $0x1c48] sm:$0xff]  ;;  %v8697_v17 = vcombine.high %v1049_v29, %v1053_v30 }
 0x22c   : > { %v7770_v52 = vmax.f32 %v6780_v41, 0.0  ;;  %v6782_v53 = vadd.f32 %v6781_v43, %v6741_v42  ;;  %7035 = vmatpush1.bf16.msra.mxu0 %v8736_v13  ;;  %7076 = vmatpush1.bf16.msra.mxu1 %v8864_v38  ;;  %v1181_v25 = vld [vmem:[%s9358_s25 + $0x1c68] sm:$0xff]  ;;  %v8696_v41 = vcombine.low %v1049_v29, %v1053_v30 }
 0x22d   : > { %v6743_v57 = vpop.f32.mrf.mxu0  ;;  %7036 = vmatprep.subr.bf16.mxu0 %v8729_v39  ;;  %v6784_v63 = vpop.f32.mrf.mxu1  ;;  %7077 = vmatprep.subr.bf16.mxu1 %v8857_v12  ;;  %v8825_v35 = vcombine.high %v1177_v33, %v1181_v25  ;;  %v1041_v13 = vld [vmem:[%s9358_s25 + $0x1808] sm:$0xff]  ;;  %v8824_v42 = vcombine.low %v1177_v33, %v1181_v25 }
 0x22e   : > { %7778 = vst [vmem:[%s9925_s10] sm:$0xff] %v7770_v52  ;;  %v7771_v62 = vmax.f32 %v6782_v53, 0.0  ;;  %v1045_v37 = vld [vmem:[%s9358_s25 + $0x1828] sm:$0xff] }
 0x22f   : > { %v1169_v38 = vld [vmem:[%s9358_s25 + $0x1c08] sm:$0xff]  ;;  %v8689_v43 = vcombine.high %v1041_v13, %v1045_v37  ;;  %v8688_v49 = vcombine.low %v1041_v13, %v1045_v37 }
 0x230   : > { %7779 = vst [vmem:[%s9925_s10 + $0x8] sm:$0xff] %v7771_v62  ;;  %7037 = vmatpush1.bf16.msra.mxu0 %v8728_v56  ;;  %7078 = vmatpush1.bf16.msra.mxu1 %v8856_v60  ;;  %v1173_v39 = vld [vmem:[%s9358_s25 + $0x1c28] sm:$0xff] }
 0x231   : > { %7038 = vmatprep.subr.bf16.mxu0 %v8721_v61  ;;  %7079 = vmatprep.subr.bf16.mxu1 %v8849_v0  ;;  %v8817_v12 = vcombine.high %v1169_v38, %v1173_v39  ;;  %v1161_v44 = vld [vmem:[%s9358_s25 + $0x1bc8] sm:$0xff]  ;;  %v8816_v52 = vcombine.low %v1169_v38, %v1173_v39 }
 0x232   : > { %v1165_v45 = vld [vmem:[%s9358_s25 + $0x1be8] sm:$0xff] }
 0x233   : > { %v1289_v46 = vld [vmem:[%s9358_s25 + $0x1fc8] sm:$0xff]  ;;  %v8809_v53 = vcombine.high %v1161_v44, %v1165_v45  ;;  %v8808_v62 = vcombine.low %v1161_v44, %v1165_v45 }
 0x234   : > { %7039 = vmatpush1.bf16.msra.mxu0 %v8720_v7  ;;  %7080 = vmatpush1.bf16.msra.mxu1 %v8848_v8  ;;  %v1293_v47 = vld [vmem:[%s9358_s25 + $0x1fe8] sm:$0xff] }
 0x235   : > { %7040 = vmatprep.subr.bf16.mxu0 %v8713_v10  ;;  %7081 = vmatprep.subr.bf16.mxu1 %v8841_v11  ;;  %v8937_v54 = vcombine.high %v1289_v46, %v1293_v47  ;;  %v1153_v56 = vld [vmem:[%s9358_s25 + $0x1b88] sm:$0xff]  ;;  %v8936_v63 = vcombine.low %v1289_v46, %v1293_v47 }
 0x236   : > { %v1157_v57 = vld [vmem:[%s9358_s25 + $0x1ba8] sm:$0xff] }
 0x237   : > { %v1281_v60 = vld [vmem:[%s9358_s25 + $0x1f88] sm:$0xff]  ;;  %v8801_v0 = vcombine.high %v1153_v56, %v1157_v57  ;;  %v8800_v8 = vcombine.low %v1153_v56, %v1157_v57 }
 0x238   : > { %7041 = vmatpush1.bf16.msra.mxu0 %v8712_v24  ;;  %7082 = vmatpush1.bf16.msra.mxu1 %v8840_v19  ;;  %v1285_v61 = vld [vmem:[%s9358_s25 + $0x1fa8] sm:$0xff] }
 0x239   : > { %7042 = vmatprep.subr.bf16.mxu0 %v8705_v9  ;;  %7083 = vmatprep.subr.bf16.mxu1 %v8833_v27  ;;  %v8929_v1 = vcombine.high %v1281_v60, %v1285_v61  ;;  %v1145_v3 = vld [vmem:[%s9358_s25 + $0x1b48] sm:$0xff]  ;;  %v8928_v10 = vcombine.low %v1281_v60, %v1285_v61 }
 0x23a   : > { %v1149_v4 = vld [vmem:[%s9358_s25 + $0x1b68] sm:$0xff] }
 0x23b   : > { %v1273_v5 = vld [vmem:[%s9358_s25 + $0x1f48] sm:$0xff]  ;;  %v8793_v11 = vcombine.high %v1145_v3, %v1149_v4  ;;  %v8792_v19 = vcombine.low %v1145_v3, %v1149_v4  ;;  %v330_v4 = vld [vmem:[%s9358_s25 + $0x1d0] sm:$0xff] }
 0x23c   : > { %7043 = vmatpush1.bf16.msra.mxu0 %v8704_v34  ;;  %7084 = vmatpush1.bf16.msra.mxu1 %v8832_v32  ;;  %v1277_v7 = vld [vmem:[%s9358_s25 + $0x1f68] sm:$0xff] }
 0x23d   : > { %7044 = vmatprep.subr.bf16.mxu0 %v8697_v17  ;;  %7085 = vmatprep.subr.bf16.mxu1 %v8825_v35  ;;  %v8921_v15 = vcombine.high %v1273_v5, %v1277_v7  ;;  %v1137_v21 = vld [vmem:[%s9358_s25 + $0x1b08] sm:$0xff]  ;;  %v8920_v9 = vcombine.low %v1273_v5, %v1277_v7  ;;  %v334_v5 = vld [vmem:[%s9358_s25 + $0x1f0] sm:$0xff] }
 0x23e   : > { %v1141_v22 = vld [vmem:[%s9358_s25 + $0x1b28] sm:$0xff]  ;;  %v458_v7 = vld [vmem:[%s9358_s25 + $0x5d0] sm:$0xff] }
 0x23f   : > { %v1265_v23 = vld [vmem:[%s9358_s25 + $0x1f08] sm:$0xff]  ;;  %v8785_v27 = vcombine.high %v1137_v21, %v1141_v22  ;;  %v8784_v32 = vcombine.low %v1137_v21, %v1141_v22  ;;  %v7979_v21 = vcombine.high %v330_v4, %v334_v5 }
 0x240   : > { %7045 = vmatpush1.bf16.msra.mxu0 %v8696_v41  ;;  %7086 = vmatpush1.bf16.msra.mxu1 %v8824_v42  ;;  %v1269_v24 = vld [vmem:[%s9358_s25 + $0x1f28] sm:$0xff] }
 0x241   : > { %7046 = vmatprep.subr.bf16.mxu0 %v8689_v43  ;;  %7087 = vmatprep.subr.bf16.mxu1 %v8817_v12  ;;  %v8913_v29 = vcombine.high %v1265_v23, %v1269_v24  ;;  %v1129_v30 = vld [vmem:[%s9358_s25 + $0x1ac8] sm:$0xff]  ;;  %v8912_v17 = vcombine.low %v1265_v23, %v1269_v24  ;;  %v1312_v23 = vsub.s32 3, %v9663_v26  ;;  %v322_v24 = vld [vmem:[%s9358_s25 + $0x190] sm:$0xff] }
 0x242   : > { %v1133_v33 = vld [vmem:[%s9358_s25 + $0x1ae8] sm:$0xff] }
 0x243   : > { %v1257_v25 = vld [vmem:[%s9358_s25 + $0x1ec8] sm:$0xff]  ;;  %v8777_v35 = vcombine.high %v1129_v30, %v1133_v33  ;;  %v8776_v42 = vcombine.low %v1129_v30, %v1133_v33  ;;  %v7978_v33 = vcombine.low %v330_v4, %v334_v5 }
 0x244   : > { %7047 = vmatpush1.bf16.msra.mxu0 %v8688_v49  ;;  %7088 = vmatpush1.bf16.msra.mxu1 %v8816_v52  ;;  %v1261_v34 = vld [vmem:[%s9358_s25 + $0x1ee8] sm:$0xff] }
 0x245   : > { %7048 = vmatprep.subr.bf16.mxu0 %v8809_v53  ;;  %7089 = vmatprep.subr.bf16.mxu1 %v8937_v54  ;;  %v8905_v13 = vcombine.high %v1257_v25, %v1261_v34  ;;  %v1121_v37 = vld [vmem:[%s9358_s25 + $0x1a88] sm:$0xff]  ;;  %v8904_v43 = vcombine.low %v1257_v25, %v1261_v34 }
 0x246   : > { %v1125_v38 = vld [vmem:[%s9358_s25 + $0x1aa8] sm:$0xff] }
 0x247   : > { %v1249_v39 = vld [vmem:[%s9358_s25 + $0x1e88] sm:$0xff]  ;;  %v8769_v12 = vcombine.high %v1121_v37, %v1125_v38  ;;  %v8768_v52 = vcombine.low %v1121_v37, %v1125_v38  ;;  %v442_v38 = vld [vmem:[%s9358_s25 + $0x550] sm:$0xff] }
 0x248   : > { %7049 = vmatpush2.bf16.msra.mxu0 %v8808_v62  ;;  %7090 = vmatpush2.bf16.msra.mxu1 %v8936_v63  ;;  %v1253_v41 = vld [vmem:[%s9358_s25 + $0x1ea8] sm:$0xff] }
 0x249   : > { %7050 = vmatprep.subr.bf16.mxu0 %v8801_v0  ;;  %7091 = vmatprep.subr.bf16.mxu1 %v8929_v1  ;;  %v8897_v44 = vcombine.high %v1249_v39, %v1253_v41  ;;  %v1113_v45 = vld [vmem:[%s9358_s25 + $0x1a48] sm:$0xff]  ;;  %v8896_v53 = vcombine.low %v1249_v39, %v1253_v41  ;;  %v446_v39 = vld [vmem:[%s9358_s25 + $0x570] sm:$0xff] }
 0x24a   : > { %v1117_v46 = vld [vmem:[%s9358_s25 + $0x1a68] sm:$0xff] }
 0x24b   : > { %v1241_v47 = vld [vmem:[%s9358_s25 + $0x1e48] sm:$0xff]  ;;  %v8761_v54 = vcombine.high %v1113_v45, %v1117_v46  ;;  %v8760_v63 = vcombine.low %v1113_v45, %v1117_v46 }
 0x24c   : > { %7051 = vmatpush2.bf16.msra.mxu0 %v8800_v8  ;;  %7092 = vmatpush2.bf16.msra.mxu1 %v8928_v10  ;;  %v1245_v49 = vld [vmem:[%s9358_s25 + $0x1e68] sm:$0xff]  ;;  %v462_v8 = vld [vmem:[%s9358_s25 + $0x5f0] sm:$0xff] }
 0x24d   : > { %7052 = vmatprep.subr.bf16.mxu0 %v8793_v11  ;;  %7093 = vmatprep.subr.bf16.mxu1 %v8921_v15  ;;  %v8889_v56 = vcombine.high %v1241_v47, %v1245_v49  ;;  %v1105_v57 = vld [vmem:[%s9358_s25 + $0x1a08] sm:$0xff]  ;;  %v8888_v0 = vcombine.low %v1241_v47, %v1245_v49  ;;  %v1308_v11 = vsub.s32 2, %v9663_v26  ;;  %v8107_v22 = vcombine.high %v458_v7, %v462_v8 }
 0x24e   : > { %v1109_v60 = vld [vmem:[%s9358_s25 + $0x1a28] sm:$0xff]  ;;  %v8106_v25 = vcombine.low %v458_v7, %v462_v8  ;;  %v298_v7 = vld [vmem:[%s9358_s25 + $0xd0] sm:$0xff] }
 0x24f   : > { %v1233_v61 = vld [vmem:[%s9358_s25 + $0x1e08] sm:$0xff]  ;;  %v8753_v1 = vcombine.high %v1105_v57, %v1109_v60  ;;  %v8752_v10 = vcombine.low %v1105_v57, %v1109_v60  ;;  %v434_v57 = vld [vmem:[%s9358_s25 + $0x510] sm:$0xff] }
 0x250   : > { %7053 = vmatpush2.bf16.msra.mxu0 %v8792_v19  ;;  %7094 = vmatpush2.bf16.msra.mxu1 %v8920_v9  ;;  %v1237_v62 = vld [vmem:[%s9358_s25 + $0x1e28] sm:$0xff]  ;;  %v326_v19 = vld [vmem:[%s9358_s25 + $0x1b0] sm:$0xff] }
 0x251   : > { %7054 = vmatprep.subr.bf16.mxu0 %v8785_v27  ;;  %7095 = vmatprep.subr.bf16.mxu1 %v8913_v29  ;;  %v8881_v3 = vcombine.high %v1233_v61, %v1237_v62  ;;  %v8880_v15 = vcombine.low %v1233_v61, %v1237_v62  ;;  %v450_v9 = vld [vmem:[%s9358_s25 + $0x590] sm:$0xff]  ;;  %v9015_v29 = vld [vmem:[%s9670_s27] sm:$0xff]  ;;  %v7971_v34 = vcombine.high %v322_v24, %v326_v19 }
 0x252   : > { %v454_v27 = vld [vmem:[%s9358_s25 + $0x5b0] sm:$0xff]  ;;  %v1309_v30 = vrot.slane %v9015_v29, %v1308_v11 }
 0x253   : > { %v438_v60 = vld [vmem:[%s9358_s25 + $0x530] sm:$0xff] }
 0x254   : > { %7055 = vmatpush2.bf16.msra.mxu0 %v8784_v32  ;;  %7096 = vmatpush2.bf16.msra.mxu1 %v8912_v17  ;;  %v1313_v32 = vrot.slane %v9015_v29, %v1312_v23  ;;  %v8099_v17 = vcombine.high %v450_v9, %v454_v27  ;;  %v8083_v5 = vcombine.high %v434_v57, %v438_v60  ;;  %v302_v8 = vld [vmem:[%s9358_s25 + $0xf0] sm:$0xff] }
 0x255   : > { %7056 = vmatprep.subr.bf16.mxu0 %v8777_v35  ;;  %7097 = vmatprep.subr.bf16.mxu1 %v8905_v13  ;;  %v314_v35 = vld [vmem:[%s9358_s25 + $0x150] sm:$0xff]  ;;  %v7946_v29 = vcombine.low %v298_v7, %v302_v8 }
 0x256   : > { %v318_v13 = vld [vmem:[%s9358_s25 + $0x170] sm:$0xff] }
 0x257   : > { %v7963_v45 = vcombine.high %v314_v35, %v318_v13  ;;  %v430_v11 = vld [vmem:[%s9358_s25 + $0x4f0] sm:$0xff] }
 0x258   : > { %7057 = vmatpush2.bf16.msra.mxu0 %v8776_v42  ;;  %7098 = vmatpush2.bf16.msra.mxu1 %v8904_v43  ;;  %v7970_v43 = vcombine.low %v322_v24, %v326_v19  ;;  %v290_v24 = vld [vmem:[%s9358_s25 + $0x90] sm:$0xff] }
 0x259   : > { %7058 = vmatprep.subr.bf16.mxu0 %v8769_v12  ;;  %7099 = vmatprep.subr.bf16.mxu1 %v8897_v44  ;;  %v8098_v44 = vcombine.low %v450_v9, %v454_v27  ;;  %v294_v19 = vld [vmem:[%s9358_s25 + $0xb0] sm:$0xff] }
 0x25a   : > { %v418_v9 = vld [vmem:[%s9358_s25 + $0x490] sm:$0xff] }
 0x25b   : > { %v422_v27 = vld [vmem:[%s9358_s25 + $0x4b0] sm:$0xff] }
 0x25c   : > { %7059 = vmatpush2.bf16.msra.mxu0 %v8768_v52  ;;  %7100 = vmatpush2.bf16.msra.mxu1 %v8896_v53  ;;  %v8091_v52 = vcombine.high %v442_v38, %v446_v39  ;;  %v306_v53 = vld [vmem:[%s9358_s25 + $0x110] sm:$0xff] }
 0x25d   : > { %7060 = vmatprep.subr.bf16.mxu0 %v8761_v54  ;;  %7101 = vmatprep.subr.bf16.mxu1 %v8889_v56  ;;  %v310_v54 = vld [vmem:[%s9358_s25 + $0x130] sm:$0xff] }
 0x260   : > { %7061 = vmatpush2.bf16.msra.mxu0 %v8760_v63  ;;  %7102 = vmatpush2.bf16.msra.mxu1 %v8888_v0  ;;  %v7962_v63 = vcombine.low %v314_v35, %v318_v13  ;;  %v414_v35 = vld [vmem:[%s9358_s25 + $0x470] sm:$0xff]  ;;  %v7938_v13 = vcombine.low %v290_v24, %v294_v19 }
 0x261   : > { %7062 = vmatprep.subr.bf16.mxu0 %v8753_v1  ;;  %7103 = vmatprep.subr.bf16.mxu1 %v8881_v3  ;;  %v8090_v1 = vcombine.low %v442_v38, %v446_v39  ;;  %v7955_v3 = vcombine.high %v306_v53, %v310_v54 }
 0x264   : > { %7063 = vmatpush2.bf16.msra.mxu0 %v8752_v10  ;;  %7104 = vmatpush2.bf16.msra.mxu1 %v8880_v15  ;;  %v426_v10 = vld [vmem:[%s9358_s25 + $0x4d0] sm:$0xff]  ;;  %v7954_v15 = vcombine.low %v306_v53, %v310_v54 }
 0x265   : > { %7114 = vmatprep.subr.bf16.mxu0 %v7979_v21  ;;  %7155 = vmatprep.subr.bf16.mxu1 %v8107_v22  ;;  %v8082_v21 = vcombine.low %v434_v57, %v438_v60  ;;  %v7947_v22 = vcombine.high %v298_v7, %v302_v8  ;;  %v8075_v23 = vcombine.high %v426_v10, %v430_v11  ;;  %v398_v53 = vld [vmem:[%s9358_s25 + $0x3f0] sm:$0xff] }
 0x266   : > { %v522_v54 = vld [vmem:[%s9358_s25 + $0x7d0] sm:$0xff] }
 0x267   : > { %v6820_v37 = vpop.f32.mrf.mxu0  ;;  %7065 = vmatmul.mubr.bf16.vlgmr.msra.gmra.mxu0 %v9676_v50  ;;  %v6861_v42 = vpop.f32.mrf.mxu1  ;;  %7106 = vmatmul.mubr.bf16.vlgmr.msra.gmra.mxu1 %v9680_v55 }
 0x268   : > { %v6821_v41 = vadd.f32 %v6820_v37, %v1309_v30  ;;  %7115 = vmatpush1.bf16.msra.mxu0 %v7978_v33  ;;  %7156 = vmatpush1.bf16.msra.mxu1 %v8106_v25  ;;  %v8074_v30 = vcombine.low %v426_v10, %v430_v11  ;;  %v7939_v33 = vcombine.high %v290_v24, %v294_v19  ;;  %v378_v11 = vld [vmem:[%s9358_s25 + $0x350] sm:$0xff] }
 0x269   : > { %v6822_v12 = vpop.f32.mrf.mxu0  ;;  %7116 = vmatprep.subr.bf16.mxu0 %v7971_v34  ;;  %v6863_v49 = vpop.f32.mrf.mxu1  ;;  %7157 = vmatprep.subr.bf16.mxu1 %v8099_v17  ;;  %v8067_v25 = vcombine.high %v418_v9, %v422_v27  ;;  %v282_v34 = vld [vmem:[%s9358_s25 + $0x50] sm:$0xff]  ;;  %v8066_v37 = vcombine.low %v418_v9, %v422_v27 }
 0x26a   : > { %v9994_v46 = vadd.f32 %v6861_v42, %v6821_v41  ;;  %v6823_v47 = vadd.f32 %v6822_v12, %v1313_v32  ;;  %7146 = vmatprep.mubr.bf16.mxu0 %v9394_v58  ;;  %7187 = vmatprep.mubr.bf16.mxu1 %v9396_v59  ;;  %v286_v32 = vld [vmem:[%s9358_s25 + $0x70] sm:$0xff] }
 0x26b   : > { %v6824_v56 = vpop.f32.mrf.mxu0  ;;  %v6865_v62 = vpop.f32.mrf.mxu1  ;;  %v410_v17 = vld [vmem:[%s9358_s25 + $0x450] sm:$0xff]  ;;  %v7931_v38 = vcombine.high %v282_v34, %v286_v32 }
 0x26c   : > { %v10002_v61 = vadd.f32 %v6863_v49, %v6823_v47  ;;  %7117 = vmatpush1.bf16.msra.mxu0 %v7970_v43  ;;  %7158 = vmatpush1.bf16.msra.mxu1 %v8098_v44  ;;  %v8059_v39 = vcombine.high %v410_v17, %v414_v35  ;;  %v274_v41 = vld [vmem:[%s9358_s25 + $0x10] sm:$0xff]  ;;  %v7930_v44 = vcombine.low %v282_v34, %v286_v32 }
 0x26d   : > { %v6825_v0 = vpop.f32.mrf.mxu0  ;;  %7118 = vmatprep.subr.bf16.mxu0 %v7963_v45  ;;  %v6866_v4 = vpop.f32.mrf.mxu1  ;;  %7159 = vmatprep.subr.bf16.mxu1 %v8091_v52  ;;  %v278_v42 = vld [vmem:[%s9358_s25 + $0x30] sm:$0xff]  ;;  %v8058_v45 = vcombine.low %v410_v17, %v414_v35 }
 0x26e   : > { %v402_v43 = vld [vmem:[%s9358_s25 + $0x410] sm:$0xff]  ;;  %v7923_v47 = vcombine.high %v274_v41, %v278_v42  ;;  %v7922_v57 = vcombine.low %v274_v41, %v278_v42 }
 0x26f   : > { %v406_v12 = vld [vmem:[%s9358_s25 + $0x430] sm:$0xff] }
 0x270   : > { %7119 = vmatpush1.bf16.msra.mxu0 %v7962_v63  ;;  %7160 = vmatpush1.bf16.msra.mxu1 %v8090_v1  ;;  %v8051_v49 = vcombine.high %v402_v43, %v406_v12  ;;  %v394_v52 = vld [vmem:[%s9358_s25 + $0x3d0] sm:$0xff]  ;;  %v8050_v60 = vcombine.low %v402_v43, %v406_v12 }
 0x271   : > { %7120 = vmatprep.subr.bf16.mxu0 %v7955_v3  ;;  %7161 = vmatprep.subr.bf16.mxu1 %v8083_v5  ;;  %v526_v56 = vld [vmem:[%s9358_s25 + $0x7f0] sm:$0xff]  ;;  %v8043_v62 = vcombine.high %v394_v52, %v398_v53  ;;  %v8042_v5 = vcombine.low %v394_v52, %v398_v53 }
 0x272   : > { %v8171_v63 = vcombine.high %v522_v54, %v526_v56  ;;  %v386_v0 = vld [vmem:[%s9358_s25 + $0x390] sm:$0xff]  ;;  %v8170_v7 = vcombine.low %v522_v54, %v526_v56 }
 0x273   : > { %v390_v1 = vld [vmem:[%s9358_s25 + $0x3b0] sm:$0xff] }
 0x274   : > { %7121 = vmatpush1.bf16.msra.mxu0 %v7954_v15  ;;  %7162 = vmatpush1.bf16.msra.mxu1 %v8082_v21  ;;  %v514_v3 = vld [vmem:[%s9358_s25 + $0x790] sm:$0xff]  ;;  %v8035_v8 = vcombine.high %v386_v0, %v390_v1 }
 0x275   : > { %7122 = vmatprep.subr.bf16.mxu0 %v7947_v22  ;;  %7163 = vmatprep.subr.bf16.mxu1 %v8075_v23  ;;  %v518_v4 = vld [vmem:[%s9358_s25 + $0x7b0] sm:$0xff]  ;;  %v8034_v23 = vcombine.low %v386_v0, %v390_v1 }
 0x276   : > { %v8163_v10 = vcombine.high %v514_v3, %v518_v4  ;;  %v382_v15 = vld [vmem:[%s9358_s25 + $0x370] sm:$0xff]  ;;  %v8162_v24 = vcombine.low %v514_v3, %v518_v4 }
 0x277   : > { %v506_v21 = vld [vmem:[%s9358_s25 + $0x750] sm:$0xff]  ;;  %v8027_v19 = vcombine.high %v378_v11, %v382_v15 }
 0x278   : > { %7123 = vmatpush1.bf16.msra.mxu0 %v7946_v29  ;;  %7164 = vmatpush1.bf16.msra.mxu1 %v8074_v30  ;;  %v510_v22 = vld [vmem:[%s9358_s25 + $0x770] sm:$0xff] }
 0x279   : > { %7124 = vmatprep.subr.bf16.mxu0 %v7939_v33  ;;  %7165 = vmatprep.subr.bf16.mxu1 %v8067_v25  ;;  %v8155_v9 = vcombine.high %v506_v21, %v510_v22  ;;  %v370_v27 = vld [vmem:[%s9358_s25 + $0x310] sm:$0xff]  ;;  %v8026_v25 = vcombine.low %v378_v11, %v382_v15  ;;  %v8154_v34 = vcombine.low %v506_v21, %v510_v22 }
 0x27a   : > { %v374_v29 = vld [vmem:[%s9358_s25 + $0x330] sm:$0xff] }
 0x27b   : > { %v498_v30 = vld [vmem:[%s9358_s25 + $0x710] sm:$0xff]  ;;  %v8019_v32 = vcombine.high %v370_v27, %v374_v29 }
 0x27c   : > { %7125 = vmatpush1.bf16.msra.mxu0 %v7938_v13  ;;  %7166 = vmatpush1.bf16.msra.mxu1 %v8066_v37  ;;  %v502_v33 = vld [vmem:[%s9358_s25 + $0x730] sm:$0xff] }
 0x27d   : > { %7126 = vmatprep.subr.bf16.mxu0 %v7931_v38  ;;  %7167 = vmatprep.subr.bf16.mxu1 %v8059_v39  ;;  %v8147_v17 = vcombine.high %v498_v30, %v502_v33  ;;  %v362_v35 = vld [vmem:[%s9358_s25 + $0x2d0] sm:$0xff]  ;;  %v8018_v39 = vcombine.low %v370_v27, %v374_v29  ;;  %v8146_v41 = vcombine.low %v498_v30, %v502_v33 }
 0x27e   : > { %v366_v13 = vld [vmem:[%s9358_s25 + $0x2f0] sm:$0xff] }
 0x27f   : > { %v490_v37 = vld [vmem:[%s9358_s25 + $0x6d0] sm:$0xff]  ;;  %v8011_v42 = vcombine.high %v362_v35, %v366_v13 }
 0x280   : > { %7127 = vmatpush1.bf16.msra.mxu0 %v7930_v44  ;;  %7168 = vmatpush1.bf16.msra.mxu1 %v8058_v45  ;;  %v494_v38 = vld [vmem:[%s9358_s25 + $0x6f0] sm:$0xff] }
 0x281   : > { %7128 = vmatprep.subr.bf16.mxu0 %v7923_v47  ;;  %7169 = vmatprep.subr.bf16.mxu1 %v8051_v49  ;;  %v8139_v43 = vcombine.high %v490_v37, %v494_v38  ;;  %v354_v12 = vld [vmem:[%s9358_s25 + $0x290] sm:$0xff]  ;;  %v8010_v49 = vcombine.low %v362_v35, %v366_v13  ;;  %v8138_v52 = vcombine.low %v490_v37, %v494_v38 }
 0x282   : > { %v358_v44 = vld [vmem:[%s9358_s25 + $0x2b0] sm:$0xff] }
 0x283   : > { %v482_v45 = vld [vmem:[%s9358_s25 + $0x690] sm:$0xff]  ;;  %v8003_v53 = vcombine.high %v354_v12, %v358_v44 }
 0x284   : > { %7129 = vmatpush1.bf16.msra.mxu0 %v7922_v57  ;;  %7170 = vmatpush1.bf16.msra.mxu1 %v8050_v60  ;;  %v486_v47 = vld [vmem:[%s9358_s25 + $0x6b0] sm:$0xff] }
 0x285   : > { %7130 = vmatprep.subr.bf16.mxu0 %v8043_v62  ;;  %7171 = vmatprep.subr.bf16.mxu1 %v8171_v63  ;;  %v8131_v54 = vcombine.high %v482_v45, %v486_v47  ;;  %v346_v56 = vld [vmem:[%s9358_s25 + $0x250] sm:$0xff]  ;;  %v8002_v63 = vcombine.low %v354_v12, %v358_v44  ;;  %v8130_v0 = vcombine.low %v482_v45, %v486_v47 }
 0x286   : > { %v350_v57 = vld [vmem:[%s9358_s25 + $0x270] sm:$0xff] }
 0x287   : > { %v474_v60 = vld [vmem:[%s9358_s25 + $0x650] sm:$0xff]  ;;  %v7995_v1 = vcombine.high %v346_v56, %v350_v57 }
 0x288   : > { %7131 = vmatpush2.bf16.msra.mxu0 %v8042_v5  ;;  %7172 = vmatpush2.bf16.msra.mxu1 %v8170_v7  ;;  %v478_v62 = vld [vmem:[%s9358_s25 + $0x670] sm:$0xff] }
 0x289   : > { %7132 = vmatprep.subr.bf16.mxu0 %v8035_v8  ;;  %7173 = vmatprep.subr.bf16.mxu1 %v8163_v10  ;;  %v8123_v3 = vcombine.high %v474_v60, %v478_v62  ;;  %v338_v4 = vld [vmem:[%s9358_s25 + $0x210] sm:$0xff]  ;;  %v7994_v10 = vcombine.low %v346_v56, %v350_v57  ;;  %v8122_v11 = vcombine.low %v474_v60, %v478_v62 }
 0x28a   : > { %v342_v5 = vld [vmem:[%s9358_s25 + $0x230] sm:$0xff] }
 0x28b   : > { %v466_v7 = vld [vmem:[%s9358_s25 + $0x610] sm:$0xff]  ;;  %v7987_v15 = vcombine.high %v338_v4, %v342_v5 }
 0x28c   : > { %7133 = vmatpush2.bf16.msra.mxu0 %v8034_v23  ;;  %7174 = vmatpush2.bf16.msra.mxu1 %v8162_v24  ;;  %v470_v8 = vld [vmem:[%s9358_s25 + $0x630] sm:$0xff] }
 0x28d   : > { %7134 = vmatprep.subr.bf16.mxu0 %v8027_v19  ;;  %7175 = vmatprep.subr.bf16.mxu1 %v8155_v9  ;;  %v8115_v21 = vcombine.high %v466_v7, %v470_v8  ;;  %v586_v22 = vld [vmem:[%s9358_s25 + $0x9d0] sm:$0xff]  ;;  %v7986_v9 = vcombine.low %v338_v4, %v342_v5  ;;  %v8114_v27 = vcombine.low %v466_v7, %v470_v8 }
 0x28e   : > { %v590_v23 = vld [vmem:[%s9358_s25 + $0x9f0] sm:$0xff] }
 0x28f   : > { %v714_v24 = vld [vmem:[%s9358_s25 + $0xdd0] sm:$0xff]  ;;  %v8235_v29 = vcombine.high %v586_v22, %v590_v23 }
 0x290   : > { %7135 = vmatpush2.bf16.msra.mxu0 %v8026_v25  ;;  %7176 = vmatpush2.bf16.msra.mxu1 %v8154_v34  ;;  %v718_v19 = vld [vmem:[%s9358_s25 + $0xdf0] sm:$0xff] }
 0x291   : > { %7136 = vmatprep.subr.bf16.mxu0 %v8019_v32  ;;  %7177 = vmatprep.subr.bf16.mxu1 %v8147_v17  ;;  %v8363_v30 = vcombine.high %v714_v24, %v718_v19  ;;  %v578_v33 = vld [vmem:[%s9358_s25 + $0x990] sm:$0xff]  ;;  %v8234_v17 = vcombine.low %v586_v22, %v590_v23  ;;  %v8362_v35 = vcombine.low %v714_v24, %v718_v19 }
 0x292   : > { %v582_v25 = vld [vmem:[%s9358_s25 + $0x9b0] sm:$0xff] }
 0x293   : > { %v706_v34 = vld [vmem:[%s9358_s25 + $0xd90] sm:$0xff]  ;;  %v8227_v13 = vcombine.high %v578_v33, %v582_v25  ;;  %v8226_v45 = vcombine.low %v578_v33, %v582_v25 }
 0x294   : > { %7137 = vmatpush2.bf16.msra.mxu0 %v8018_v39  ;;  %7178 = vmatpush2.bf16.msra.mxu1 %v8146_v41  ;;  %v710_v32 = vld [vmem:[%s9358_s25 + $0xdb0] sm:$0xff] }
 0x295   : > { %7138 = vmatprep.subr.bf16.mxu0 %v8011_v42  ;;  %7179 = vmatprep.subr.bf16.mxu1 %v8139_v43  ;;  %v8355_v37 = vcombine.high %v706_v34, %v710_v32  ;;  %v570_v38 = vld [vmem:[%s9358_s25 + $0x950] sm:$0xff] }
 0x296   : > { %v574_v39 = vld [vmem:[%s9358_s25 + $0x970] sm:$0xff] }
 0x297   : > { %v698_v42 = vld [vmem:[%s9358_s25 + $0xd50] sm:$0xff] }
 0x298   : > { %7139 = vmatpush2.bf16.msra.mxu0 %v8010_v49  ;;  %7180 = vmatpush2.bf16.msra.mxu1 %v8138_v52  ;;  %v702_v43 = vld [vmem:[%s9358_s25 + $0xd70] sm:$0xff]  ;;  %v8354_v49 = vcombine.low %v706_v34, %v710_v32  ;;  %v8219_v52 = vcombine.high %v570_v38, %v574_v39 }
 0x299   : > { %7140 = vmatprep.subr.bf16.mxu0 %v8003_v53  ;;  %7181 = vmatprep.subr.bf16.mxu1 %v8131_v54  ;;  %v562_v57 = vld [vmem:[%s9358_s25 + $0x910] sm:$0xff]  ;;  %v8346_v5 = vcombine.low %v698_v42, %v702_v43 }
 0x29a   : > { %v566_v60 = vld [vmem:[%s9358_s25 + $0x930] sm:$0xff] }
 0x29b   : > { %v8211_v7 = vcombine.high %v562_v57, %v566_v60  ;;  %v686_v22 = vld [vmem:[%s9358_s25 + $0xcf0] sm:$0xff]  ;;  %v8210_v23 = vcombine.low %v562_v57, %v566_v60 }
 0x29c   : > { %7141 = vmatpush2.bf16.msra.mxu0 %v8002_v63  ;;  %7182 = vmatpush2.bf16.msra.mxu1 %v8130_v0  ;;  %v690_v63 = vld [vmem:[%s9358_s25 + $0xd10] sm:$0xff] }
 0x29d   : > { %7142 = vmatprep.subr.bf16.mxu0 %v7995_v1  ;;  %7183 = vmatprep.subr.bf16.mxu1 %v8123_v3  ;;  %v694_v0 = vld [vmem:[%s9358_s25 + $0xd30] sm:$0xff] }
 0x29e   : > { %v8338_v24 = vcombine.low %v690_v63, %v694_v0  ;;  %v678_v33 = vld [vmem:[%s9358_s25 + $0xcb0] sm:$0xff] }
 0x29f   : > { %v654_v57 = vld [vmem:[%s9358_s25 + $0xbf0] sm:$0xff] }
 0x2a0   : > { %7143 = vmatpush2.bf16.msra.mxu0 %v7994_v10  ;;  %7184 = vmatpush2.bf16.msra.mxu1 %v8122_v11  ;;  %v8339_v10 = vcombine.high %v690_v63, %v694_v0  ;;  %v554_v11 = vld [vmem:[%s9358_s25 + $0x8d0] sm:$0xff] }
 0x2a1   : > { %7144 = vmatprep.subr.bf16.mxu0 %v7987_v15  ;;  %7185 = vmatprep.subr.bf16.mxu1 %v8115_v21  ;;  %v558_v15 = vld [vmem:[%s9358_s25 + $0x8f0] sm:$0xff] }
 0x2a2   : > { %v682_v21 = vld [vmem:[%s9358_s25 + $0xcd0] sm:$0xff]  ;;  %v8203_v19 = vcombine.high %v554_v11, %v558_v15  ;;  %v8202_v25 = vcombine.low %v554_v11, %v558_v15 }
 0x2a3   : > { %v8330_v34 = vcombine.low %v682_v21, %v686_v22  ;;  %v778_v60 = vld [vmem:[%s9358_s25 + $0xfd0] sm:$0xff] }
 0x2a4   : > { %7145 = vmatpush2.bf16.msra.mxu0 %v7986_v9  ;;  %7186 = vmatpush2.bf16.msra.mxu1 %v8114_v27  ;;  %v8331_v9 = vcombine.high %v682_v21, %v686_v22  ;;  %v546_v27 = vld [vmem:[%s9358_s25 + $0x890] sm:$0xff] }
 0x2a5   : > { %7196 = vmatprep.subr.bf16.mxu0 %v8235_v29  ;;  %7237 = vmatprep.subr.bf16.mxu1 %v8363_v30  ;;  %v550_v29 = vld [vmem:[%s9358_s25 + $0x8b0] sm:$0xff] }
 0x2a6   : > { %v674_v30 = vld [vmem:[%s9358_s25 + $0xc90] sm:$0xff]  ;;  %v8195_v32 = vcombine.high %v546_v27, %v550_v29 }
 0x2a7   : > { %v6902_v41 = vpop.f32.mrf.mxu0  ;;  %7147 = vmatmul.mubr.bf16.vlgmr.msra.gmra.mxu0 %v9440_v16  ;;  %v6943_v44 = vpop.f32.mrf.mxu1  ;;  %7188 = vmatmul.mubr.bf16.vlgmr.msra.gmra.mxu1 %v9444_v20  ;;  %v634_v22 = vld [vmem:[%s9358_s25 + $0xb50] sm:$0xff] }
 0x2a8   : > { %v6903_v12 = vadd.f32 %v6902_v41, %v9994_v46  ;;  %7197 = vmatpush1.bf16.msra.mxu0 %v8234_v17  ;;  %7238 = vmatpush1.bf16.msra.mxu1 %v8362_v35  ;;  %v8347_v46 = vcombine.high %v698_v42, %v702_v43  ;;  %v8323_v17 = vcombine.high %v674_v30, %v678_v33  ;;  %v538_v35 = vld [vmem:[%s9358_s25 + $0x850] sm:$0xff] }
 0x2a9   : > { %v6904_v47 = vpop.f32.mrf.mxu0  ;;  %7198 = vmatprep.subr.bf16.mxu0 %v8227_v13  ;;  %v6945_v56 = vpop.f32.mrf.mxu1  ;;  %7239 = vmatprep.subr.bf16.mxu1 %v8355_v37  ;;  %v542_v13 = vld [vmem:[%s9358_s25 + $0x870] sm:$0xff]  ;;  %v8322_v41 = vcombine.low %v674_v30, %v678_v33 }
 0x2aa   : > { %v10067_v53 = vadd.f32 %v6943_v44, %v6903_v12  ;;  %v6905_v54 = vadd.f32 %v6904_v47, %v10002_v61  ;;  %7228 = vmatprep.mubr.bf16.mxu0 %v9448_v28  ;;  %7269 = vmatprep.mubr.bf16.mxu1 %v9453_v31  ;;  %v8218_v61 = vcombine.low %v570_v38, %v574_v39  ;;  %v666_v37 = vld [vmem:[%s9358_s25 + $0xc50] sm:$0xff] }
 0x2ab   : > { %v6906_v62 = vpop.f32.mrf.mxu0  ;;  %v6947_v3 = vpop.f32.mrf.mxu1  ;;  %v670_v38 = vld [vmem:[%s9358_s25 + $0xc70] sm:$0xff]  ;;  %v8194_v39 = vcombine.low %v546_v27, %v550_v29  ;;  %v8187_v42 = vcombine.high %v538_v35, %v542_v13 }
 0x2ac   : > { %v10076_v1 = vadd.f32 %v6945_v56, %v6905_v54  ;;  %7199 = vmatpush1.bf16.msra.mxu0 %v8226_v45  ;;  %7240 = vmatpush1.bf16.msra.mxu1 %v8354_v49  ;;  %v8315_v43 = vcombine.high %v666_v37, %v670_v38  ;;  %v530_v12 = vld [vmem:[%s9358_s25 + $0x810] sm:$0xff]  ;;  %v8186_v49 = vcombine.low %v538_v35, %v542_v13 }
 0x2ad   : > { %v6907_v4 = vpop.f32.mrf.mxu0  ;;  %7200 = vmatprep.subr.bf16.mxu0 %v8219_v52  ;;  %v6948_v8 = vpop.f32.mrf.mxu1  ;;  %7241 = vmatprep.subr.bf16.mxu1 %v8347_v46  ;;  %v534_v44 = vld [vmem:[%s9358_s25 + $0x830] sm:$0xff]  ;;  %v8314_v52 = vcombine.low %v666_v37, %v670_v38 }
 0x2ae   : > { %v658_v45 = vld [vmem:[%s9358_s25 + $0xc10] sm:$0xff]  ;;  %v8179_v54 = vcombine.high %v530_v12, %v534_v44  ;;  %v8178_v63 = vcombine.low %v530_v12, %v534_v44 }
 0x2af   : > { %v662_v47 = vld [vmem:[%s9358_s25 + $0xc30] sm:$0xff] }
 0x2b0   : > { %7201 = vmatpush1.bf16.msra.mxu0 %v8218_v61  ;;  %7242 = vmatpush1.bf16.msra.mxu1 %v8346_v5  ;;  %v8307_v56 = vcombine.high %v658_v45, %v662_v47  ;;  %v650_v46 = vld [vmem:[%s9358_s25 + $0xbd0] sm:$0xff]  ;;  %v8306_v0 = vcombine.low %v658_v45, %v662_v47 }
 0x2b1   : > { %7202 = vmatprep.subr.bf16.mxu0 %v8211_v7  ;;  %7243 = vmatprep.subr.bf16.mxu1 %v8339_v10  ;;  %v782_v62 = vld [vmem:[%s9358_s25 + $0xff0] sm:$0xff]  ;;  %v8299_v3 = vcombine.high %v650_v46, %v654_v57  ;;  %v8298_v10 = vcombine.low %v650_v46, %v654_v57 }
 0x2b2   : > { %v8427_v61 = vcombine.high %v778_v60, %v782_v62  ;;  %v642_v4 = vld [vmem:[%s9358_s25 + $0xb90] sm:$0xff]  ;;  %v8426_v11 = vcombine.low %v778_v60, %v782_v62 }
 0x2b3   : > { %v646_v5 = vld [vmem:[%s9358_s25 + $0xbb0] sm:$0xff] }
 0x2b4   : > { %7203 = vmatpush1.bf16.msra.mxu0 %v8210_v23  ;;  %7244 = vmatpush1.bf16.msra.mxu1 %v8338_v24  ;;  %v770_v7 = vld [vmem:[%s9358_s25 + $0xf90] sm:$0xff]  ;;  %v8291_v15 = vcombine.high %v642_v4, %v646_v5 }
 0x2b5   : > { %7204 = vmatprep.subr.bf16.mxu0 %v8203_v19  ;;  %7245 = vmatprep.subr.bf16.mxu1 %v8331_v9  ;;  %v774_v8 = vld [vmem:[%s9358_s25 + $0xfb0] sm:$0xff]  ;;  %v8290_v9 = vcombine.low %v642_v4, %v646_v5 }
 0x2b6   : > { %v8419_v21 = vcombine.high %v770_v7, %v774_v8  ;;  %v638_v23 = vld [vmem:[%s9358_s25 + $0xb70] sm:$0xff]  ;;  %v8418_v27 = vcombine.low %v770_v7, %v774_v8 }
 0x2b7   : > { %v762_v24 = vld [vmem:[%s9358_s25 + $0xf50] sm:$0xff]  ;;  %v8283_v29 = vcombine.high %v634_v22, %v638_v23 }
 0x2b8   : > { %7205 = vmatpush1.bf16.msra.mxu0 %v8202_v25  ;;  %7246 = vmatpush1.bf16.msra.mxu1 %v8330_v34  ;;  %v766_v19 = vld [vmem:[%s9358_s25 + $0xf70] sm:$0xff] }
 0x2b9   : > { %7206 = vmatprep.subr.bf16.mxu0 %v8195_v32  ;;  %7247 = vmatprep.subr.bf16.mxu1 %v8323_v17  ;;  %v8411_v30 = vcombine.high %v762_v24, %v766_v19  ;;  %v626_v33 = vld [vmem:[%s9358_s25 + $0xb10] sm:$0xff]  ;;  %v8282_v17 = vcombine.low %v634_v22, %v638_v23  ;;  %v8410_v35 = vcombine.low %v762_v24, %v766_v19 }
 0x2ba   : > { %v630_v25 = vld [vmem:[%s9358_s25 + $0xb30] sm:$0xff] }
 0x2bb   : > { %v754_v34 = vld [vmem:[%s9358_s25 + $0xf10] sm:$0xff]  ;;  %v8275_v13 = vcombine.high %v626_v33, %v630_v25 }
 0x2bc   : > { %7207 = vmatpush1.bf16.msra.mxu0 %v8194_v39  ;;  %7248 = vmatpush1.bf16.msra.mxu1 %v8322_v41  ;;  %v758_v32 = vld [vmem:[%s9358_s25 + $0xf30] sm:$0xff] }
 0x2bd   : > { %7208 = vmatprep.subr.bf16.mxu0 %v8187_v42  ;;  %7249 = vmatprep.subr.bf16.mxu1 %v8315_v43  ;;  %v8403_v37 = vcombine.high %v754_v34, %v758_v32  ;;  %v618_v38 = vld [vmem:[%s9358_s25 + $0xad0] sm:$0xff]  ;;  %v8274_v43 = vcombine.low %v626_v33, %v630_v25  ;;  %v8402_v12 = vcombine.low %v754_v34, %v758_v32 }
 0x2be   : > { %v622_v39 = vld [vmem:[%s9358_s25 + $0xaf0] sm:$0xff] }
 0x2bf   : > { %v746_v41 = vld [vmem:[%s9358_s25 + $0xed0] sm:$0xff]  ;;  %v8267_v44 = vcombine.high %v618_v38, %v622_v39 }
 0x2c0   : > { %7209 = vmatpush1.bf16.msra.mxu0 %v8186_v49  ;;  %7250 = vmatpush1.bf16.msra.mxu1 %v8314_v52  ;;  %v750_v42 = vld [vmem:[%s9358_s25 + $0xef0] sm:$0xff] }
 0x2c1   : > { %7210 = vmatprep.subr.bf16.mxu0 %v8179_v54  ;;  %7251 = vmatprep.subr.bf16.mxu1 %v8307_v56  ;;  %v8395_v45 = vcombine.high %v746_v41, %v750_v42  ;;  %v610_v47 = vld [vmem:[%s9358_s25 + $0xa90] sm:$0xff]  ;;  %v8266_v56 = vcombine.low %v618_v38, %v622_v39  ;;  %v8394_v46 = vcombine.low %v746_v41, %v750_v42 }
 0x2c2   : > { %v614_v49 = vld [vmem:[%s9358_s25 + $0xab0] sm:$0xff] }
 0x2c3   : > { %v738_v52 = vld [vmem:[%s9358_s25 + $0xe90] sm:$0xff]  ;;  %v8259_v57 = vcombine.high %v610_v47, %v614_v49 }
 0x2c4   : > { %7211 = vmatpush1.bf16.msra.mxu0 %v8178_v63  ;;  %7252 = vmatpush1.bf16.msra.mxu1 %v8306_v0  ;;  %v742_v54 = vld [vmem:[%s9358_s25 + $0xeb0] sm:$0xff] }
 0x2c5   : > { %7212 = vmatprep.subr.bf16.mxu0 %v8299_v3  ;;  %7253 = vmatprep.subr.bf16.mxu1 %v8427_v61  ;;  %v8387_v60 = vcombine.high %v738_v52, %v742_v54  ;;  %v602_v62 = vld [vmem:[%s9358_s25 + $0xa50] sm:$0xff]  ;;  %v8258_v61 = vcombine.low %v610_v47, %v614_v49  ;;  %v8386_v4 = vcombine.low %v738_v52, %v742_v54 }
 0x2c6   : > { %v606_v63 = vld [vmem:[%s9358_s25 + $0xa70] sm:$0xff] }
 0x2c7   : > { %v730_v0 = vld [vmem:[%s9358_s25 + $0xe50] sm:$0xff]  ;;  %v8251_v5 = vcombine.high %v602_v62, %v606_v63 }
 0x2c8   : > { %7213 = vmatpush2.bf16.msra.mxu0 %v8298_v10  ;;  %7254 = vmatpush2.bf16.msra.mxu1 %v8426_v11  ;;  %v734_v3 = vld [vmem:[%s9358_s25 + $0xe70] sm:$0xff] }
 0x2c9   : > { %7214 = vmatprep.subr.bf16.mxu0 %v8291_v15  ;;  %7255 = vmatprep.subr.bf16.mxu1 %v8419_v21  ;;  %v8379_v7 = vcombine.high %v730_v0, %v734_v3  ;;  %v594_v8 = vld [vmem:[%s9358_s25 + $0xa10] sm:$0xff]  ;;  %v8250_v21 = vcombine.low %v602_v62, %v606_v63  ;;  %v8378_v22 = vcombine.low %v730_v0, %v734_v3 }
 0x2ca   : > { %v598_v10 = vld [vmem:[%s9358_s25 + $0xa30] sm:$0xff] }
 0x2cb   : > { %v722_v11 = vld [vmem:[%s9358_s25 + $0xe10] sm:$0xff]  ;;  %v8243_v23 = vcombine.high %v594_v8, %v598_v10 }
 0x2cc   : > { %7215 = vmatpush2.bf16.msra.mxu0 %v8290_v9  ;;  %7256 = vmatpush2.bf16.msra.mxu1 %v8418_v27  ;;  %v726_v15 = vld [vmem:[%s9358_s25 + $0xe30] sm:$0xff] }
 0x2cd   : > { %7216 = vmatprep.subr.bf16.mxu0 %v8283_v29  ;;  %7257 = vmatprep.subr.bf16.mxu1 %v8411_v30  ;;  %v8371_v24 = vcombine.high %v722_v11, %v726_v15  ;;  %v842_v19 = vld [vmem:[%s9358_s25 + $0x11d0] sm:$0xff]  ;;  %v8242_v30 = vcombine.low %v594_v8, %v598_v10  ;;  %v8370_v33 = vcombine.low %v722_v11, %v726_v15 }
 0x2ce   : > { %v846_v9 = vld [vmem:[%s9358_s25 + $0x11f0] sm:$0xff] }
 0x2cf   : > { %v970_v27 = vld [vmem:[%s9358_s25 + $0x15d0] sm:$0xff]  ;;  %v8491_v25 = vcombine.high %v842_v19, %v846_v9 }
 0x2d0   : > { %7217 = vmatpush2.bf16.msra.mxu0 %v8282_v17  ;;  %7258 = vmatpush2.bf16.msra.mxu1 %v8410_v35  ;;  %v974_v29 = vld [vmem:[%s9358_s25 + $0x15f0] sm:$0xff] }
 0x2d1   : > { %7218 = vmatprep.subr.bf16.mxu0 %v8275_v13  ;;  %7259 = vmatprep.subr.bf16.mxu1 %v8403_v37  ;;  %v8619_v34 = vcombine.high %v970_v27, %v974_v29  ;;  %v834_v32 = vld [vmem:[%s9358_s25 + $0x1190] sm:$0xff]  ;;  %v8490_v37 = vcombine.low %v842_v19, %v846_v9  ;;  %v8618_v38 = vcombine.low %v970_v27, %v974_v29 }
 0x2d2   : > { %v838_v17 = vld [vmem:[%s9358_s25 + $0x11b0] sm:$0xff] }
 0x2d3   : > { %v962_v35 = vld [vmem:[%s9358_s25 + $0x1590] sm:$0xff]  ;;  %v8483_v39 = vcombine.high %v834_v32, %v838_v17  ;;  %v8482_v49 = vcombine.low %v834_v32, %v838_v17 }
 0x2d4   : > { %7219 = vmatpush2.bf16.msra.mxu0 %v8274_v43  ;;  %7260 = vmatpush2.bf16.msra.mxu1 %v8402_v12  ;;  %v966_v13 = vld [vmem:[%s9358_s25 + $0x15b0] sm:$0xff] }
 0x2d5   : > { %7220 = vmatprep.subr.bf16.mxu0 %v8267_v44  ;;  %7261 = vmatprep.subr.bf16.mxu1 %v8395_v45  ;;  %v8611_v41 = vcombine.high %v962_v35, %v966_v13  ;;  %v826_v42 = vld [vmem:[%s9358_s25 + $0x1150] sm:$0xff]  ;;  %v8610_v54 = vcombine.low %v962_v35, %v966_v13 }
 0x2d6   : > { %v830_v43 = vld [vmem:[%s9358_s25 + $0x1170] sm:$0xff] }
 0x2d7   : > { %v954_v44 = vld [vmem:[%s9358_s25 + $0x1550] sm:$0xff] }
 0x2d8   : > { %7221 = vmatpush2.bf16.msra.mxu0 %v8266_v56  ;;  %7262 = vmatpush2.bf16.msra.mxu1 %v8394_v46  ;;  %v958_v45 = vld [vmem:[%s9358_s25 + $0x1570] sm:$0xff]  ;;  %v8475_v56 = vcombine.high %v826_v42, %v830_v43 }
 0x2d9   : > { %7222 = vmatprep.subr.bf16.mxu0 %v8259_v57  ;;  %7263 = vmatprep.subr.bf16.mxu1 %v8387_v60  ;;  %v8603_v57 = vcombine.high %v954_v44, %v958_v45  ;;  %v818_v60 = vld [vmem:[%s9358_s25 + $0x1110] sm:$0xff] }
 0x2da   : > { %v822_v62 = vld [vmem:[%s9358_s25 + $0x1130] sm:$0xff] }
 0x2db   : > { %v946_v0 = vld [vmem:[%s9358_s25 + $0x1510] sm:$0xff]  ;;  %v8467_v8 = vcombine.high %v818_v60, %v822_v62 }
 0x2dc   : > { %7223 = vmatpush2.bf16.msra.mxu0 %v8258_v61  ;;  %7264 = vmatpush2.bf16.msra.mxu1 %v8386_v4  ;;  %v950_v3 = vld [vmem:[%s9358_s25 + $0x1530] sm:$0xff]  ;;  %v8474_v4 = vcombine.low %v826_v42, %v830_v43 }
 0x2dd   : > { %7224 = vmatprep.subr.bf16.mxu0 %v8251_v5  ;;  %7265 = vmatprep.subr.bf16.mxu1 %v8379_v7  ;;  %v8602_v7 = vcombine.low %v954_v44, %v958_v45  ;;  %v8595_v11 = vcombine.high %v946_v0, %v950_v3  ;;  %v810_v15 = vld [vmem:[%s9358_s25 + $0x10d0] sm:$0xff]  ;;  %v8594_v19 = vcombine.low %v946_v0, %v950_v3 }
 0x2de   : > { %v802_v29 = vld [vmem:[%s9358_s25 + $0x1090] sm:$0xff] }
 0x2df   : > { %v794_v13 = vld [vmem:[%s9358_s25 + $0x1050] sm:$0xff] }
 0x2e0   : > { %7225 = vmatpush2.bf16.msra.mxu0 %v8250_v21  ;;  %7266 = vmatpush2.bf16.msra.mxu1 %v8378_v22  ;;  %v814_v21 = vld [vmem:[%s9358_s25 + $0x10f0] sm:$0xff] }
 0x2e1   : > { %7226 = vmatprep.subr.bf16.mxu0 %v8243_v23  ;;  %7267 = vmatprep.subr.bf16.mxu1 %v8371_v24  ;;  %v938_v22 = vld [vmem:[%s9358_s25 + $0x14d0] sm:$0xff]  ;;  %v8466_v24 = vcombine.low %v818_v60, %v822_v62  ;;  %v8459_v9 = vcombine.high %v810_v15, %v814_v21 }
 0x2e2   : > { %v942_v23 = vld [vmem:[%s9358_s25 + $0x14f0] sm:$0xff] }
 0x2e3   : > { %v8587_v27 = vcombine.high %v938_v22, %v942_v23  ;;  %v8586_v32 = vcombine.low %v938_v22, %v942_v23  ;;  %v786_v45 = vld [vmem:[%s9358_s25 + $0x1010] sm:$0xff] }
 0x2e4   : > { %7227 = vmatpush2.bf16.msra.mxu0 %v8242_v30  ;;  %7268 = vmatpush2.bf16.msra.mxu1 %v8370_v33  ;;  %v806_v30 = vld [vmem:[%s9358_s25 + $0x10b0] sm:$0xff] }
 0x2e5   : > { %7278 = vmatprep.subr.bf16.mxu0 %v8491_v25  ;;  %7319 = vmatprep.subr.bf16.mxu1 %v8619_v34  ;;  %v930_v33 = vld [vmem:[%s9358_s25 + $0x1490] sm:$0xff]  ;;  %v8458_v34 = vcombine.low %v810_v15, %v814_v21  ;;  %v8451_v17 = vcombine.high %v802_v29, %v806_v30 }
 0x2e6   : > { %v934_v25 = vld [vmem:[%s9358_s25 + $0x14b0] sm:$0xff] }
 0x2e7   : > { %v10136_v12 = vpop.f32.mrf.mxu0  ;;  %7229 = vmatmul.mubr.bf16.vlgmr.msra.gmra.mxu0 %v9516_v36  ;;  %v10141_v47 = vpop.f32.mrf.mxu1  ;;  %7270 = vmatmul.mubr.bf16.vlgmr.msra.gmra.mxu1 %v9520_v40  ;;  %v8579_v35 = vcombine.high %v930_v33, %v934_v25  ;;  %v8578_v42 = vcombine.low %v930_v33, %v934_v25  ;;  %v906_v0 = vld [vmem:[%s9358_s25 + $0x13d0] sm:$0xff] }
 0x2e8   : > { %7279 = vmatpush1.bf16.msra.mxu0 %v8490_v37  ;;  %7320 = vmatpush1.bf16.msra.mxu1 %v8618_v38  ;;  %v798_v37 = vld [vmem:[%s9358_s25 + $0x1070] sm:$0xff] }
 0x2e9   : > { %v10144_v52 = vpop.f32.mrf.mxu0  ;;  %7280 = vmatprep.subr.bf16.mxu0 %v8483_v39  ;;  %v10146_v46 = vpop.f32.mrf.mxu1  ;;  %7321 = vmatprep.subr.bf16.mxu1 %v8611_v41  ;;  %v922_v38 = vld [vmem:[%s9358_s25 + $0x1450] sm:$0xff]  ;;  %v8450_v41 = vcombine.low %v802_v29, %v806_v30  ;;  %v8443_v43 = vcombine.high %v794_v13, %v798_v37 }
 0x2ea   : > { %7310 = vmatprep.mubr.bf16.mxu0 %v9524_v48  ;;  %7351 = vmatprep.mubr.bf16.mxu1 %v9529_v51  ;;  %v926_v39 = vld [vmem:[%s9358_s25 + $0x1470] sm:$0xff] }
 0x2eb   : > { %v6988_v63 = vpop.f32.mrf.mxu0  ;;  %v7029_v61 = vpop.f32.mrf.mxu1  ;;  %v8571_v44 = vcombine.high %v922_v38, %v926_v39  ;;  %v8570_v60 = vcombine.low %v922_v38, %v926_v39  ;;  %v910_v3 = vld [vmem:[%s9358_s25 + $0x13f0] sm:$0xff] }
 0x2ec   : > { %7281 = vmatpush1.bf16.msra.mxu0 %v8482_v49  ;;  %7322 = vmatpush1.bf16.msra.mxu1 %v8610_v54  ;;  %v790_v49 = vld [vmem:[%s9358_s25 + $0x1030] sm:$0xff]  ;;  %v8554_v23 = vcombine.low %v906_v0, %v910_v3 }
 0x2ed   : > { %v6989_v5 = vpop.f32.mrf.mxu0  ;;  %7282 = vmatprep.subr.bf16.mxu0 %v8475_v56  ;;  %v7030_v10 = vpop.f32.mrf.mxu1  ;;  %7323 = vmatprep.subr.bf16.mxu1 %v8603_v57  ;;  %v914_v54 = vld [vmem:[%s9358_s25 + $0x1410] sm:$0xff]  ;;  %v8442_v57 = vcombine.low %v794_v13, %v798_v37  ;;  %v8435_v62 = vcombine.high %v786_v45, %v790_v49 }
 0x2ee   : > { %v918_v56 = vld [vmem:[%s9358_s25 + $0x1430] sm:$0xff]  ;;  %v8434_v5 = vcombine.low %v786_v45, %v790_v49 }
 0x2ef   : > { %v8563_v63 = vcombine.high %v914_v54, %v918_v56  ;;  %v1034_v61 = vld [vmem:[%s9358_s25 + $0x17d0] sm:$0xff] }
 0x2f0   : > { %7283 = vmatpush1.bf16.msra.mxu0 %v8474_v4  ;;  %7324 = vmatpush1.bf16.msra.mxu1 %v8602_v7  ;;  %v1038_v4 = vld [vmem:[%s9358_s25 + $0x17f0] sm:$0xff]  ;;  %v8562_v7 = vcombine.low %v914_v54, %v918_v56 }
 0x2f1   : > { %7284 = vmatprep.subr.bf16.mxu0 %v8467_v8  ;;  %7325 = vmatprep.subr.bf16.mxu1 %v8595_v11  ;;  %v8555_v8 = vcombine.high %v906_v0, %v910_v3  ;;  %v8683_v10 = vcombine.high %v1034_v61, %v1038_v4  ;;  %v898_v11 = vld [vmem:[%s9358_s25 + $0x1390] sm:$0xff] }
 0x2f2   : > { %v902_v15 = vld [vmem:[%s9358_s25 + $0x13b0] sm:$0xff] }
 0x2f3   : > { %v1026_v21 = vld [vmem:[%s9358_s25 + $0x1790] sm:$0xff]  ;;  %v8546_v25 = vcombine.low %v898_v11, %v902_v15 }
 0x2f4   : > { %7285 = vmatpush1.bf16.msra.mxu0 %v8466_v24  ;;  %7326 = vmatpush1.bf16.msra.mxu1 %v8594_v19  ;;  %v1030_v22 = vld [vmem:[%s9358_s25 + $0x17b0] sm:$0xff]  ;;  %v8682_v24 = vcombine.low %v1034_v61, %v1038_v4  ;;  %v8547_v19 = vcombine.high %v898_v11, %v902_v15 }
 0x2f5   : > { %7286 = vmatprep.subr.bf16.mxu0 %v8459_v9  ;;  %7327 = vmatprep.subr.bf16.mxu1 %v8587_v27  ;;  %v8675_v9 = vcombine.high %v1026_v21, %v1030_v22  ;;  %v890_v27 = vld [vmem:[%s9358_s25 + $0x1350] sm:$0xff] }
 0x2f6   : > { %v894_v29 = vld [vmem:[%s9358_s25 + $0x1370] sm:$0xff] }
 0x2f7   : > { %v1018_v30 = vld [vmem:[%s9358_s25 + $0x1750] sm:$0xff]  ;;  %v8538_v39 = vcombine.low %v890_v27, %v894_v29 }
 0x2f8   : > { %7287 = vmatpush1.bf16.msra.mxu0 %v8458_v34  ;;  %7328 = vmatpush1.bf16.msra.mxu1 %v8586_v32  ;;  %v1022_v33 = vld [vmem:[%s9358_s25 + $0x1770] sm:$0xff]  ;;  %v8674_v34 = vcombine.low %v1026_v21, %v1030_v22  ;;  %v8539_v32 = vcombine.high %v890_v27, %v894_v29 }
 0x2f9   : > { %7288 = vmatprep.subr.bf16.mxu0 %v8451_v17  ;;  %7329 = vmatprep.subr.bf16.mxu1 %v8579_v35  ;;  %v8667_v17 = vcombine.high %v1018_v30, %v1022_v33  ;;  %v882_v35 = vld [vmem:[%s9358_s25 + $0x1310] sm:$0xff] }
 0x2fa   : > { %v886_v13 = vld [vmem:[%s9358_s25 + $0x1330] sm:$0xff] }
 0x2fb   : > { %v1010_v37 = vld [vmem:[%s9358_s25 + $0x1710] sm:$0xff]  ;;  %v8530_v56 = vcombine.low %v882_v35, %v886_v13 }
 0x2fc   : > { %7289 = vmatpush1.bf16.msra.mxu0 %v8450_v41  ;;  %7330 = vmatpush1.bf16.msra.mxu1 %v8578_v42  ;;  %v1014_v38 = vld [vmem:[%s9358_s25 + $0x1730] sm:$0xff]  ;;  %v8666_v41 = vcombine.low %v1018_v30, %v1022_v33  ;;  %v8531_v42 = vcombine.high %v882_v35, %v886_v13 }
 0x2fd   : > { %7290 = vmatprep.subr.bf16.mxu0 %v8443_v43  ;;  %7331 = vmatprep.subr.bf16.mxu1 %v8571_v44  ;;  %v8659_v43 = vcombine.high %v1010_v37, %v1014_v38  ;;  %v874_v44 = vld [vmem:[%s9358_s25 + $0x12d0] sm:$0xff] }
 0x2fe   : > { %v878_v45 = vld [vmem:[%s9358_s25 + $0x12f0] sm:$0xff] }
 0x2ff   : > { %v1002_v49 = vld [vmem:[%s9358_s25 + $0x16d0] sm:$0xff]  ;;  %v8522_v4 = vcombine.low %v874_v44, %v878_v45 }
 0x300   : > { %7291 = vmatpush1.bf16.msra.mxu0 %v8442_v57  ;;  %7332 = vmatpush1.bf16.msra.mxu1 %v8570_v60  ;;  %v1006_v54 = vld [vmem:[%s9358_s25 + $0x16f0] sm:$0xff]  ;;  %v8658_v57 = vcombine.low %v1010_v37, %v1014_v38  ;;  %v8523_v60 = vcombine.high %v874_v44, %v878_v45 }
 0x301   : > { %7292 = vmatprep.subr.bf16.mxu0 %v8435_v62  ;;  %7333 = vmatprep.subr.bf16.mxu1 %v8563_v63  ;;  %v8651_v62 = vcombine.high %v1002_v49, %v1006_v54  ;;  %v866_v63 = vld [vmem:[%s9358_s25 + $0x1290] sm:$0xff] }
 0x302   : > { %v870_v0 = vld [vmem:[%s9358_s25 + $0x12b0] sm:$0xff] }
 0x303   : > { %v994_v3 = vld [vmem:[%s9358_s25 + $0x1690] sm:$0xff]  ;;  %v8514_v22 = vcombine.low %v866_v63, %v870_v0 }
 0x304   : > { %7293 = vmatpush1.bf16.msra.mxu0 %v8434_v5  ;;  %7334 = vmatpush1.bf16.msra.mxu1 %v8562_v7  ;;  %v998_v61 = vld [vmem:[%s9358_s25 + $0x16b0] sm:$0xff]  ;;  %v8650_v5 = vcombine.low %v1002_v49, %v1006_v54  ;;  %v8515_v7 = vcombine.high %v866_v63, %v870_v0 }
 0x305   : > { %7294 = vmatprep.subr.bf16.mxu0 %v8555_v8  ;;  %7335 = vmatprep.subr.bf16.mxu1 %v8683_v10  ;;  %v8643_v8 = vcombine.high %v994_v3, %v998_v61  ;;  %v858_v10 = vld [vmem:[%s9358_s25 + $0x1250] sm:$0xff] }
 0x306   : > { %v862_v11 = vld [vmem:[%s9358_s25 + $0x1270] sm:$0xff] }
 0x307   : > { %v986_v15 = vld [vmem:[%s9358_s25 + $0x1650] sm:$0xff]  ;;  %v8506_v33 = vcombine.low %v858_v10, %v862_v11 }
 0x308   : > { %7295 = vmatpush2.bf16.msra.mxu0 %v8554_v23  ;;  %7336 = vmatpush2.bf16.msra.mxu1 %v8682_v24  ;;  %v990_v21 = vld [vmem:[%s9358_s25 + $0x1670] sm:$0xff]  ;;  %v8642_v23 = vcombine.low %v994_v3, %v998_v61  ;;  %v8507_v24 = vcombine.high %v858_v10, %v862_v11 }
 0x309   : > { %7296 = vmatprep.subr.bf16.mxu0 %v8547_v19  ;;  %7337 = vmatprep.subr.bf16.mxu1 %v8675_v9  ;;  %v8635_v19 = vcombine.high %v986_v15, %v990_v21  ;;  %v850_v9 = vld [vmem:[%s9358_s25 + $0x1210] sm:$0xff] }
 0x30a   : > { %v854_v27 = vld [vmem:[%s9358_s25 + $0x1230] sm:$0xff] }
 0x30b   : > { %v978_v29 = vld [vmem:[%s9358_s25 + $0x1610] sm:$0xff]  ;;  %v8498_v38 = vcombine.low %v850_v9, %v854_v27 }
 0x30c   : > { %7297 = vmatpush2.bf16.msra.mxu0 %v8546_v25  ;;  %7338 = vmatpush2.bf16.msra.mxu1 %v8674_v34  ;;  %v982_v30 = vld [vmem:[%s9358_s25 + $0x1630] sm:$0xff]  ;;  %v8634_v25 = vcombine.low %v986_v15, %v990_v21  ;;  %v8499_v34 = vcombine.high %v850_v9, %v854_v27 }
 0x30d   : > { %7298 = vmatprep.subr.bf16.mxu0 %v8539_v32  ;;  %7339 = vmatprep.subr.bf16.mxu1 %v8667_v17  ;;  %v8627_v32 = vcombine.high %v978_v29, %v982_v30  ;;  %v1098_v17 = vld [vmem:[%s9358_s25 + $0x19d0] sm:$0xff] }
 0x30e   : > { %v1102_v35 = vld [vmem:[%s9358_s25 + $0x19f0] sm:$0xff] }
 0x30f   : > { %v1226_v13 = vld [vmem:[%s9358_s25 + $0x1dd0] sm:$0xff] }
 0x310   : > { %7299 = vmatpush2.bf16.msra.mxu0 %v8538_v39  ;;  %7340 = vmatpush2.bf16.msra.mxu1 %v8666_v41  ;;  %v1230_v37 = vld [vmem:[%s9358_s25 + $0x1df0] sm:$0xff]  ;;  %v8626_v39 = vcombine.low %v978_v29, %v982_v30  ;;  %v8747_v41 = vcombine.high %v1098_v17, %v1102_v35 }
 0x311   : > { %7300 = vmatprep.subr.bf16.mxu0 %v8531_v42  ;;  %7341 = vmatprep.subr.bf16.mxu1 %v8659_v43  ;;  %v6985_v42 = vadd.f32 %v10136_v12, %v10067_v53  ;;  %v8875_v43 = vcombine.high %v1226_v13, %v1230_v37  ;;  %v1090_v44 = vld [vmem:[%s9358_s25 + $0x1990] sm:$0xff] }
 0x312   : > { %v1094_v45 = vld [vmem:[%s9358_s25 + $0x19b0] sm:$0xff] }
 0x313   : > { %v1218_v49 = vld [vmem:[%s9358_s25 + $0x1d90] sm:$0xff]  ;;  %v7026_v53 = vadd.f32 %v10141_v47, %v6985_v42  ;;  %v8738_v47 = vcombine.low %v1090_v44, %v1094_v45 }
 0x314   : > { %7301 = vmatpush2.bf16.msra.mxu0 %v8530_v56  ;;  %7342 = vmatpush2.bf16.msra.mxu1 %v8658_v57  ;;  %v1222_v54 = vld [vmem:[%s9358_s25 + $0x1db0] sm:$0xff]  ;;  %v6987_v56 = vadd.f32 %v10144_v52, %v10076_v1  ;;  %v8746_v57 = vcombine.low %v1098_v17, %v1102_v35 }
 0x315   : > { %7302 = vmatprep.subr.bf16.mxu0 %v8523_v60  ;;  %7343 = vmatprep.subr.bf16.mxu1 %v8651_v62  ;;  %v8874_v60 = vcombine.low %v1226_v13, %v1230_v37  ;;  %v8739_v62 = vcombine.high %v1090_v44, %v1094_v45  ;;  %v8867_v12 = vcombine.high %v1218_v49, %v1222_v54  ;;  %v1082_v63 = vld [vmem:[%s9358_s25 + $0x1950] sm:$0xff] }
 0x316   : > { %v1086_v0 = vld [vmem:[%s9358_s25 + $0x1970] sm:$0xff] }
 0x317   : > { %v1210_v61 = vld [vmem:[%s9358_s25 + $0x1d50] sm:$0xff]  ;;  %v8731_v10 = vcombine.high %v1082_v63, %v1086_v0 }
 0x318   : > { %7303 = vmatpush2.bf16.msra.mxu0 %v8522_v4  ;;  %7344 = vmatpush2.bf16.msra.mxu1 %v8650_v5  ;;  %v1214_v4 = vld [vmem:[%s9358_s25 + $0x1d70] sm:$0xff]  ;;  %v7028_v5 = vadd.f32 %v10146_v46, %v6987_v56 }
 0x319   : > { %7304 = vmatprep.subr.bf16.mxu0 %v8515_v7  ;;  %7345 = vmatprep.subr.bf16.mxu1 %v8643_v8  ;;  %v8866_v8 = vcombine.low %v1218_v49, %v1222_v54  ;;  %v8859_v46 = vcombine.high %v1210_v61, %v1214_v4  ;;  %v1206_v9 = vld [vmem:[%s9358_s25 + $0x1d30] sm:$0xff] }
 0x31a   : > { %v1066_v37 = vld [vmem:[%s9358_s25 + $0x18d0] sm:$0xff] }
 0x31b   : > { %v1058_v49 = vld [vmem:[%s9358_s25 + $0x1890] sm:$0xff] }
 0x31c   : > { %7305 = vmatpush2.bf16.msra.mxu0 %v8514_v22  ;;  %7346 = vmatpush2.bf16.msra.mxu1 %v8642_v23  ;;  %v1074_v22 = vld [vmem:[%s9358_s25 + $0x1910] sm:$0xff] }
 0x31d   : > { %7306 = vmatprep.subr.bf16.mxu0 %v8507_v24  ;;  %7347 = vmatprep.subr.bf16.mxu1 %v8635_v19  ;;  %v1078_v23 = vld [vmem:[%s9358_s25 + $0x1930] sm:$0xff] }
 0x31e   : > { %v1202_v19 = vld [vmem:[%s9358_s25 + $0x1d10] sm:$0xff]  ;;  %v8722_v42 = vcombine.low %v1074_v22, %v1078_v23 }
 0x31f   : > { %v8851_v13 = vcombine.high %v1202_v19, %v1206_v9  ;;  %v1062_v54 = vld [vmem:[%s9358_s25 + $0x18b0] sm:$0xff] }
 0x320   : > { %7307 = vmatpush2.bf16.msra.mxu0 %v8506_v33  ;;  %7348 = vmatpush2.bf16.msra.mxu1 %v8634_v25  ;;  %v8730_v33 = vcombine.low %v1082_v63, %v1086_v0  ;;  %v1186_v56 = vld [vmem:[%s9358_s25 + $0x1c90] sm:$0xff] }
 0x321   : > { %7308 = vmatprep.subr.bf16.mxu0 %v8499_v34  ;;  %7349 = vmatprep.subr.bf16.mxu1 %v8627_v32  ;;  %v8858_v34 = vcombine.low %v1210_v61, %v1214_v4  ;;  %v8723_v32 = vcombine.high %v1074_v22, %v1078_v23  ;;  %v1050_v63 = vld [vmem:[%s9358_s25 + $0x1850] sm:$0xff]  ;;  %v8706_v4 = vcombine.low %v1058_v49, %v1062_v54 }
 0x322   : > { %v1054_v0 = vld [vmem:[%s9358_s25 + $0x1870] sm:$0xff] }
 0x323   : > { %v1182_v61 = vld [vmem:[%s9358_s25 + $0x1c70] sm:$0xff] }
 0x324   : > { %7309 = vmatpush2.bf16.msra.mxu0 %v8498_v38  ;;  %7350 = vmatpush2.bf16.msra.mxu1 %v8626_v39  ;;  %v1070_v38 = vld [vmem:[%s9358_s25 + $0x18f0] sm:$0xff] }
 0x325   : > { %7360 = vmatprep.subr.bf16.mxu0 %v8747_v41  ;;  %7401 = vmatprep.subr.bf16.mxu1 %v8875_v43  ;;  %v1194_v39 = vld [vmem:[%s9358_s25 + $0x1cd0] sm:$0xff]  ;;  %v8850_v43 = vcombine.low %v1202_v19, %v1206_v9  ;;  %v8715_v44 = vcombine.high %v1066_v37, %v1070_v38 }
 0x326   : > { %v1198_v41 = vld [vmem:[%s9358_s25 + $0x1cf0] sm:$0xff] }
 0x327   : > { %v7066_v3 = vpop.f32.mrf.mxu0  ;;  %7311 = vmatmul.mubr.bf16.vlgmr.msra.gmra.mxu0 %v9592_v2  ;;  %v7107_v52 = vpop.f32.mrf.mxu1  ;;  %7352 = vmatmul.mubr.bf16.vlgmr.msra.gmra.mxu1 %v9596_v6  ;;  %v8843_v45 = vcombine.high %v1194_v39, %v1198_v41  ;;  %v1162_v22 = vld [vmem:[%s9358_s25 + $0x1bd0] sm:$0xff] }
 0x328   : > { %v7067_v1 = vadd.f32 %v7066_v3, %v7026_v53  ;;  %7361 = vmatpush1.bf16.msra.mxu0 %v8746_v57  ;;  %7402 = vmatpush1.bf16.msra.mxu1 %v8874_v60  ;;  %v1190_v57 = vld [vmem:[%s9358_s25 + $0x1cb0] sm:$0xff]  ;;  %v8714_v60 = vcombine.low %v1066_v37, %v1070_v38  ;;  %v8707_v53 = vcombine.high %v1058_v49, %v1062_v54 }
 0x329   : > { %v7068_v7 = vpop.f32.mrf.mxu0  ;;  %7362 = vmatprep.subr.bf16.mxu0 %v8739_v62  ;;  %v7109_v21 = vpop.f32.mrf.mxu1  ;;  %7403 = vmatprep.subr.bf16.mxu1 %v8867_v12  ;;  %v8842_v62 = vcombine.low %v1194_v39, %v1198_v41  ;;  %v8835_v12 = vcombine.high %v1186_v56, %v1190_v57  ;;  %v1178_v3 = vld [vmem:[%s9358_s25 + $0x1c50] sm:$0xff] }
 0x32a   : > { %v7108_v11 = vadd.f32 %v7107_v52, %v7067_v1  ;;  %v7069_v15 = vadd.f32 %v7068_v7, %v7028_v5  ;;  %7392 = vmatprep.mubr.bf16.mxu0 %v9600_v14  ;;  %7433 = vmatprep.mubr.bf16.mxu1 %v9605_v18  ;;  %v8834_v5 = vcombine.low %v1186_v56, %v1190_v57  ;;  %v1046_v7 = vld [vmem:[%s9358_s25 + $0x1830] sm:$0xff] }
 0x32b   : > { %v7070_v24 = vpop.f32.mrf.mxu0  ;;  %v7111_v30 = vpop.f32.mrf.mxu1  ;;  %v8699_v1 = vcombine.high %v1050_v63, %v1054_v0  ;;  %v8827_v52 = vcombine.high %v1178_v3, %v1182_v61  ;;  %v1166_v23 = vld [vmem:[%s9358_s25 + $0x1bf0] sm:$0xff] }
 0x32c   : > { %v7772_v27 = vmax.f32 %v7108_v11, 0.0  ;;  %v7110_v29 = vadd.f32 %v7109_v21, %v7069_v15  ;;  %7363 = vmatpush1.bf16.msra.mxu0 %v8738_v47  ;;  %7404 = vmatpush1.bf16.msra.mxu1 %v8866_v8  ;;  %v1042_v47 = vld [vmem:[%s9358_s25 + $0x1810] sm:$0xff]  ;;  %v8698_v11 = vcombine.low %v1050_v63, %v1054_v0  ;;  %v8826_v15 = vcombine.low %v1178_v3, %v1182_v61 }
 0x32d   : > { %v7071_v25 = vpop.f32.mrf.mxu0  ;;  %7364 = vmatprep.subr.bf16.mxu0 %v8731_v10  ;;  %v7112_v35 = vpop.f32.mrf.mxu1  ;;  %7405 = vmatprep.subr.bf16.mxu1 %v8859_v46  ;;  %v1170_v8 = vld [vmem:[%s9358_s25 + $0x1c10] sm:$0xff]  ;;  %v8691_v21 = vcombine.high %v1042_v47, %v1046_v7  ;;  %v8690_v9 = vcombine.low %v1042_v47, %v1046_v7 }
 0x32e   : > { %7780 = vst [vmem:[%s9925_s10 + $0x10] sm:$0xff] %v7772_v27  ;;  %v7773_v17 = vmax.f32 %v7110_v29, 0.0  ;;  %v1174_v10 = vld [vmem:[%s9358_s25 + $0x1c30] sm:$0xff]  ;;  %v8811_v29 = vcombine.high %v1162_v22, %v1166_v23 }
 0x32f   : > { %v8819_v46 = vcombine.high %v1170_v8, %v1174_v10  ;;  %v1290_v24 = vld [vmem:[%s9358_s25 + $0x1fd0] sm:$0xff]  ;;  %v8818_v27 = vcombine.low %v1170_v8, %v1174_v10 }
 0x330   : > { %7781 = vst [vmem:[%s9925_s10 + $0x18] sm:$0xff] %v7773_v17  ;;  %7365 = vmatpush1.bf16.msra.mxu0 %v8730_v33  ;;  %7406 = vmatpush1.bf16.msra.mxu1 %v8858_v34  ;;  %v1294_v19 = vld [vmem:[%s9358_s25 + $0x1ff0] sm:$0xff]  ;;  %v8810_v17 = vcombine.low %v1162_v22, %v1166_v23 }
 0x331   : > { %7366 = vmatprep.subr.bf16.mxu0 %v8723_v32  ;;  %7407 = vmatprep.subr.bf16.mxu1 %v8851_v13  ;;  %v8939_v30 = vcombine.high %v1290_v24, %v1294_v19  ;;  %v1154_v33 = vld [vmem:[%s9358_s25 + $0x1b90] sm:$0xff]  ;;  %v8938_v35 = vcombine.low %v1290_v24, %v1294_v19 }
 0x332   : > { %v1158_v25 = vld [vmem:[%s9358_s25 + $0x1bb0] sm:$0xff] }
 0x333   : > { %v1282_v34 = vld [vmem:[%s9358_s25 + $0x1f90] sm:$0xff]  ;;  %v8803_v13 = vcombine.high %v1154_v33, %v1158_v25 }
 0x334   : > { %7367 = vmatpush1.bf16.msra.mxu0 %v8722_v42  ;;  %7408 = vmatpush1.bf16.msra.mxu1 %v8850_v43  ;;  %v1286_v32 = vld [vmem:[%s9358_s25 + $0x1fb0] sm:$0xff]  ;;  %v8802_v43 = vcombine.low %v1154_v33, %v1158_v25 }
 0x335   : > { %7368 = vmatprep.subr.bf16.mxu0 %v8715_v44  ;;  %7409 = vmatprep.subr.bf16.mxu1 %v8843_v45  ;;  %v8931_v37 = vcombine.high %v1282_v34, %v1286_v32  ;;  %v1146_v38 = vld [vmem:[%s9358_s25 + $0x1b50] sm:$0xff]  ;;  %v8930_v44 = vcombine.low %v1282_v34, %v1286_v32 }
 0x336   : > { %v1150_v39 = vld [vmem:[%s9358_s25 + $0x1b70] sm:$0xff] }
 0x337   : > { %v1274_v41 = vld [vmem:[%s9358_s25 + $0x1f50] sm:$0xff]  ;;  %v8795_v45 = vcombine.high %v1146_v38, %v1150_v39 }
 0x338   : > { %7369 = vmatpush1.bf16.msra.mxu0 %v8714_v60  ;;  %7410 = vmatpush1.bf16.msra.mxu1 %v8842_v62  ;;  %v1278_v42 = vld [vmem:[%s9358_s25 + $0x1f70] sm:$0xff]  ;;  %v8794_v62 = vcombine.low %v1146_v38, %v1150_v39  ;;  %v331_v39 = vld [vmem:[%s9358_s25 + $0x1d8] sm:$0xff] }
 0x339   : > { %7370 = vmatprep.subr.bf16.mxu0 %v8707_v53  ;;  %7411 = vmatprep.subr.bf16.mxu1 %v8835_v12  ;;  %v8923_v49 = vcombine.high %v1274_v41, %v1278_v42  ;;  %v1138_v54 = vld [vmem:[%s9358_s25 + $0x1b10] sm:$0xff]  ;;  %v8922_v53 = vcombine.low %v1274_v41, %v1278_v42  ;;  %v335_v41 = vld [vmem:[%s9358_s25 + $0x1f8] sm:$0xff] }
 0x33a   : > { %v1142_v56 = vld [vmem:[%s9358_s25 + $0x1b30] sm:$0xff]  ;;  %v459_v42 = vld [vmem:[%s9358_s25 + $0x5d8] sm:$0xff] }
 0x33b   : > { %v1266_v57 = vld [vmem:[%s9358_s25 + $0x1f10] sm:$0xff]  ;;  %v8787_v12 = vcombine.high %v1138_v54, %v1142_v56 }
 0x33c   : > { %7371 = vmatpush1.bf16.msra.mxu0 %v8706_v4  ;;  %7412 = vmatpush1.bf16.msra.mxu1 %v8834_v5  ;;  %v1270_v60 = vld [vmem:[%s9358_s25 + $0x1f30] sm:$0xff]  ;;  %v8786_v5 = vcombine.low %v1138_v54, %v1142_v56  ;;  %v7981_v54 = vcombine.high %v331_v39, %v335_v41 }
 0x33d   : > { %7372 = vmatprep.subr.bf16.mxu0 %v8699_v1  ;;  %7413 = vmatprep.subr.bf16.mxu1 %v8827_v52  ;;  %v8915_v63 = vcombine.high %v1266_v57, %v1270_v60  ;;  %v1130_v0 = vld [vmem:[%s9358_s25 + $0x1ad0] sm:$0xff]  ;;  %v8914_v1 = vcombine.low %v1266_v57, %v1270_v60  ;;  %v1320_v57 = vsub.s32 5, %v9663_v26  ;;  %v323_v60 = vld [vmem:[%s9358_s25 + $0x198] sm:$0xff] }
 0x33e   : > { %v1134_v3 = vld [vmem:[%s9358_s25 + $0x1af0] sm:$0xff] }
 0x33f   : > { %v1258_v61 = vld [vmem:[%s9358_s25 + $0x1ed0] sm:$0xff]  ;;  %v8779_v52 = vcombine.high %v1130_v0, %v1134_v3 }
 0x340   : > { %7373 = vmatpush1.bf16.msra.mxu0 %v8698_v11  ;;  %7414 = vmatpush1.bf16.msra.mxu1 %v8826_v15  ;;  %v1262_v4 = vld [vmem:[%s9358_s25 + $0x1ef0] sm:$0xff]  ;;  %v8778_v15 = vcombine.low %v1130_v0, %v1134_v3  ;;  %v7980_v3 = vcombine.low %v331_v39, %v335_v41  ;;  %v299_v41 = vld [vmem:[%s9358_s25 + $0xd8] sm:$0xff] }
 0x341   : > { %7374 = vmatprep.subr.bf16.mxu0 %v8691_v21  ;;  %7415 = vmatprep.subr.bf16.mxu1 %v8819_v46  ;;  %v8907_v47 = vcombine.high %v1258_v61, %v1262_v4  ;;  %v1122_v7 = vld [vmem:[%s9358_s25 + $0x1a90] sm:$0xff]  ;;  %v8906_v21 = vcombine.low %v1258_v61, %v1262_v4 }
 0x342   : > { %v1126_v8 = vld [vmem:[%s9358_s25 + $0x1ab0] sm:$0xff] }
 0x343   : > { %v1250_v10 = vld [vmem:[%s9358_s25 + $0x1e90] sm:$0xff]  ;;  %v8771_v46 = vcombine.high %v1122_v7, %v1126_v8 }
 0x344   : > { %7375 = vmatpush1.bf16.msra.mxu0 %v8690_v9  ;;  %7416 = vmatpush1.bf16.msra.mxu1 %v8818_v27  ;;  %v1254_v11 = vld [vmem:[%s9358_s25 + $0x1eb0] sm:$0xff]  ;;  %v8770_v27 = vcombine.low %v1122_v7, %v1126_v8  ;;  %v443_v8 = vld [vmem:[%s9358_s25 + $0x558] sm:$0xff] }
 0x345   : > { %7376 = vmatprep.subr.bf16.mxu0 %v8811_v29  ;;  %7417 = vmatprep.subr.bf16.mxu1 %v8939_v30  ;;  %v8899_v22 = vcombine.high %v1250_v10, %v1254_v11  ;;  %v1114_v23 = vld [vmem:[%s9358_s25 + $0x1a50] sm:$0xff]  ;;  %v8898_v29 = vcombine.low %v1250_v10, %v1254_v11  ;;  %v447_v10 = vld [vmem:[%s9358_s25 + $0x578] sm:$0xff] }
 0x346   : > { %v1118_v24 = vld [vmem:[%s9358_s25 + $0x1a70] sm:$0xff] }
 0x347   : > { %v1242_v19 = vld [vmem:[%s9358_s25 + $0x1e50] sm:$0xff]  ;;  %v8763_v30 = vcombine.high %v1114_v23, %v1118_v24 }
 0x348   : > { %7377 = vmatpush2.bf16.msra.mxu0 %v8810_v17  ;;  %7418 = vmatpush2.bf16.msra.mxu1 %v8938_v35  ;;  %v1246_v9 = vld [vmem:[%s9358_s25 + $0x1e70] sm:$0xff]  ;;  %v8762_v35 = vcombine.low %v1114_v23, %v1118_v24 }
 0x349   : > { %7378 = vmatprep.subr.bf16.mxu0 %v8803_v13  ;;  %7419 = vmatprep.subr.bf16.mxu1 %v8931_v37  ;;  %v8891_v33 = vcombine.high %v1242_v19, %v1246_v9  ;;  %v1106_v25 = vld [vmem:[%s9358_s25 + $0x1a10] sm:$0xff]  ;;  %v8890_v13 = vcombine.low %v1242_v19, %v1246_v9 }
 0x34a   : > { %v1110_v34 = vld [vmem:[%s9358_s25 + $0x1a30] sm:$0xff] }
 0x34b   : > { %v1234_v32 = vld [vmem:[%s9358_s25 + $0x1e10] sm:$0xff]  ;;  %v8755_v37 = vcombine.high %v1106_v25, %v1110_v34 }
 0x34c   : > { %7379 = vmatpush2.bf16.msra.mxu0 %v8802_v43  ;;  %7420 = vmatpush2.bf16.msra.mxu1 %v8930_v44  ;;  %v1238_v17 = vld [vmem:[%s9358_s25 + $0x1e30] sm:$0xff]  ;;  %v463_v43 = vld [vmem:[%s9358_s25 + $0x5f8] sm:$0xff]  ;;  %v8754_v44 = vcombine.low %v1106_v25, %v1110_v34 }
 0x34d   : > { %7380 = vmatprep.subr.bf16.mxu0 %v8795_v45  ;;  %7421 = vmatprep.subr.bf16.mxu1 %v8923_v49  ;;  %v8883_v38 = vcombine.high %v1234_v32, %v1238_v17  ;;  %v1316_v45 = vsub.s32 4, %v9663_v26  ;;  %v8882_v49 = vcombine.low %v1234_v32, %v1238_v17  ;;  %v8109_v56 = vcombine.high %v459_v42, %v463_v43  ;;  %v435_v25 = vld [vmem:[%s9358_s25 + $0x518] sm:$0xff] }
 0x34e   : > { %v8108_v61 = vcombine.low %v459_v42, %v463_v43  ;;  %v439_v34 = vld [vmem:[%s9358_s25 + $0x538] sm:$0xff] }
 0x34f   : > { %v8085_v39 = vcombine.high %v435_v25, %v439_v34  ;;  %v427_v42 = vld [vmem:[%s9358_s25 + $0x4d8] sm:$0xff] }
 0x350   : > { %7381 = vmatpush2.bf16.msra.mxu0 %v8794_v62  ;;  %7422 = vmatpush2.bf16.msra.mxu1 %v8922_v53  ;;  %v327_v62 = vld [vmem:[%s9358_s25 + $0x1b8] sm:$0xff] }
 0x351   : > { %7382 = vmatprep.subr.bf16.mxu0 %v8787_v12  ;;  %7423 = vmatprep.subr.bf16.mxu1 %v8915_v63  ;;  %v451_v53 = vld [vmem:[%s9358_s25 + $0x598] sm:$0xff]  ;;  %v9016_v63 = vld [vmem:[%s9670_s27] sm:$0xff]  ;;  %v7973_v4 = vcombine.high %v323_v60, %v327_v62 }
 0x352   : > { %v455_v12 = vld [vmem:[%s9358_s25 + $0x5b8] sm:$0xff]  ;;  %v1317_v0 = vrot.slane %v9016_v63, %v1316_v45  ;;  %v8084_v45 = vcombine.low %v435_v25, %v439_v34 }
 0x353   : > { %v431_v43 = vld [vmem:[%s9358_s25 + $0x4f8] sm:$0xff] }
 0x354   : > { %7383 = vmatpush2.bf16.msra.mxu0 %v8786_v5  ;;  %7424 = vmatpush2.bf16.msra.mxu1 %v8914_v1  ;;  %v1321_v5 = vrot.slane %v9016_v63, %v1320_v57  ;;  %v8101_v1 = vcombine.high %v451_v53, %v455_v12  ;;  %v295_v57 = vld [vmem:[%s9358_s25 + $0xb8] sm:$0xff] }
 0x355   : > { %7384 = vmatprep.subr.bf16.mxu0 %v8779_v52  ;;  %7425 = vmatprep.subr.bf16.mxu1 %v8907_v47  ;;  %v315_v52 = vld [vmem:[%s9358_s25 + $0x158] sm:$0xff] }
 0x356   : > { %v319_v47 = vld [vmem:[%s9358_s25 + $0x178] sm:$0xff] }
 0x357   : > { %v7965_v23 = vcombine.high %v315_v52, %v319_v47 }
 0x358   : > { %7385 = vmatpush2.bf16.msra.mxu0 %v8778_v15  ;;  %7426 = vmatpush2.bf16.msra.mxu1 %v8906_v21  ;;  %v7972_v21 = vcombine.low %v323_v60, %v327_v62  ;;  %v419_v60 = vld [vmem:[%s9358_s25 + $0x498] sm:$0xff] }
 0x359   : > { %7386 = vmatprep.subr.bf16.mxu0 %v8771_v46  ;;  %7427 = vmatprep.subr.bf16.mxu1 %v8899_v22  ;;  %v8100_v22 = vcombine.low %v451_v53, %v455_v12  ;;  %v423_v62 = vld [vmem:[%s9358_s25 + $0x4b8] sm:$0xff]  ;;  %v8076_v12 = vcombine.low %v427_v42, %v431_v43 }
 0x35c   : > { %7387 = vmatpush2.bf16.msra.mxu0 %v8770_v27  ;;  %7428 = vmatpush2.bf16.msra.mxu1 %v8898_v29  ;;  %v8093_v27 = vcombine.high %v443_v8, %v447_v10  ;;  %v307_v29 = vld [vmem:[%s9358_s25 + $0x118] sm:$0xff] }
 0x35d   : > { %7388 = vmatprep.subr.bf16.mxu0 %v8763_v30  ;;  %7429 = vmatprep.subr.bf16.mxu1 %v8891_v33  ;;  %v311_v30 = vld [vmem:[%s9358_s25 + $0x138] sm:$0xff] }
 0x360   : > { %7389 = vmatpush2.bf16.msra.mxu0 %v8762_v35  ;;  %7430 = vmatpush2.bf16.msra.mxu1 %v8890_v13  ;;  %v7964_v35 = vcombine.low %v315_v52, %v319_v47  ;;  %v8068_v52 = vcombine.low %v419_v60, %v423_v62 }
 0x361   : > { %7390 = vmatprep.subr.bf16.mxu0 %v8755_v37  ;;  %7431 = vmatprep.subr.bf16.mxu1 %v8883_v38  ;;  %v8092_v37 = vcombine.low %v443_v8, %v447_v10  ;;  %v7957_v38 = vcombine.high %v307_v29, %v311_v30  ;;  %v275_v8 = vld [vmem:[%s9358_s25 + $0x18] sm:$0xff] }
 0x362   : > { %v279_v10 = vld [vmem:[%s9358_s25 + $0x38] sm:$0xff] }
 0x364   : > { %7391 = vmatpush2.bf16.msra.mxu0 %v8754_v44  ;;  %7432 = vmatpush2.bf16.msra.mxu1 %v8882_v49  ;;  %v7956_v44 = vcombine.low %v307_v29, %v311_v30  ;;  %v527_v29 = vld [vmem:[%s9358_s25 + $0x7f8] sm:$0xff]  ;;  %v7924_v30 = vcombine.low %v275_v8, %v279_v10 }
 0x365   : > { %7442 = vmatprep.subr.bf16.mxu0 %v7981_v54  ;;  %7483 = vmatprep.subr.bf16.mxu1 %v8109_v56  ;;  %v8077_v54 = vcombine.high %v427_v42, %v431_v43  ;;  %v291_v56 = vld [vmem:[%s9358_s25 + $0x98] sm:$0xff] }
 0x366   : > { %v7941_v63 = vcombine.high %v291_v56, %v295_v57  ;;  %v383_v42 = vld [vmem:[%s9358_s25 + $0x378] sm:$0xff] }
 0x367   : > { %v7148_v7 = vpop.f32.mrf.mxu0  ;;  %7393 = vmatmul.mubr.bf16.vlgmr.msra.gmra.mxu0 %v9676_v50  ;;  %v7189_v15 = vpop.f32.mrf.mxu1  ;;  %7434 = vmatmul.mubr.bf16.vlgmr.msra.gmra.mxu1 %v9680_v55  ;;  %v507_v43 = vld [vmem:[%s9358_s25 + $0x758] sm:$0xff] }
 0x368   : > { %v7149_v11 = vadd.f32 %v7148_v7, %v1317_v0  ;;  %7443 = vmatpush1.bf16.msra.mxu0 %v7980_v3  ;;  %7484 = vmatpush1.bf16.msra.mxu1 %v8108_v61  ;;  %v8069_v0 = vcombine.high %v419_v60, %v423_v62  ;;  %v283_v3 = vld [vmem:[%s9358_s25 + $0x58] sm:$0xff] }
 0x369   : > { %v7150_v46 = vpop.f32.mrf.mxu0  ;;  %7444 = vmatprep.subr.bf16.mxu0 %v7973_v4  ;;  %v7191_v9 = vpop.f32.mrf.mxu1  ;;  %7485 = vmatprep.subr.bf16.mxu1 %v8101_v1  ;;  %v287_v61 = vld [vmem:[%s9358_s25 + $0x78] sm:$0xff]  ;;  %v7940_v1 = vcombine.low %v291_v56, %v295_v57 }
 0x36a   : > { %v10295_v24 = vadd.f32 %v7189_v15, %v7149_v11  ;;  %v7151_v19 = vadd.f32 %v7150_v46, %v1321_v5  ;;  %7474 = vmatprep.mubr.bf16.mxu0 %v9394_v58  ;;  %7515 = vmatprep.mubr.bf16.mxu1 %v9396_v59  ;;  %v303_v59 = vld [vmem:[%s9358_s25 + $0xf8] sm:$0xff]  ;;  %v7933_v47 = vcombine.high %v283_v3, %v287_v61 }
 0x36b   : > { %v7152_v33 = vpop.f32.mrf.mxu0  ;;  %v7193_v17 = vpop.f32.mrf.mxu1  ;;  %v7949_v49 = vcombine.high %v299_v41, %v303_v59  ;;  %v7948_v53 = vcombine.low %v299_v41, %v303_v59  ;;  %v411_v4 = vld [vmem:[%s9358_s25 + $0x458] sm:$0xff] }
 0x36c   : > { %v10303_v32 = vadd.f32 %v7191_v9, %v7151_v19  ;;  %7445 = vmatpush1.bf16.msra.mxu0 %v7972_v21  ;;  %7486 = vmatpush1.bf16.msra.mxu1 %v8100_v22  ;;  %v415_v5 = vld [vmem:[%s9358_s25 + $0x478] sm:$0xff]  ;;  %v7932_v21 = vcombine.low %v283_v3, %v287_v61  ;;  %v7925_v22 = vcombine.high %v275_v8, %v279_v10 }
 0x36d   : > { %v7153_v13 = vpop.f32.mrf.mxu0  ;;  %7446 = vmatprep.subr.bf16.mxu0 %v7965_v23  ;;  %v7194_v58 = vpop.f32.mrf.mxu1  ;;  %7487 = vmatprep.subr.bf16.mxu1 %v8093_v27  ;;  %v8061_v7 = vcombine.high %v411_v4, %v415_v5  ;;  %v403_v11 = vld [vmem:[%s9358_s25 + $0x418] sm:$0xff]  ;;  %v8060_v46 = vcombine.low %v411_v4, %v415_v5 }
 0x36e   : > { %v407_v15 = vld [vmem:[%s9358_s25 + $0x438] sm:$0xff] }
 0x36f   : > { %v8053_v23 = vcombine.high %v403_v11, %v407_v15  ;;  %v395_v19 = vld [vmem:[%s9358_s25 + $0x3d8] sm:$0xff]  ;;  %v8052_v33 = vcombine.low %v403_v11, %v407_v15 }
 0x370   : > { %7447 = vmatpush1.bf16.msra.mxu0 %v7964_v35  ;;  %7488 = vmatpush1.bf16.msra.mxu1 %v8092_v37  ;;  %v399_v9 = vld [vmem:[%s9358_s25 + $0x3f8] sm:$0xff] }
 0x371   : > { %7448 = vmatprep.subr.bf16.mxu0 %v7957_v38  ;;  %7489 = vmatprep.subr.bf16.mxu1 %v8085_v39  ;;  %v523_v27 = vld [vmem:[%s9358_s25 + $0x7d8] sm:$0xff]  ;;  %v8045_v25 = vcombine.high %v395_v19, %v399_v9  ;;  %v8044_v38 = vcombine.low %v395_v19, %v399_v9 }
 0x372   : > { %v8173_v34 = vcombine.high %v523_v27, %v527_v29  ;;  %v387_v17 = vld [vmem:[%s9358_s25 + $0x398] sm:$0xff]  ;;  %v8172_v58 = vcombine.low %v523_v27, %v527_v29 }
 0x373   : > { %v391_v35 = vld [vmem:[%s9358_s25 + $0x3b8] sm:$0xff] }
 0x374   : > { %7449 = vmatpush1.bf16.msra.mxu0 %v7956_v44  ;;  %7490 = vmatpush1.bf16.msra.mxu1 %v8084_v45  ;;  %v515_v13 = vld [vmem:[%s9358_s25 + $0x798] sm:$0xff]  ;;  %v8037_v39 = vcombine.high %v387_v17, %v391_v35  ;;  %v8036_v45 = vcombine.low %v387_v17, %v391_v35 }
 0x375   : > { %7450 = vmatprep.subr.bf16.mxu0 %v7949_v49  ;;  %7491 = vmatprep.subr.bf16.mxu1 %v8077_v54  ;;  %v519_v37 = vld [vmem:[%s9358_s25 + $0x7b8] sm:$0xff] }
 0x376   : > { %v8165_v41 = vcombine.high %v515_v13, %v519_v37  ;;  %v379_v59 = vld [vmem:[%s9358_s25 + $0x358] sm:$0xff]  ;;  %v8164_v49 = vcombine.low %v515_v13, %v519_v37 }
 0x377   : > { %v511_v44 = vld [vmem:[%s9358_s25 + $0x778] sm:$0xff]  ;;  %v8029_v54 = vcombine.high %v379_v59, %v383_v42 }
 0x378   : > { %7451 = vmatpush1.bf16.msra.mxu0 %v7948_v53  ;;  %7492 = vmatpush1.bf16.msra.mxu1 %v8076_v12  ;;  %v8157_v56 = vcombine.high %v507_v43, %v511_v44  ;;  %v371_v57 = vld [vmem:[%s9358_s25 + $0x318] sm:$0xff]  ;;  %v8028_v12 = vcombine.low %v379_v59, %v383_v42 }
 0x379   : > { %7452 = vmatprep.subr.bf16.mxu0 %v7941_v63  ;;  %7493 = vmatprep.subr.bf16.mxu1 %v8069_v0  ;;  %v375_v60 = vld [vmem:[%s9358_s25 + $0x338] sm:$0xff]  ;;  %v8156_v63 = vcombine.low %v507_v43, %v511_v44 }
 0x37a   : > { %v499_v62 = vld [vmem:[%s9358_s25 + $0x718] sm:$0xff]  ;;  %v8021_v0 = vcombine.high %v371_v57, %v375_v60 }
 0x37b   : > { %v503_v53 = vld [vmem:[%s9358_s25 + $0x738] sm:$0xff] }
 0x37c   : > { %7453 = vmatpush1.bf16.msra.mxu0 %v7940_v1  ;;  %7494 = vmatpush1.bf16.msra.mxu1 %v8068_v52  ;;  %v8149_v3 = vcombine.high %v499_v62, %v503_v53  ;;  %v363_v61 = vld [vmem:[%s9358_s25 + $0x2d8] sm:$0xff]  ;;  %v8020_v52 = vcombine.low %v371_v57, %v375_v60 }
 0x37d   : > { %7454 = vmatprep.subr.bf16.mxu0 %v7933_v47  ;;  %7495 = vmatprep.subr.bf16.mxu1 %v8061_v7  ;;  %v367_v4 = vld [vmem:[%s9358_s25 + $0x2f8] sm:$0xff]  ;;  %v8148_v47 = vcombine.low %v499_v62, %v503_v53 }
 0x37e   : > { %v491_v5 = vld [vmem:[%s9358_s25 + $0x6d8] sm:$0xff]  ;;  %v8013_v7 = vcombine.high %v363_v61, %v367_v4 }
 0x37f   : > { %v495_v1 = vld [vmem:[%s9358_s25 + $0x6f8] sm:$0xff] }
 0x380   : > { %7455 = vmatpush1.bf16.msra.mxu0 %v7932_v21  ;;  %7496 = vmatpush1.bf16.msra.mxu1 %v8060_v46  ;;  %v8141_v8 = vcombine.high %v491_v5, %v495_v1  ;;  %v355_v10 = vld [vmem:[%s9358_s25 + $0x298] sm:$0xff]  ;;  %v8012_v46 = vcombine.low %v363_v61, %v367_v4 }
 0x381   : > { %7456 = vmatprep.subr.bf16.mxu0 %v7925_v22  ;;  %7497 = vmatprep.subr.bf16.mxu1 %v8053_v23  ;;  %v359_v11 = vld [vmem:[%s9358_s25 + $0x2b8] sm:$0xff]  ;;  %v8140_v22 = vcombine.low %v491_v5, %v495_v1 }
 0x382   : > { %v483_v15 = vld [vmem:[%s9358_s25 + $0x698] sm:$0xff]  ;;  %v8005_v23 = vcombine.high %v355_v10, %v359_v11 }
 0x383   : > { %v487_v21 = vld [vmem:[%s9358_s25 + $0x6b8] sm:$0xff] }
 0x384   : > { %7457 = vmatpush1.bf16.msra.mxu0 %v7924_v30  ;;  %7498 = vmatpush1.bf16.msra.mxu1 %v8052_v33  ;;  %v8133_v19 = vcombine.high %v483_v15, %v487_v21  ;;  %v347_v9 = vld [vmem:[%s9358_s25 + $0x258] sm:$0xff]  ;;  %v8004_v33 = vcombine.low %v355_v10, %v359_v11 }
 0x385   : > { %7458 = vmatprep.subr.bf16.mxu0 %v8045_v25  ;;  %7499 = vmatprep.subr.bf16.mxu1 %v8173_v34  ;;  %v351_v27 = vld [vmem:[%s9358_s25 + $0x278] sm:$0xff]  ;;  %v8132_v25 = vcombine.low %v483_v15, %v487_v21 }
 0x386   : > { %v475_v29 = vld [vmem:[%s9358_s25 + $0x658] sm:$0xff]  ;;  %v7997_v34 = vcombine.high %v347_v9, %v351_v27 }
 0x387   : > { %v479_v30 = vld [vmem:[%s9358_s25 + $0x678] sm:$0xff] }
 0x388   : > { %7459 = vmatpush2.bf16.msra.mxu0 %v8044_v38  ;;  %7500 = vmatpush2.bf16.msra.mxu1 %v8172_v58  ;;  %v8125_v17 = vcombine.high %v475_v29, %v479_v30  ;;  %v339_v35 = vld [vmem:[%s9358_s25 + $0x218] sm:$0xff]  ;;  %v7996_v58 = vcombine.low %v347_v9, %v351_v27 }
 0x389   : > { %7460 = vmatprep.subr.bf16.mxu0 %v8037_v39  ;;  %7501 = vmatprep.subr.bf16.mxu1 %v8165_v41  ;;  %v343_v13 = vld [vmem:[%s9358_s25 + $0x238] sm:$0xff]  ;;  %v8124_v39 = vcombine.low %v475_v29, %v479_v30 }
 0x38a   : > { %v467_v37 = vld [vmem:[%s9358_s25 + $0x618] sm:$0xff]  ;;  %v7989_v41 = vcombine.high %v339_v35, %v343_v13 }
 0x38b   : > { %v471_v38 = vld [vmem:[%s9358_s25 + $0x638] sm:$0xff] }
 0x38c   : > { %7461 = vmatpush2.bf16.msra.mxu0 %v8036_v45  ;;  %7502 = vmatpush2.bf16.msra.mxu1 %v8164_v49  ;;  %v8117_v59 = vcombine.high %v467_v37, %v471_v38  ;;  %v587_v42 = vld [vmem:[%s9358_s25 + $0x9d8] sm:$0xff]  ;;  %v7988_v49 = vcombine.low %v339_v35, %v343_v13 }
 0x38d   : > { %7462 = vmatprep.subr.bf16.mxu0 %v8029_v54  ;;  %7503 = vmatprep.subr.bf16.mxu1 %v8157_v56  ;;  %v591_v43 = vld [vmem:[%s9358_s25 + $0x9f8] sm:$0xff]  ;;  %v8116_v54 = vcombine.low %v467_v37, %v471_v38 }
 0x38e   : > { %v715_v44 = vld [vmem:[%s9358_s25 + $0xdd8] sm:$0xff]  ;;  %v8237_v56 = vcombine.high %v587_v42, %v591_v43 }
 0x38f   : > { %v719_v45 = vld [vmem:[%s9358_s25 + $0xdf8] sm:$0xff] }
 0x390   : > { %7463 = vmatpush2.bf16.msra.mxu0 %v8028_v12  ;;  %7504 = vmatpush2.bf16.msra.mxu1 %v8156_v63  ;;  %v8365_v57 = vcombine.high %v715_v44, %v719_v45  ;;  %v579_v60 = vld [vmem:[%s9358_s25 + $0x998] sm:$0xff]  ;;  %v8236_v63 = vcombine.low %v587_v42, %v591_v43 }
 0x391   : > { %7464 = vmatprep.subr.bf16.mxu0 %v8021_v0  ;;  %7505 = vmatprep.subr.bf16.mxu1 %v8149_v3  ;;  %v583_v62 = vld [vmem:[%s9358_s25 + $0x9b8] sm:$0xff]  ;;  %v8364_v0 = vcombine.low %v715_v44, %v719_v45 }
 0x392   : > { %v707_v53 = vld [vmem:[%s9358_s25 + $0xd98] sm:$0xff]  ;;  %v8229_v3 = vcombine.high %v579_v60, %v583_v62  ;;  %v8228_v10 = vcombine.low %v579_v60, %v583_v62 }
 0x393   : > { %v711_v12 = vld [vmem:[%s9358_s25 + $0xdb8] sm:$0xff] }
 0x394   : > { %7465 = vmatpush2.bf16.msra.mxu0 %v8020_v52  ;;  %7506 = vmatpush2.bf16.msra.mxu1 %v8148_v47  ;;  %v8357_v61 = vcombine.high %v707_v53, %v711_v12  ;;  %v571_v4 = vld [vmem:[%s9358_s25 + $0x958] sm:$0xff]  ;;  %v8356_v15 = vcombine.low %v707_v53, %v711_v12 }
 0x395   : > { %7466 = vmatprep.subr.bf16.mxu0 %v8013_v7  ;;  %7507 = vmatprep.subr.bf16.mxu1 %v8141_v8  ;;  %v575_v5 = vld [vmem:[%s9358_s25 + $0x978] sm:$0xff] }
 0x396   : > { %v699_v52 = vld [vmem:[%s9358_s25 + $0xd58] sm:$0xff]  ;;  %v8221_v21 = vcombine.high %v571_v4, %v575_v5 }
 0x397   : > { %v703_v47 = vld [vmem:[%s9358_s25 + $0xd78] sm:$0xff] }
 0x398   : > { %7467 = vmatpush2.bf16.msra.mxu0 %v8012_v46  ;;  %7508 = vmatpush2.bf16.msra.mxu1 %v8140_v22  ;;  %v691_v9 = vld [vmem:[%s9358_s25 + $0xd18] sm:$0xff] }
 0x399   : > { %7468 = vmatprep.subr.bf16.mxu0 %v8005_v23  ;;  %7509 = vmatprep.subr.bf16.mxu1 %v8133_v19  ;;  %v563_v23 = vld [vmem:[%s9358_s25 + $0x918] sm:$0xff] }
 0x39a   : > { %v567_v19 = vld [vmem:[%s9358_s25 + $0x938] sm:$0xff] }
 0x39b   : > { %v695_v27 = vld [vmem:[%s9358_s25 + $0xd38] sm:$0xff]  ;;  %v8212_v38 = vcombine.low %v563_v23, %v567_v19 }
 0x39c   : > { %7469 = vmatpush2.bf16.msra.mxu0 %v8004_v33  ;;  %7510 = vmatpush2.bf16.msra.mxu1 %v8132_v25  ;;  %v8348_v25 = vcombine.low %v699_v52, %v703_v47  ;;  %v555_v35 = vld [vmem:[%s9358_s25 + $0x8d8] sm:$0xff] }
 0x39d   : > { %7470 = vmatprep.subr.bf16.mxu0 %v7997_v34  ;;  %7511 = vmatprep.subr.bf16.mxu1 %v8125_v17  ;;  %v8213_v34 = vcombine.high %v563_v23, %v567_v19  ;;  %v8341_v17 = vcombine.high %v691_v9, %v695_v27  ;;  %v683_v13 = vld [vmem:[%s9358_s25 + $0xcd8] sm:$0xff] }
 0x39e   : > { %v687_v37 = vld [vmem:[%s9358_s25 + $0xcf8] sm:$0xff] }
 0x39f   : > { %v551_v42 = vld [vmem:[%s9358_s25 + $0x8b8] sm:$0xff] }
 0x3a0   : > { %7471 = vmatpush2.bf16.msra.mxu0 %v7996_v58  ;;  %7512 = vmatpush2.bf16.msra.mxu1 %v8124_v39  ;;  %v8340_v58 = vcombine.low %v691_v9, %v695_v27  ;;  %v675_v43 = vld [vmem:[%s9358_s25 + $0xc98] sm:$0xff] }
 0x3a1   : > { %7472 = vmatprep.subr.bf16.mxu0 %v7989_v41  ;;  %7513 = vmatprep.subr.bf16.mxu1 %v8117_v59  ;;  %v8333_v41 = vcombine.high %v683_v13, %v687_v37  ;;  %v547_v59 = vld [vmem:[%s9358_s25 + $0x898] sm:$0xff] }
 0x3a2   : > { %v679_v44 = vld [vmem:[%s9358_s25 + $0xcb8] sm:$0xff]  ;;  %v8196_v12 = vcombine.low %v547_v59, %v551_v42 }
 0x3a3   : > { %v543_v60 = vld [vmem:[%s9358_s25 + $0x878] sm:$0xff] }
 0x3a4   : > { %7473 = vmatpush2.bf16.msra.mxu0 %v7988_v49  ;;  %7514 = vmatpush2.bf16.msra.mxu1 %v8116_v54  ;;  %v8332_v49 = vcombine.low %v683_v13, %v687_v37  ;;  %v8197_v54 = vcombine.high %v547_v59, %v551_v42  ;;  %v667_v62 = vld [vmem:[%s9358_s25 + $0xc58] sm:$0xff] }
 0x3a5   : > { %7524 = vmatprep.subr.bf16.mxu0 %v8237_v56  ;;  %7565 = vmatprep.subr.bf16.mxu1 %v8365_v57  ;;  %v8325_v56 = vcombine.high %v675_v43, %v679_v44  ;;  %v539_v57 = vld [vmem:[%s9358_s25 + $0x858] sm:$0xff] }
 0x3a6   : > { %v671_v53 = vld [vmem:[%s9358_s25 + $0xc78] sm:$0xff] }
 0x3a7   : > { %v7230_v1 = vpop.f32.mrf.mxu0  ;;  %7475 = vmatmul.mubr.bf16.vlgmr.msra.gmra.mxu0 %v9440_v16  ;;  %v7271_v8 = vpop.f32.mrf.mxu1  ;;  %7516 = vmatmul.mubr.bf16.vlgmr.msra.gmra.mxu1 %v9444_v20  ;;  %v643_v19 = vld [vmem:[%s9358_s25 + $0xb98] sm:$0xff] }
 0x3a8   : > { %v7231_v7 = vadd.f32 %v7230_v1, %v10295_v24  ;;  %7525 = vmatpush1.bf16.msra.mxu0 %v8236_v63  ;;  %7566 = vmatpush1.bf16.msra.mxu1 %v8364_v0  ;;  %v8349_v24 = vcombine.high %v699_v52, %v703_v47  ;;  %v8324_v63 = vcombine.low %v675_v43, %v679_v44  ;;  %v663_v1 = vld [vmem:[%s9358_s25 + $0xc38] sm:$0xff] }
 0x3a9   : > { %v7232_v11 = vpop.f32.mrf.mxu0  ;;  %7526 = vmatprep.subr.bf16.mxu0 %v8229_v3  ;;  %v7273_v22 = vpop.f32.mrf.mxu1  ;;  %7567 = vmatprep.subr.bf16.mxu1 %v8357_v61  ;;  %v8189_v0 = vcombine.high %v539_v57, %v543_v60  ;;  %v8317_v3 = vcombine.high %v667_v62, %v671_v53  ;;  %v531_v61 = vld [vmem:[%s9358_s25 + $0x818] sm:$0xff]  ;;  %v8188_v52 = vcombine.low %v539_v57, %v543_v60 }
 0x3aa   : > { %v10368_v46 = vadd.f32 %v7271_v8, %v7231_v7  ;;  %v7233_v16 = vadd.f32 %v7232_v11, %v10303_v32  ;;  %7556 = vmatprep.mubr.bf16.mxu0 %v9448_v28  ;;  %7597 = vmatprep.mubr.bf16.mxu1 %v9453_v31  ;;  %v8220_v32 = vcombine.low %v571_v4, %v575_v5  ;;  %v559_v31 = vld [vmem:[%s9358_s25 + $0x8f8] sm:$0xff] }
 0x3ab   : > { %v7234_v20 = vpop.f32.mrf.mxu0  ;;  %v7275_v30 = vpop.f32.mrf.mxu1  ;;  %v8205_v39 = vcombine.high %v555_v35, %v559_v31  ;;  %v8204_v45 = vcombine.low %v555_v35, %v559_v31  ;;  %v535_v4 = vld [vmem:[%s9358_s25 + $0x838] sm:$0xff]  ;;  %v8316_v47 = vcombine.low %v667_v62, %v671_v53 }
 0x3ac   : > { %v10377_v29 = vadd.f32 %v7273_v22, %v7233_v16  ;;  %7527 = vmatpush1.bf16.msra.mxu0 %v8228_v10  ;;  %7568 = vmatpush1.bf16.msra.mxu1 %v8356_v15  ;;  %v659_v5 = vld [vmem:[%s9358_s25 + $0xc18] sm:$0xff]  ;;  %v8181_v7 = vcombine.high %v531_v61, %v535_v4  ;;  %v8180_v16 = vcombine.low %v531_v61, %v535_v4 }
 0x3ad   : > { %v7235_v33 = vpop.f32.mrf.mxu0  ;;  %7528 = vmatprep.subr.bf16.mxu0 %v8221_v21  ;;  %v7276_v28 = vpop.f32.mrf.mxu1  ;;  %7569 = vmatprep.subr.bf16.mxu1 %v8349_v24  ;;  %v8309_v8 = vcombine.high %v659_v5, %v663_v1  ;;  %v651_v10 = vld [vmem:[%s9358_s25 + $0xbd8] sm:$0xff]  ;;  %v8308_v22 = vcombine.low %v659_v5, %v663_v1 }
 0x3ae   : > { %v655_v11 = vld [vmem:[%s9358_s25 + $0xbf8] sm:$0xff] }
 0x3af   : > { %v779_v15 = vld [vmem:[%s9358_s25 + $0xfd8] sm:$0xff]  ;;  %v8301_v24 = vcombine.high %v651_v10, %v655_v11  ;;  %v8300_v30 = vcombine.low %v651_v10, %v655_v11 }
 0x3b0   : > { %7529 = vmatpush1.bf16.msra.mxu0 %v8220_v32  ;;  %7570 = vmatpush1.bf16.msra.mxu1 %v8348_v25  ;;  %v783_v21 = vld [vmem:[%s9358_s25 + $0xff8] sm:$0xff] }
 0x3b1   : > { %7530 = vmatprep.subr.bf16.mxu0 %v8213_v34  ;;  %7571 = vmatprep.subr.bf16.mxu1 %v8341_v17  ;;  %v8429_v23 = vcombine.high %v779_v15, %v783_v21  ;;  %v647_v20 = vld [vmem:[%s9358_s25 + $0xbb8] sm:$0xff]  ;;  %v8428_v32 = vcombine.low %v779_v15, %v783_v21 }
 0x3b2   : > { %v771_v9 = vld [vmem:[%s9358_s25 + $0xf98] sm:$0xff]  ;;  %v8293_v33 = vcombine.high %v643_v19, %v647_v20  ;;  %v8292_v31 = vcombine.low %v643_v19, %v647_v20 }
 0x3b3   : > { %v775_v27 = vld [vmem:[%s9358_s25 + $0xfb8] sm:$0xff] }
 0x3b4   : > { %7531 = vmatpush1.bf16.msra.mxu0 %v8212_v38  ;;  %7572 = vmatpush1.bf16.msra.mxu1 %v8340_v58  ;;  %v8421_v25 = vcombine.high %v771_v9, %v775_v27  ;;  %v635_v34 = vld [vmem:[%s9358_s25 + $0xb58] sm:$0xff]  ;;  %v8420_v13 = vcombine.low %v771_v9, %v775_v27 }
 0x3b5   : > { %7532 = vmatprep.subr.bf16.mxu0 %v8205_v39  ;;  %7573 = vmatprep.subr.bf16.mxu1 %v8333_v41  ;;  %v639_v28 = vld [vmem:[%s9358_s25 + $0xb78] sm:$0xff] }
 0x3b6   : > { %v763_v17 = vld [vmem:[%s9358_s25 + $0xf58] sm:$0xff]  ;;  %v8285_v37 = vcombine.high %v635_v34, %v639_v28  ;;  %v8284_v42 = vcombine.low %v635_v34, %v639_v28 }
 0x3b7   : > { %v767_v35 = vld [vmem:[%s9358_s25 + $0xf78] sm:$0xff] }
 0x3b8   : > { %7533 = vmatpush1.bf16.msra.mxu0 %v8204_v45  ;;  %7574 = vmatpush1.bf16.msra.mxu1 %v8332_v49  ;;  %v8413_v38 = vcombine.high %v763_v17, %v767_v35  ;;  %v627_v58 = vld [vmem:[%s9358_s25 + $0xb18] sm:$0xff]  ;;  %v8412_v43 = vcombine.low %v763_v17, %v767_v35 }
 0x3b9   : > { %7534 = vmatprep.subr.bf16.mxu0 %v8197_v54  ;;  %7575 = vmatprep.subr.bf16.mxu1 %v8325_v56  ;;  %v631_v39 = vld [vmem:[%s9358_s25 + $0xb38] sm:$0xff] }
 0x3ba   : > { %v755_v41 = vld [vmem:[%s9358_s25 + $0xf18] sm:$0xff]  ;;  %v8277_v44 = vcombine.high %v627_v58, %v631_v39  ;;  %v8276_v60 = vcombine.low %v627_v58, %v631_v39 }
 0x3bb   : > { %v759_v59 = vld [vmem:[%s9358_s25 + $0xf38] sm:$0xff] }
 0x3bc   : > { %7535 = vmatpush1.bf16.msra.mxu0 %v8196_v12  ;;  %7576 = vmatpush1.bf16.msra.mxu1 %v8324_v63  ;;  %v8405_v45 = vcombine.high %v755_v41, %v759_v59  ;;  %v619_v49 = vld [vmem:[%s9358_s25 + $0xad8] sm:$0xff]  ;;  %v8404_v62 = vcombine.low %v755_v41, %v759_v59 }
 0x3bd   : > { %7536 = vmatprep.subr.bf16.mxu0 %v8189_v0  ;;  %7577 = vmatprep.subr.bf16.mxu1 %v8317_v3  ;;  %v623_v54 = vld [vmem:[%s9358_s25 + $0xaf8] sm:$0xff] }
 0x3be   : > { %v747_v56 = vld [vmem:[%s9358_s25 + $0xed8] sm:$0xff]  ;;  %v8269_v53 = vcombine.high %v619_v49, %v623_v54  ;;  %v8268_v4 = vcombine.low %v619_v49, %v623_v54 }
 0x3bf   : > { %v751_v57 = vld [vmem:[%s9358_s25 + $0xef8] sm:$0xff] }
 0x3c0   : > { %7537 = vmatpush1.bf16.msra.mxu0 %v8188_v52  ;;  %7578 = vmatpush1.bf16.msra.mxu1 %v8316_v47  ;;  %v8397_v12 = vcombine.high %v747_v56, %v751_v57  ;;  %v611_v63 = vld [vmem:[%s9358_s25 + $0xa98] sm:$0xff]  ;;  %v8396_v5 = vcombine.low %v747_v56, %v751_v57 }
 0x3c1   : > { %7538 = vmatprep.subr.bf16.mxu0 %v8181_v7  ;;  %7579 = vmatprep.subr.bf16.mxu1 %v8309_v8  ;;  %v615_v0 = vld [vmem:[%s9358_s25 + $0xab8] sm:$0xff] }
 0x3c2   : > { %v739_v3 = vld [vmem:[%s9358_s25 + $0xe98] sm:$0xff]  ;;  %v8261_v1 = vcombine.high %v611_v63, %v615_v0  ;;  %v8260_v11 = vcombine.low %v611_v63, %v615_v0 }
 0x3c3   : > { %v743_v61 = vld [vmem:[%s9358_s25 + $0xeb8] sm:$0xff] }
 0x3c4   : > { %7539 = vmatpush1.bf16.msra.mxu0 %v8180_v16  ;;  %7580 = vmatpush1.bf16.msra.mxu1 %v8308_v22  ;;  %v8389_v52 = vcombine.high %v739_v3, %v743_v61  ;;  %v603_v47 = vld [vmem:[%s9358_s25 + $0xa58] sm:$0xff]  ;;  %v8388_v15 = vcombine.low %v739_v3, %v743_v61 }
 0x3c5   : > { %7540 = vmatprep.subr.bf16.mxu0 %v8301_v24  ;;  %7581 = vmatprep.subr.bf16.mxu1 %v8429_v23  ;;  %v607_v7 = vld [vmem:[%s9358_s25 + $0xa78] sm:$0xff] }
 0x3c6   : > { %v731_v8 = vld [vmem:[%s9358_s25 + $0xe58] sm:$0xff]  ;;  %v8253_v21 = vcombine.high %v603_v47, %v607_v7  ;;  %v8252_v20 = vcombine.low %v603_v47, %v607_v7 }
 0x3c7   : > { %v735_v10 = vld [vmem:[%s9358_s25 + $0xe78] sm:$0xff] }
 0x3c8   : > { %7541 = vmatpush2.bf16.msra.mxu0 %v8300_v30  ;;  %7582 = vmatpush2.bf16.msra.mxu1 %v8428_v32  ;;  %v8381_v16 = vcombine.high %v731_v8, %v735_v10  ;;  %v595_v22 = vld [vmem:[%s9358_s25 + $0xa18] sm:$0xff]  ;;  %v8380_v9 = vcombine.low %v731_v8, %v735_v10 }
 0x3c9   : > { %7542 = vmatprep.subr.bf16.mxu0 %v8293_v33  ;;  %7583 = vmatprep.subr.bf16.mxu1 %v8421_v25  ;;  %v599_v24 = vld [vmem:[%s9358_s25 + $0xa38] sm:$0xff] }
 0x3ca   : > { %v723_v23 = vld [vmem:[%s9358_s25 + $0xe18] sm:$0xff]  ;;  %v8245_v27 = vcombine.high %v595_v22, %v599_v24  ;;  %v8244_v28 = vcombine.low %v595_v22, %v599_v24 }
 0x3cb   : > { %v727_v19 = vld [vmem:[%s9358_s25 + $0xe38] sm:$0xff] }
 0x3cc   : > { %7543 = vmatpush2.bf16.msra.mxu0 %v8292_v31  ;;  %7584 = vmatpush2.bf16.msra.mxu1 %v8420_v13  ;;  %v8373_v30 = vcombine.high %v723_v23, %v727_v19  ;;  %v843_v32 = vld [vmem:[%s9358_s25 + $0x11d8] sm:$0xff]  ;;  %v8372_v17 = vcombine.low %v723_v23, %v727_v19 }
 0x3cd   : > { %7544 = vmatprep.subr.bf16.mxu0 %v8285_v37  ;;  %7585 = vmatprep.subr.bf16.mxu1 %v8413_v38  ;;  %v847_v33 = vld [vmem:[%s9358_s25 + $0x11f8] sm:$0xff] }
 0x3ce   : > { %v971_v25 = vld [vmem:[%s9358_s25 + $0x15d8] sm:$0xff]  ;;  %v8493_v35 = vcombine.high %v843_v32, %v847_v33  ;;  %v8492_v39 = vcombine.low %v843_v32, %v847_v33 }
 0x3cf   : > { %v975_v34 = vld [vmem:[%s9358_s25 + $0x15f8] sm:$0xff] }
 0x3d0   : > { %7545 = vmatpush2.bf16.msra.mxu0 %v8284_v42  ;;  %7586 = vmatpush2.bf16.msra.mxu1 %v8412_v43  ;;  %v8621_v31 = vcombine.high %v971_v25, %v975_v34  ;;  %v835_v13 = vld [vmem:[%s9358_s25 + $0x1198] sm:$0xff]  ;;  %v8620_v41 = vcombine.low %v971_v25, %v975_v34 }
 0x3d1   : > { %7546 = vmatprep.subr.bf16.mxu0 %v8277_v44  ;;  %7587 = vmatprep.subr.bf16.mxu1 %v8405_v45  ;;  %v839_v37 = vld [vmem:[%s9358_s25 + $0x11b8] sm:$0xff] }
 0x3d2   : > { %v963_v38 = vld [vmem:[%s9358_s25 + $0x1598] sm:$0xff]  ;;  %v8485_v59 = vcombine.high %v835_v13, %v839_v37  ;;  %v8484_v57 = vcombine.low %v835_v13, %v839_v37 }
 0x3d3   : > { %v967_v58 = vld [vmem:[%s9358_s25 + $0x15b8] sm:$0xff] }
 0x3d4   : > { %7547 = vmatpush2.bf16.msra.mxu0 %v8276_v60  ;;  %7588 = vmatpush2.bf16.msra.mxu1 %v8404_v62  ;;  %v8613_v42 = vcombine.high %v963_v38, %v967_v58  ;;  %v827_v43 = vld [vmem:[%s9358_s25 + $0x1158] sm:$0xff]  ;;  %v8612_v62 = vcombine.low %v963_v38, %v967_v58 }
 0x3d5   : > { %7548 = vmatprep.subr.bf16.mxu0 %v8269_v53  ;;  %7589 = vmatprep.subr.bf16.mxu1 %v8397_v12  ;;  %v831_v44 = vld [vmem:[%s9358_s25 + $0x1178] sm:$0xff] }
 0x3d6   : > { %v955_v49 = vld [vmem:[%s9358_s25 + $0x1558] sm:$0xff]  ;;  %v8477_v53 = vcombine.high %v827_v43, %v831_v44 }
 0x3d7   : > { %v959_v54 = vld [vmem:[%s9358_s25 + $0x1578] sm:$0xff] }
 0x3d8   : > { %7549 = vmatpush2.bf16.msra.mxu0 %v8268_v4  ;;  %7590 = vmatpush2.bf16.msra.mxu1 %v8396_v5  ;;  %v819_v63 = vld [vmem:[%s9358_s25 + $0x1118] sm:$0xff]  ;;  %v8476_v5 = vcombine.low %v827_v43, %v831_v44 }
 0x3d9   : > { %7550 = vmatprep.subr.bf16.mxu0 %v8261_v1  ;;  %7591 = vmatprep.subr.bf16.mxu1 %v8389_v52  ;;  %v823_v0 = vld [vmem:[%s9358_s25 + $0x1138] sm:$0xff]  ;;  %v8604_v52 = vcombine.low %v955_v49, %v959_v54 }
 0x3da   : > { %v951_v61 = vld [vmem:[%s9358_s25 + $0x1538] sm:$0xff]  ;;  %v8469_v47 = vcombine.high %v819_v63, %v823_v0 }
 0x3db   : > { %v811_v8 = vld [vmem:[%s9358_s25 + $0x10d8] sm:$0xff] }
 0x3dc   : > { %7551 = vmatpush2.bf16.msra.mxu0 %v8260_v11  ;;  %7592 = vmatpush2.bf16.msra.mxu1 %v8388_v15  ;;  %v815_v10 = vld [vmem:[%s9358_s25 + $0x10f8] sm:$0xff] }
 0x3dd   : > { %7552 = vmatprep.subr.bf16.mxu0 %v8253_v21  ;;  %7593 = vmatprep.subr.bf16.mxu1 %v8381_v16  ;;  %v939_v11 = vld [vmem:[%s9358_s25 + $0x14d8] sm:$0xff]  ;;  %v8461_v16 = vcombine.high %v811_v8, %v815_v10 }
 0x3de   : > { %v943_v15 = vld [vmem:[%s9358_s25 + $0x14f8] sm:$0xff] }
 0x3df   : > { %v8589_v22 = vcombine.high %v939_v11, %v943_v15  ;;  %v803_v24 = vld [vmem:[%s9358_s25 + $0x1098] sm:$0xff] }
 0x3e0   : > { %7553 = vmatpush2.bf16.msra.mxu0 %v8252_v20  ;;  %7594 = vmatpush2.bf16.msra.mxu1 %v8380_v9  ;;  %v807_v23 = vld [vmem:[%s9358_s25 + $0x10b8] sm:$0xff]  ;;  %v8460_v9 = vcombine.low %v811_v8, %v815_v10 }
 0x3e1   : > { %7554 = vmatprep.subr.bf16.mxu0 %v8245_v27  ;;  %7595 = vmatprep.subr.bf16.mxu1 %v8373_v30  ;;  %v931_v19 = vld [vmem:[%s9358_s25 + $0x1498] sm:$0xff]  ;;  %v8588_v27 = vcombine.low %v939_v11, %v943_v15  ;;  %v8453_v30 = vcombine.high %v803_v24, %v807_v23 }
 0x3e2   : > { %v935_v20 = vld [vmem:[%s9358_s25 + $0x14b8] sm:$0xff] }
 0x3e3   : > { %v8581_v32 = vcombine.high %v931_v19, %v935_v20  ;;  %v795_v33 = vld [vmem:[%s9358_s25 + $0x1058] sm:$0xff] }
 0x3e4   : > { %7555 = vmatpush2.bf16.msra.mxu0 %v8244_v28  ;;  %7596 = vmatpush2.bf16.msra.mxu1 %v8372_v17  ;;  %v799_v25 = vld [vmem:[%s9358_s25 + $0x1078] sm:$0xff]  ;;  %v8452_v17 = vcombine.low %v803_v24, %v807_v23 }
 0x3e5   : > { %7606 = vmatprep.subr.bf16.mxu0 %v8493_v35  ;;  %7647 = vmatprep.subr.bf16.mxu1 %v8621_v31  ;;  %v923_v34 = vld [vmem:[%s9358_s25 + $0x1458] sm:$0xff]  ;;  %v8580_v35 = vcombine.low %v931_v19, %v935_v20  ;;  %v8445_v31 = vcombine.high %v795_v33, %v799_v25 }
 0x3e6   : > { %v927_v28 = vld [vmem:[%s9358_s25 + $0x1478] sm:$0xff] }
 0x3e7   : > { %v10437_v45 = vpop.f32.mrf.mxu0  ;;  %7557 = vmatmul.mubr.bf16.vlgmr.msra.gmra.mxu0 %v9516_v36  ;;  %v10442_v56 = vpop.f32.mrf.mxu1  ;;  %7598 = vmatmul.mubr.bf16.vlgmr.msra.gmra.mxu1 %v9520_v40  ;;  %v8605_v36 = vcombine.high %v955_v49, %v959_v54  ;;  %v947_v40 = vld [vmem:[%s9358_s25 + $0x1518] sm:$0xff]  ;;  %v8573_v13 = vcombine.high %v923_v34, %v927_v28 }
 0x3e8   : > { %7607 = vmatpush1.bf16.msra.mxu0 %v8492_v39  ;;  %7648 = vmatpush1.bf16.msra.mxu1 %v8620_v41  ;;  %v8596_v21 = vcombine.low %v947_v40, %v951_v61  ;;  %v787_v37 = vld [vmem:[%s9358_s25 + $0x1018] sm:$0xff]  ;;  %v8444_v41 = vcombine.low %v795_v33, %v799_v25 }
 0x3e9   : > { %v10445_v60 = vpop.f32.mrf.mxu0  ;;  %7608 = vmatprep.subr.bf16.mxu0 %v8485_v59  ;;  %v10447_v12 = vpop.f32.mrf.mxu1  ;;  %7649 = vmatprep.subr.bf16.mxu1 %v8613_v42  ;;  %v791_v38 = vld [vmem:[%s9358_s25 + $0x1038] sm:$0xff]  ;;  %v8572_v59 = vcombine.low %v923_v34, %v927_v28 }
 0x3ea   : > { %7638 = vmatprep.mubr.bf16.mxu0 %v9524_v48  ;;  %7679 = vmatprep.mubr.bf16.mxu1 %v9529_v51  ;;  %v8597_v48 = vcombine.high %v947_v40, %v951_v61  ;;  %v8468_v51 = vcombine.low %v819_v63, %v823_v0  ;;  %v915_v58 = vld [vmem:[%s9358_s25 + $0x1418] sm:$0xff]  ;;  %v8437_v42 = vcombine.high %v787_v37, %v791_v38 }
 0x3eb   : > { %v7316_v3 = vpop.f32.mrf.mxu0  ;;  %v7357_v4 = vpop.f32.mrf.mxu1  ;;  %v919_v39 = vld [vmem:[%s9358_s25 + $0x1438] sm:$0xff] }
 0x3ec   : > { %7609 = vmatpush1.bf16.msra.mxu0 %v8484_v57  ;;  %7650 = vmatpush1.bf16.msra.mxu1 %v8612_v62  ;;  %v8565_v43 = vcombine.high %v915_v58, %v919_v39  ;;  %v907_v44 = vld [vmem:[%s9358_s25 + $0x13d8] sm:$0xff]  ;;  %v8436_v62 = vcombine.low %v787_v37, %v791_v38 }
 0x3ed   : > { %v7317_v1 = vpop.f32.mrf.mxu0  ;;  %7610 = vmatprep.subr.bf16.mxu0 %v8477_v53  ;;  %v7358_v7 = vpop.f32.mrf.mxu1  ;;  %7651 = vmatprep.subr.bf16.mxu1 %v8605_v36  ;;  %v911_v49 = vld [vmem:[%s9358_s25 + $0x13f8] sm:$0xff]  ;;  %v8564_v53 = vcombine.low %v915_v58, %v919_v39 }
 0x3ee   : > { %v1035_v54 = vld [vmem:[%s9358_s25 + $0x17d8] sm:$0xff]  ;;  %v8557_v36 = vcombine.high %v907_v44, %v911_v49  ;;  %v8556_v4 = vcombine.low %v907_v44, %v911_v49 }
 0x3ef   : > { %v1039_v57 = vld [vmem:[%s9358_s25 + $0x17f8] sm:$0xff] }
 0x3f0   : > { %7611 = vmatpush1.bf16.msra.mxu0 %v8476_v5  ;;  %7652 = vmatpush1.bf16.msra.mxu1 %v8604_v52  ;;  %v8685_v63 = vcombine.high %v1035_v54, %v1039_v57  ;;  %v899_v0 = vld [vmem:[%s9358_s25 + $0x1398] sm:$0xff]  ;;  %v8684_v5 = vcombine.low %v1035_v54, %v1039_v57 }
 0x3f1   : > { %7612 = vmatprep.subr.bf16.mxu0 %v8469_v47  ;;  %7653 = vmatprep.subr.bf16.mxu1 %v8597_v48  ;;  %v903_v3 = vld [vmem:[%s9358_s25 + $0x13b8] sm:$0xff] }
 0x3f2   : > { %v1027_v40 = vld [vmem:[%s9358_s25 + $0x1798] sm:$0xff]  ;;  %v8549_v1 = vcombine.high %v899_v0, %v903_v3  ;;  %v8548_v10 = vcombine.low %v899_v0, %v903_v3 }
 0x3f3   : > { %v1031_v61 = vld [vmem:[%s9358_s25 + $0x17b8] sm:$0xff] }
 0x3f4   : > { %7613 = vmatpush1.bf16.msra.mxu0 %v8468_v51  ;;  %7654 = vmatpush1.bf16.msra.mxu1 %v8596_v21  ;;  %v8677_v52 = vcombine.high %v1027_v40, %v1031_v61  ;;  %v891_v47 = vld [vmem:[%s9358_s25 + $0x1358] sm:$0xff]  ;;  %v8676_v11 = vcombine.low %v1027_v40, %v1031_v61 }
 0x3f5   : > { %7614 = vmatprep.subr.bf16.mxu0 %v8461_v16  ;;  %7655 = vmatprep.subr.bf16.mxu1 %v8589_v22  ;;  %v895_v7 = vld [vmem:[%s9358_s25 + $0x1378] sm:$0xff] }
 0x3f6   : > { %v1019_v48 = vld [vmem:[%s9358_s25 + $0x1758] sm:$0xff]  ;;  %v8541_v15 = vcombine.high %v891_v47, %v895_v7  ;;  %v8540_v23 = vcombine.low %v891_v47, %v895_v7 }
 0x3f7   : > { %v1023_v8 = vld [vmem:[%s9358_s25 + $0x1778] sm:$0xff] }
 0x3f8   : > { %7615 = vmatpush1.bf16.msra.mxu0 %v8460_v9  ;;  %7656 = vmatpush1.bf16.msra.mxu1 %v8588_v27  ;;  %v8669_v51 = vcombine.high %v1019_v48, %v1023_v8  ;;  %v883_v21 = vld [vmem:[%s9358_s25 + $0x1318] sm:$0xff]  ;;  %v8668_v19 = vcombine.low %v1019_v48, %v1023_v8 }
 0x3f9   : > { %7616 = vmatprep.subr.bf16.mxu0 %v8453_v30  ;;  %7657 = vmatprep.subr.bf16.mxu1 %v8581_v32  ;;  %v887_v16 = vld [vmem:[%s9358_s25 + $0x1338] sm:$0xff] }
 0x3fa   : > { %v1011_v22 = vld [vmem:[%s9358_s25 + $0x1718] sm:$0xff]  ;;  %v8533_v20 = vcombine.high %v883_v21, %v887_v16  ;;  %v8532_v25 = vcombine.low %v883_v21, %v887_v16 }
 0x3fb   : > { %v1015_v24 = vld [vmem:[%s9358_s25 + $0x1738] sm:$0xff] }
 0x3fc   : > { %7617 = vmatpush1.bf16.msra.mxu0 %v8452_v17  ;;  %7658 = vmatpush1.bf16.msra.mxu1 %v8580_v35  ;;  %v8661_v9 = vcombine.high %v1011_v22, %v1015_v24  ;;  %v875_v27 = vld [vmem:[%s9358_s25 + $0x12d8] sm:$0xff]  ;;  %v8660_v34 = vcombine.low %v1011_v22, %v1015_v24  ;;  %v7315_v22 = vadd.f32 %v10445_v60, %v10377_v29 }
 0x3fd   : > { %7618 = vmatprep.subr.bf16.mxu0 %v8445_v31  ;;  %7659 = vmatprep.subr.bf16.mxu1 %v8573_v13  ;;  %v879_v30 = vld [vmem:[%s9358_s25 + $0x12f8] sm:$0xff] }
 0x3fe   : > { %v1003_v32 = vld [vmem:[%s9358_s25 + $0x16d8] sm:$0xff]  ;;  %v8525_v28 = vcombine.high %v875_v27, %v879_v30  ;;  %v8524_v38 = vcombine.low %v875_v27, %v879_v30 }
 0x3ff   : > { %v1007_v33 = vld [vmem:[%s9358_s25 + $0x16f8] sm:$0xff] }
 0x400   : > { %7619 = vmatpush1.bf16.msra.mxu0 %v8444_v41  ;;  %7660 = vmatpush1.bf16.msra.mxu1 %v8572_v59  ;;  %v8653_v17 = vcombine.high %v1003_v32, %v1007_v33  ;;  %v867_v35 = vld [vmem:[%s9358_s25 + $0x1298] sm:$0xff]  ;;  %v8652_v58 = vcombine.low %v1003_v32, %v1007_v33  ;;  %v7356_v33 = vadd.f32 %v10447_v12, %v7315_v22 }
 0x401   : > { %7620 = vmatprep.subr.bf16.mxu0 %v8437_v42  ;;  %7661 = vmatprep.subr.bf16.mxu1 %v8565_v43  ;;  %v871_v31 = vld [vmem:[%s9358_s25 + $0x12b8] sm:$0xff] }
 0x402   : > { %v995_v13 = vld [vmem:[%s9358_s25 + $0x1698] sm:$0xff]  ;;  %v8517_v39 = vcombine.high %v867_v35, %v871_v31  ;;  %v8516_v49 = vcombine.low %v867_v35, %v871_v31 }
 0x403   : > { %v999_v37 = vld [vmem:[%s9358_s25 + $0x16b8] sm:$0xff] }
 0x404   : > { %7621 = vmatpush1.bf16.msra.mxu0 %v8436_v62  ;;  %7662 = vmatpush1.bf16.msra.mxu1 %v8564_v53  ;;  %v8645_v41 = vcombine.high %v995_v13, %v999_v37  ;;  %v859_v59 = vld [vmem:[%s9358_s25 + $0x1258] sm:$0xff]  ;;  %v8644_v54 = vcombine.low %v995_v13, %v999_v37 }
 0x405   : > { %7622 = vmatprep.subr.bf16.mxu0 %v8557_v36  ;;  %7663 = vmatprep.subr.bf16.mxu1 %v8685_v63  ;;  %v863_v42 = vld [vmem:[%s9358_s25 + $0x1278] sm:$0xff] }
 0x406   : > { %v987_v43 = vld [vmem:[%s9358_s25 + $0x1658] sm:$0xff]  ;;  %v8509_v57 = vcombine.high %v859_v59, %v863_v42  ;;  %v8508_v3 = vcombine.low %v859_v59, %v863_v42 }
 0x407   : > { %v991_v44 = vld [vmem:[%s9358_s25 + $0x1678] sm:$0xff] }
 0x408   : > { %7623 = vmatpush2.bf16.msra.mxu0 %v8556_v4  ;;  %7664 = vmatpush2.bf16.msra.mxu1 %v8684_v5  ;;  %v8637_v62 = vcombine.high %v987_v43, %v991_v44  ;;  %v851_v53 = vld [vmem:[%s9358_s25 + $0x1218] sm:$0xff]  ;;  %v8636_v40 = vcombine.low %v987_v43, %v991_v44 }
 0x409   : > { %7624 = vmatprep.subr.bf16.mxu0 %v8549_v1  ;;  %7665 = vmatprep.subr.bf16.mxu1 %v8677_v52  ;;  %v855_v36 = vld [vmem:[%s9358_s25 + $0x1238] sm:$0xff] }
 0x40a   : > { %v979_v63 = vld [vmem:[%s9358_s25 + $0x1618] sm:$0xff]  ;;  %v8501_v61 = vcombine.high %v851_v53, %v855_v36  ;;  %v8500_v7 = vcombine.low %v851_v53, %v855_v36 }
 0x40b   : > { %v983_v0 = vld [vmem:[%s9358_s25 + $0x1638] sm:$0xff] }
 0x40c   : > { %7625 = vmatpush2.bf16.msra.mxu0 %v8548_v10  ;;  %7666 = vmatpush2.bf16.msra.mxu1 %v8676_v11  ;;  %v8629_v4 = vcombine.high %v979_v63, %v983_v0  ;;  %v1099_v5 = vld [vmem:[%s9358_s25 + $0x19d8] sm:$0xff]  ;;  %v8628_v48 = vcombine.low %v979_v63, %v983_v0  ;;  %v7313_v10 = vadd.f32 %v10437_v45, %v10368_v46 }
 0x40d   : > { %7626 = vmatprep.subr.bf16.mxu0 %v8541_v15  ;;  %7667 = vmatprep.subr.bf16.mxu1 %v8669_v51  ;;  %v1103_v1 = vld [vmem:[%s9358_s25 + $0x19f8] sm:$0xff] }
 0x40e   : > { %v1227_v52 = vld [vmem:[%s9358_s25 + $0x1dd8] sm:$0xff]  ;;  %v8749_v8 = vcombine.high %v1099_v5, %v1103_v1  ;;  %v8748_v24 = vcombine.low %v1099_v5, %v1103_v1  ;;  %v7354_v46 = vadd.f32 %v10442_v56, %v7313_v10 }
 0x40f   : > { %v1231_v47 = vld [vmem:[%s9358_s25 + $0x1df8] sm:$0xff] }
 0x410   : > { %7627 = vmatpush2.bf16.msra.mxu0 %v8540_v23  ;;  %7668 = vmatpush2.bf16.msra.mxu1 %v8668_v19  ;;  %v8877_v11 = vcombine.high %v1227_v52, %v1231_v47  ;;  %v1091_v15 = vld [vmem:[%s9358_s25 + $0x1998] sm:$0xff]  ;;  %v8876_v23 = vcombine.low %v1227_v52, %v1231_v47 }
 0x411   : > { %7628 = vmatprep.subr.bf16.mxu0 %v8533_v20  ;;  %7669 = vmatprep.subr.bf16.mxu1 %v8661_v9  ;;  %v1095_v51 = vld [vmem:[%s9358_s25 + $0x19b8] sm:$0xff] }
 0x412   : > { %v1219_v21 = vld [vmem:[%s9358_s25 + $0x1d98] sm:$0xff]  ;;  %v8741_v19 = vcombine.high %v1091_v15, %v1095_v51  ;;  %v8740_v56 = vcombine.low %v1091_v15, %v1095_v51 }
 0x413   : > { %v1223_v16 = vld [vmem:[%s9358_s25 + $0x1db8] sm:$0xff] }
 0x414   : > { %7629 = vmatpush2.bf16.msra.mxu0 %v8532_v25  ;;  %7670 = vmatpush2.bf16.msra.mxu1 %v8660_v34  ;;  %v8869_v45 = vcombine.high %v1219_v21, %v1223_v16  ;;  %v1083_v20 = vld [vmem:[%s9358_s25 + $0x1958] sm:$0xff]  ;;  %v8868_v34 = vcombine.low %v1219_v21, %v1223_v16 }
 0x415   : > { %7630 = vmatprep.subr.bf16.mxu0 %v8525_v28  ;;  %7671 = vmatprep.subr.bf16.mxu1 %v8653_v17  ;;  %v1087_v9 = vld [vmem:[%s9358_s25 + $0x1978] sm:$0xff] }
 0x416   : > { %v1211_v30 = vld [vmem:[%s9358_s25 + $0x1d58] sm:$0xff]  ;;  %v8733_v28 = vcombine.high %v1083_v20, %v1087_v9  ;;  %v8732_v59 = vcombine.low %v1083_v20, %v1087_v9 }
 0x417   : > { %v1215_v32 = vld [vmem:[%s9358_s25 + $0x1d78] sm:$0xff] }
 0x418   : > { %7631 = vmatpush2.bf16.msra.mxu0 %v8524_v38  ;;  %7672 = vmatpush2.bf16.msra.mxu1 %v8652_v58  ;;  %v8861_v12 = vcombine.high %v1211_v30, %v1215_v32  ;;  %v1075_v31 = vld [vmem:[%s9358_s25 + $0x1918] sm:$0xff]  ;;  %v8860_v43 = vcombine.low %v1211_v30, %v1215_v32 }
 0x419   : > { %7632 = vmatprep.subr.bf16.mxu0 %v8517_v39  ;;  %7673 = vmatprep.subr.bf16.mxu1 %v8645_v41  ;;  %v1079_v13 = vld [vmem:[%s9358_s25 + $0x1938] sm:$0xff] }
 0x41a   : > { %v1203_v37 = vld [vmem:[%s9358_s25 + $0x1d18] sm:$0xff]  ;;  %v8724_v36 = vcombine.low %v1075_v31, %v1079_v13 }
 0x41b   : > { %v1207_v38 = vld [vmem:[%s9358_s25 + $0x1d38] sm:$0xff] }
 0x41c   : > { %7633 = vmatpush2.bf16.msra.mxu0 %v8516_v49  ;;  %7674 = vmatpush2.bf16.msra.mxu1 %v8644_v54  ;;  %v1067_v54 = vld [vmem:[%s9358_s25 + $0x18d8] sm:$0xff]  ;;  %v8852_v63 = vcombine.low %v1203_v37, %v1207_v38 }
 0x41d   : > { %7634 = vmatprep.subr.bf16.mxu0 %v8509_v57  ;;  %7675 = vmatprep.subr.bf16.mxu1 %v8637_v62  ;;  %v1071_v57 = vld [vmem:[%s9358_s25 + $0x18f8] sm:$0xff] }
 0x41e   : > { %v1195_v62 = vld [vmem:[%s9358_s25 + $0x1cd8] sm:$0xff]  ;;  %v8717_v0 = vcombine.high %v1067_v54, %v1071_v57  ;;  %v8716_v1 = vcombine.low %v1067_v54, %v1071_v57 }
 0x41f   : > { %v1199_v53 = vld [vmem:[%s9358_s25 + $0x1cf8] sm:$0xff] }
 0x420   : > { %7635 = vmatpush2.bf16.msra.mxu0 %v8508_v3  ;;  %7676 = vmatpush2.bf16.msra.mxu1 %v8636_v40  ;;  %v8845_v3 = vcombine.high %v1195_v62, %v1199_v53  ;;  %v1059_v40 = vld [vmem:[%s9358_s25 + $0x1898] sm:$0xff]  ;;  %v8844_v52 = vcombine.low %v1195_v62, %v1199_v53 }
 0x421   : > { %7636 = vmatprep.subr.bf16.mxu0 %v8501_v61  ;;  %7677 = vmatprep.subr.bf16.mxu1 %v8629_v4  ;;  %v1063_v61 = vld [vmem:[%s9358_s25 + $0x18b8] sm:$0xff] }
 0x422   : > { %v1187_v4 = vld [vmem:[%s9358_s25 + $0x1c98] sm:$0xff]  ;;  %v8709_v47 = vcombine.high %v1059_v40, %v1063_v61  ;;  %v8708_v15 = vcombine.low %v1059_v40, %v1063_v61 }
 0x423   : > { %v1191_v5 = vld [vmem:[%s9358_s25 + $0x1cb8] sm:$0xff] }
 0x424   : > { %7637 = vmatpush2.bf16.msra.mxu0 %v8500_v7  ;;  %7678 = vmatpush2.bf16.msra.mxu1 %v8628_v48  ;;  %v8837_v7 = vcombine.high %v1187_v4, %v1191_v5  ;;  %v1051_v48 = vld [vmem:[%s9358_s25 + $0x1858] sm:$0xff]  ;;  %v8836_v51 = vcombine.low %v1187_v4, %v1191_v5 }
 0x425   : > { %7688 = vmatprep.subr.bf16.mxu0 %v8749_v8  ;;  %7729 = vmatprep.subr.bf16.mxu1 %v8877_v11  ;;  %v1055_v8 = vld [vmem:[%s9358_s25 + $0x1878] sm:$0xff] }
 0x426   : > { %v1179_v10 = vld [vmem:[%s9358_s25 + $0x1c58] sm:$0xff]  ;;  %v8701_v21 = vcombine.high %v1051_v48, %v1055_v8 }
 0x427   : > { %v7394_v27 = vpop.f32.mrf.mxu0  ;;  %7639 = vmatmul.mubr.bf16.vlgmr.msra.gmra.mxu0 %v9592_v2  ;;  %v7435_v60 = vpop.f32.mrf.mxu1  ;;  %7680 = vmatmul.mubr.bf16.vlgmr.msra.gmra.mxu1 %v9596_v6  ;;  %v1183_v11 = vld [vmem:[%s9358_s25 + $0x1c78] sm:$0xff] }
 0x428   : > { %v7395_v29 = vadd.f32 %v7394_v27, %v7354_v46  ;;  %7689 = vmatpush1.bf16.msra.mxu0 %v8748_v24  ;;  %7730 = vmatpush1.bf16.msra.mxu1 %v8876_v23  ;;  %v8829_v16 = vcombine.high %v1179_v10, %v1183_v11  ;;  %v1043_v22 = vld [vmem:[%s9358_s25 + $0x1818] sm:$0xff]  ;;  %v8700_v46 = vcombine.low %v1051_v48, %v1055_v8 }
 0x429   : > { %v7396_v25 = vpop.f32.mrf.mxu0  ;;  %7690 = vmatprep.subr.bf16.mxu0 %v8741_v19  ;;  %v7437_v35 = vpop.f32.mrf.mxu1  ;;  %7731 = vmatprep.subr.bf16.mxu1 %v8869_v45  ;;  %v1047_v24 = vld [vmem:[%s9358_s25 + $0x1838] sm:$0xff]  ;;  %v8828_v45 = vcombine.low %v1179_v10, %v1183_v11 }
 0x42a   : > { %v7436_v2 = vadd.f32 %v7435_v60, %v7395_v29  ;;  %v7397_v17 = vadd.f32 %v7396_v25, %v7356_v33  ;;  %7720 = vmatprep.mubr.bf16.mxu0 %v9600_v14  ;;  %7761 = vmatprep.mubr.bf16.mxu1 %v9605_v18  ;;  %v8725_v14 = vcombine.high %v1075_v31, %v1079_v13  ;;  %v1171_v23 = vld [vmem:[%s9358_s25 + $0x1c18] sm:$0xff] }
 0x42b   : > { %v7398_v6 = vpop.f32.mrf.mxu0  ;;  %v7439_v41 = vpop.f32.mrf.mxu1  ;;  %v8853_v18 = vcombine.high %v1203_v37, %v1207_v38  ;;  %v1175_v19 = vld [vmem:[%s9358_s25 + $0x1c38] sm:$0xff]  ;;  %v8693_v20 = vcombine.high %v1043_v22, %v1047_v24  ;;  %v8692_v29 = vcombine.low %v1043_v22, %v1047_v24 }
 0x42c   : > { %v7774_v58 = vmax.f32 %v7436_v2, 0.0  ;;  %v7438_v39 = vadd.f32 %v7437_v35, %v7397_v17  ;;  %7691 = vmatpush1.bf16.msra.mxu0 %v8740_v56  ;;  %7732 = vmatpush1.bf16.msra.mxu1 %v8868_v34  ;;  %v8821_v9 = vcombine.high %v1171_v23, %v1175_v19  ;;  %v1163_v27 = vld [vmem:[%s9358_s25 + $0x1bd8] sm:$0xff]  ;;  %v8820_v60 = vcombine.low %v1171_v23, %v1175_v19 }
 0x42d   : > { %v7399_v42 = vpop.f32.mrf.mxu0  ;;  %7692 = vmatprep.subr.bf16.mxu0 %v8733_v28  ;;  %v7440_v49 = vpop.f32.mrf.mxu1  ;;  %7733 = vmatprep.subr.bf16.mxu1 %v8861_v12  ;;  %v1167_v30 = vld [vmem:[%s9358_s25 + $0x1bf8] sm:$0xff] }
 0x42e   : > { %7782 = vst [vmem:[%s9925_s10 + $0x20] sm:$0xff] %v7774_v58  ;;  %v7775_v44 = vmax.f32 %v7438_v39, 0.0  ;;  %v1291_v32 = vld [vmem:[%s9358_s25 + $0x1fd8] sm:$0xff]  ;;  %v8813_v56 = vcombine.high %v1163_v27, %v1167_v30  ;;  %v8812_v35 = vcombine.low %v1163_v27, %v1167_v30 }
 0x42f   : > { %v1295_v33 = vld [vmem:[%s9358_s25 + $0x1ff8] sm:$0xff] }
 0x430   : > { %7783 = vst [vmem:[%s9925_s10 + $0x28] sm:$0xff] %v7775_v44  ;;  %7693 = vmatpush1.bf16.msra.mxu0 %v8732_v59  ;;  %7734 = vmatpush1.bf16.msra.mxu1 %v8860_v43  ;;  %v8941_v25 = vcombine.high %v1291_v32, %v1295_v33  ;;  %v1155_v34 = vld [vmem:[%s9358_s25 + $0x1b98] sm:$0xff]  ;;  %v8940_v12 = vcombine.low %v1291_v32, %v1295_v33 }
 0x431   : > { %7694 = vmatprep.subr.bf16.mxu0 %v8725_v14  ;;  %7735 = vmatprep.subr.bf16.mxu1 %v8853_v18  ;;  %v1159_v28 = vld [vmem:[%s9358_s25 + $0x1bb8] sm:$0xff] }
 0x432   : > { %v1283_v2 = vld [vmem:[%s9358_s25 + $0x1f98] sm:$0xff]  ;;  %v8805_v31 = vcombine.high %v1155_v34, %v1159_v28  ;;  %v8804_v39 = vcombine.low %v1155_v34, %v1159_v28 }
 0x433   : > { %v1287_v17 = vld [vmem:[%s9358_s25 + $0x1fb8] sm:$0xff] }
 0x434   : > { %7695 = vmatpush1.bf16.msra.mxu0 %v8724_v36  ;;  %7736 = vmatpush1.bf16.msra.mxu1 %v8852_v63  ;;  %v8933_v13 = vcombine.high %v1283_v2, %v1287_v17  ;;  %v1147_v6 = vld [vmem:[%s9358_s25 + $0x1b58] sm:$0xff]  ;;  %v8932_v41 = vcombine.low %v1283_v2, %v1287_v17 }
 0x435   : > { %7696 = vmatprep.subr.bf16.mxu0 %v8717_v0  ;;  %7737 = vmatprep.subr.bf16.mxu1 %v8845_v3  ;;  %v1151_v37 = vld [vmem:[%s9358_s25 + $0x1b78] sm:$0xff] }
 0x436   : > { %v1275_v38 = vld [vmem:[%s9358_s25 + $0x1f58] sm:$0xff]  ;;  %v8797_v59 = vcombine.high %v1147_v6, %v1151_v37  ;;  %v8796_v18 = vcombine.low %v1147_v6, %v1151_v37 }
 0x437   : > { %v1279_v58 = vld [vmem:[%s9358_s25 + $0x1f78] sm:$0xff] }
 0x438   : > { %7697 = vmatpush1.bf16.msra.mxu0 %v8716_v1  ;;  %7738 = vmatpush1.bf16.msra.mxu1 %v8844_v52  ;;  %v8925_v42 = vcombine.high %v1275_v38, %v1279_v58  ;;  %v1139_v43 = vld [vmem:[%s9358_s25 + $0x1b18] sm:$0xff]  ;;  %v8924_v54 = vcombine.low %v1275_v38, %v1279_v58 }
 0x439   : > { %7698 = vmatprep.subr.bf16.mxu0 %v8709_v47  ;;  %7739 = vmatprep.subr.bf16.mxu1 %v8837_v7  ;;  %v1143_v14 = vld [vmem:[%s9358_s25 + $0x1b38] sm:$0xff] }
 0x43a   : > { %v1267_v44 = vld [vmem:[%s9358_s25 + $0x1f18] sm:$0xff]  ;;  %v8789_v57 = vcombine.high %v1139_v43, %v1143_v14  ;;  %v8788_v3 = vcombine.low %v1139_v43, %v1143_v14 }
 0x43b   : > { %v1271_v49 = vld [vmem:[%s9358_s25 + $0x1f38] sm:$0xff] }
 0x43c   : > { %7699 = vmatpush1.bf16.msra.mxu0 %v8708_v15  ;;  %7740 = vmatpush1.bf16.msra.mxu1 %v8836_v51  ;;  %v8917_v62 = vcombine.high %v1267_v44, %v1271_v49  ;;  %v1131_v53 = vld [vmem:[%s9358_s25 + $0x1ad8] sm:$0xff]  ;;  %v8916_v40 = vcombine.low %v1267_v44, %v1271_v49 }
 0x43d   : > { %7700 = vmatprep.subr.bf16.mxu0 %v8701_v21  ;;  %7741 = vmatprep.subr.bf16.mxu1 %v8829_v16  ;;  %v1135_v36 = vld [vmem:[%s9358_s25 + $0x1af8] sm:$0xff] }
 0x43e   : > { %v1259_v63 = vld [vmem:[%s9358_s25 + $0x1ed8] sm:$0xff]  ;;  %v8781_v61 = vcombine.high %v1131_v53, %v1135_v36  ;;  %v8780_v7 = vcombine.low %v1131_v53, %v1135_v36 }
 0x43f   : > { %v1263_v0 = vld [vmem:[%s9358_s25 + $0x1ef8] sm:$0xff] }
 0x440   : > { %7701 = vmatpush1.bf16.msra.mxu0 %v8700_v46  ;;  %7742 = vmatpush1.bf16.msra.mxu1 %v8828_v45  ;;  %v8909_v4 = vcombine.high %v1259_v63, %v1263_v0  ;;  %v1123_v5 = vld [vmem:[%s9358_s25 + $0x1a98] sm:$0xff]  ;;  %v8908_v48 = vcombine.low %v1259_v63, %v1263_v0 }
 0x441   : > { %7702 = vmatprep.subr.bf16.mxu0 %v8693_v20  ;;  %7743 = vmatprep.subr.bf16.mxu1 %v8821_v9  ;;  %v1127_v1 = vld [vmem:[%s9358_s25 + $0x1ab8] sm:$0xff] }
 0x442   : > { %v1251_v52 = vld [vmem:[%s9358_s25 + $0x1e98] sm:$0xff]  ;;  %v8773_v8 = vcombine.high %v1123_v5, %v1127_v1  ;;  %v8772_v16 = vcombine.low %v1123_v5, %v1127_v1 }
 0x443   : > { %v1255_v47 = vld [vmem:[%s9358_s25 + $0x1eb8] sm:$0xff] }
 0x444   : > { %7703 = vmatpush1.bf16.msra.mxu0 %v8692_v29  ;;  %7744 = vmatpush1.bf16.msra.mxu1 %v8820_v60  ;;  %v8901_v10 = vcombine.high %v1251_v52, %v1255_v47  ;;  %v1115_v11 = vld [vmem:[%s9358_s25 + $0x1a58] sm:$0xff]  ;;  %v8900_v22 = vcombine.low %v1251_v52, %v1255_v47  ;;  %v1324_v29 = vsub.s32 6, %v9663_v26 }
 0x445   : > { %7704 = vmatprep.subr.bf16.mxu0 %v8813_v56  ;;  %7745 = vmatprep.subr.bf16.mxu1 %v8941_v25  ;;  %v1119_v15 = vld [vmem:[%s9358_s25 + $0x1a78] sm:$0xff]  ;;  %v1328_v56 = vsub.s32 7, %v9663_v26  ;;  %v9017_v25 = vld [vmem:[%s9670_s27] sm:$0xff] }
 0x446   : > { %v1243_v51 = vld [vmem:[%s9358_s25 + $0x1e58] sm:$0xff]  ;;  %v8765_v24 = vcombine.high %v1115_v11, %v1119_v15  ;;  %v8764_v9 = vcombine.low %v1115_v11, %v1119_v15  ;;  %v1325_v34 = vrot.slane %v9017_v25, %v1324_v29 }
 0x447   : > { %v1247_v21 = vld [vmem:[%s9358_s25 + $0x1e78] sm:$0xff]  ;;  %v1329_v28 = vrot.slane %v9017_v25, %v1328_v56 }
 0x448   : > { %7705 = vmatpush2.bf16.msra.mxu0 %v8812_v35  ;;  %7746 = vmatpush2.bf16.msra.mxu1 %v8940_v12  ;;  %v8893_v23 = vcombine.high %v1243_v51, %v1247_v21  ;;  %v1107_v19 = vld [vmem:[%s9358_s25 + $0x1a18] sm:$0xff]  ;;  %v8892_v27 = vcombine.low %v1243_v51, %v1247_v21 }
 0x449   : > { %7706 = vmatprep.subr.bf16.mxu0 %v8805_v31  ;;  %7747 = vmatprep.subr.bf16.mxu1 %v8933_v13  ;;  %v1111_v46 = vld [vmem:[%s9358_s25 + $0x1a38] sm:$0xff] }
 0x44a   : > { %v1235_v45 = vld [vmem:[%s9358_s25 + $0x1e18] sm:$0xff]  ;;  %v8757_v30 = vcombine.high %v1107_v19, %v1111_v46  ;;  %v8756_v33 = vcombine.low %v1107_v19, %v1111_v46 }
 0x44b   : > { %v1239_v20 = vld [vmem:[%s9358_s25 + $0x1e38] sm:$0xff] }
 0x44c   : > { %7707 = vmatpush2.bf16.msra.mxu0 %v8804_v39  ;;  %7748 = vmatpush2.bf16.msra.mxu1 %v8932_v41  ;;  %v8885_v32 = vcombine.high %v1235_v45, %v1239_v20  ;;  %v8884_v60 = vcombine.low %v1235_v45, %v1239_v20 }
 0x44d   : > { %7708 = vmatprep.subr.bf16.mxu0 %v8797_v59  ;;  %7749 = vmatprep.subr.bf16.mxu1 %v8925_v42 }
 0x450   : > { %7709 = vmatpush2.bf16.msra.mxu0 %v8796_v18  ;;  %7750 = vmatpush2.bf16.msra.mxu1 %v8924_v54 }
 0x451   : > { %7710 = vmatprep.subr.bf16.mxu0 %v8789_v57  ;;  %7751 = vmatprep.subr.bf16.mxu1 %v8917_v62 }
 0x454   : > { %7711 = vmatpush2.bf16.msra.mxu0 %v8788_v3  ;;  %7752 = vmatpush2.bf16.msra.mxu1 %v8916_v40 }
 0x455   : > { %7712 = vmatprep.subr.bf16.mxu0 %v8781_v61  ;;  %7753 = vmatprep.subr.bf16.mxu1 %v8909_v4 }
 0x458   : > { %7713 = vmatpush2.bf16.msra.mxu0 %v8780_v7  ;;  %7754 = vmatpush2.bf16.msra.mxu1 %v8908_v48 }
 0x459   : > { %7714 = vmatprep.subr.bf16.mxu0 %v8773_v8  ;;  %7755 = vmatprep.subr.bf16.mxu1 %v8901_v10 }
 0x45c   : > { %7715 = vmatpush2.bf16.msra.mxu0 %v8772_v16  ;;  %7756 = vmatpush2.bf16.msra.mxu1 %v8900_v22 }
 0x45d   : > { %7716 = vmatprep.subr.bf16.mxu0 %v8765_v24  ;;  %7757 = vmatprep.subr.bf16.mxu1 %v8893_v23 }
 0x460   : > { %7717 = vmatpush2.bf16.msra.mxu0 %v8764_v9  ;;  %7758 = vmatpush2.bf16.msra.mxu1 %v8892_v27 }
 0x461   : > { %7718 = vmatprep.subr.bf16.mxu0 %v8757_v30  ;;  %7759 = vmatprep.subr.bf16.mxu1 %v8885_v32 }
 0x464   : > { %7719 = vmatpush2.bf16.msra.mxu0 %v8756_v33  ;;  %7760 = vmatpush2.bf16.msra.mxu1 %v8884_v60 }
 0x467   : > { %v7476_v2 = vpop.f32.mrf.mxu0  ;;  %7721 = vmatmul.mubr.bf16.vlgmr.msra.gmra.mxu0 %v9676_v50  ;;  %v7517_v35 = vpop.f32.mrf.mxu1  ;;  %7762 = vmatmul.mubr.bf16.vlgmr.msra.gmra.mxu1 %v9680_v55 }
 0x468   : > { %v7477_v17 = vadd.f32 %v7476_v2, %v1325_v34 }
 0x469   : > { %v7478_v12 = vpop.f32.mrf.mxu0  ;;  %v7519_v6 = vpop.f32.mrf.mxu1 }
 0x46a   : > { %v7518_v31 = vadd.f32 %v7517_v35, %v7477_v17  ;;  %v7479_v13 = vadd.f32 %v7478_v12, %v1329_v28 }
 0x46b   : > { %v7480_v37 = vpop.f32.mrf.mxu0  ;;  %v7521_v58 = vpop.f32.mrf.mxu1 }
 0x46c   : > { %v7520_v38 = vadd.f32 %v7519_v6, %v7479_v13 }
 0x46d   : > { %v7481_v26 = vpop.f32.mrf.mxu0  ;;  %v7522_v39 = vpop.f32.mrf.mxu1 }
 0x4a7   : > { %v7558_v41 = vpop.f32.mrf.mxu0  ;;  %v7599_v42 = vpop.f32.mrf.mxu1 }
 0x4a8   : > { %v7559_v59 = vadd.f32 %v7558_v41, %v7518_v31 }
 0x4a9   : > { %v7560_v43 = vpop.f32.mrf.mxu0  ;;  %v7601_v50 = vpop.f32.mrf.mxu1 }
 0x4aa   : > { %v7600_v14 = vadd.f32 %v7599_v42, %v7559_v59  ;;  %v7561_v44 = vadd.f32 %v7560_v43, %v7520_v38 }
 0x4ab   : > { %v7562_v49 = vpop.f32.mrf.mxu0  ;;  %v7603_v54 = vpop.f32.mrf.mxu1 }
 0x4ac   : > { %v7602_v18 = vadd.f32 %v7601_v50, %v7561_v44 }
 0x4ad   : > { %v7563_v55 = vpop.f32.mrf.mxu0  ;;  %v7604_v57 = vpop.f32.mrf.mxu1 }
 0x4e7   : > { %v7640_v62 = vpop.f32.mrf.mxu0  ;;  %v7681_v53 = vpop.f32.mrf.mxu1 }
 0x4e8   : > { %v7641_v4 = vadd.f32 %v7640_v62, %v7600_v14 }
 0x4e9   : > { %v7642_v36 = vpop.f32.mrf.mxu0  ;;  %v7683_v63 = vpop.f32.mrf.mxu1 }
 0x4ea   : > { %v7643_v5 = vadd.f32 %v7642_v36, %v7602_v18  ;;  %v7682_v1 = vadd.f32 %v7681_v53, %v7641_v4 }
 0x4eb   : > { %v7644_v0 = vpop.f32.mrf.mxu0  ;;  %v7685_v3 = vpop.f32.mrf.mxu1 }
 0x4ec   : > { %v7684_v47 = vadd.f32 %v7683_v63, %v7643_v5 }
 0x4ed   : > { %v7645_v40 = vpop.f32.mrf.mxu0  ;;  %v7686_v61 = vpop.f32.mrf.mxu1 }
 0x527   : > { %v7722_v52 = vpop.f32.mrf.mxu0  ;;  %v7763_v48 = vpop.f32.mrf.mxu1 }
 0x528   : > { %v7723_v7 = vadd.f32 %v7722_v52, %v7682_v1 }
 0x529   : > { %v7724_v8 = vpop.f32.mrf.mxu0  ;;  %v7765_v15 = vpop.f32.mrf.mxu1 }
 0x52a   : > { %v7764_v10 = vadd.f32 %v7763_v48, %v7723_v7  ;;  %v7725_v11 = vadd.f32 %v7724_v8, %v7684_v47 }
 0x52b   : > { %v7726_v51 = vpop.f32.mrf.mxu0  ;;  %v7767_v22 = vpop.f32.mrf.mxu1 }
 0x52c   : > { %v7776_v21 = vmax.f32 %v7764_v10, 0.0  ;;  %v7766_v16 = vadd.f32 %v7765_v15, %v7725_v11 }
 0x52d   : > { %v7727_v24 = vpop.f32.mrf.mxu0  ;;  %v7768_v19 = vpop.f32.mrf.mxu1 }
 0x52e   : > { %7784 = vst [vmem:[%s9925_s10 + $0x30] sm:$0xff] %v7776_v21  ;;  %v7777_v23 = vmax.f32 %v7766_v16, 0.0 }
 0x530   : > { %7785 = vst [vmem:[%s9925_s10 + $0x38] sm:$0xff] %v7777_v23 }
 0x531   : > { %9113 = shalt.err (!%p9110_p1)
}
 0x532   : > { %s9114_s21 = scalar_lea.hbm %s7799_s9, 1024  ;;  %s9118_s23 = scalar_lea.hbm %s10624_s3, 4096 }
 0x533   : > { %p9115_p6 = scmp.ne.s32.totalorder %s7799_s9, %s9114_s21  ;;  %p9119_p9 = scmp.lt.s32.totalorder %s7799_s9, %s10624_s3 }
 0x534   : > { %p9120_p3 = scmp.lt.s32.totalorder %s9118_s23, %s9114_s21 }
 0x535   : > { %p9116_p10 = pnand %p9115_p6, %p10638_p4 }
 0x536   : > { %p9121_p5 = por %p9120_p3, %p9119_p9 }
 0x537   : > { %p9117_p7 = pneg %p9116_p10 }
 0x539   : > { %p9122_p8 = pnand %p9121_p5, %p9117_p7 }
 0x53b   : > { %9125 = shalt.err (!%p9122_p8)
}
 0x53c   : > { %8958 = dma.vmem_to_hbm [thread:$0]  (%p10638_p4), %s7802_s5, 1024, %s7799_s9, %s7787_s6  }
 0x53d PF: > { %p8978_p12 = scmp.ge.s32.totalorder %s9168_s15, 2  ;;  %s7813_s27 = sand.u32 1, %s9156_s12  }
 0x53e   : > { %p10639_p0 = scmp.ne.s32.totalorder %s10632_s28, 0  ;;  %s7814_s4 = scalar_lea.sflag [#allocation4], %s7813_s27 }
 0x540   : > { %p8972_p11 = pnand %p8978_p12, %p10639_p0 }
 0x542   : > { %p8973_p2 = pneg %p8972_p11 }
 0x544   : > { %9151 = dma.done.wait (%p8973_p2), %s7814_s4, 1024  }
 0x545   : > { %9153 = vsyncadd (%p8973_p2), %s7814_s4, 4294966272  ;;  %p17_p13 = scmp.ge.s32.totalorder %s9218_s16, 6   ;;  %s10640_s12 = smov %s9160_s13 }
 0x546   : > { %s10641_s13 = smov %s9164_s14  ;;  %s10642_s14 = smov %s9228_s19 }
 0x547   : > { %s10643_s15 = smov %s9218_s16  ;;  %19 = sbr.rel (!%p17_p13) target bundleno = 6 (0x6), region = 93 }
 0x54c   :  { %7819 = vsyncpa [#allocation3], 1 }
 0x54d   :  { %7821 = vsyncpa [#allocation3 + $0x1], 1 }
 0x54e   :  { %7822 = vsyncpa [#allocation6], 1 }
 0x54f   :  { %7824 = vsyncpa [#allocation6 + $0x1], 1 }
 0x550   :  { %7825 = vsyncpa [#allocation4], 1 }
 0x551   :  { %7827 = vsyncpa [#allocation4 + $0x1], 1 }

</bundles_post_ra>
